<compile_context>
chip_gen: v5e
topology: v5e:2x2
jax: 0.10.0
libtpu: 0.0.40
codegen_flags: <defaults>
</compile_context>

<pallas_src>
import math
import functools

import jax
import jax.numpy as jnp
from jax.experimental import pallas as pl
from jax.experimental.pallas import tpu as pltpu

_MIB = 1024 * 1024


def _round_up(x: int, m: int) -> int:
    return ((x + m - 1) // m) * m


def _vmem_budget_bytes():
    """(physical VMEM, generation-aware limit with compiler-scratch headroom)."""
    try:
        cap = int(pltpu.get_tpu_info().vmem_capacity_bytes)
    except Exception:
        cap = 64 * _MIB  # conservative (v7x-sized) fallback
    headroom = max(cap // 8, 8 * _MIB)  # v7x: 8 MiB -> 56 MiB; v5e/v6e: 16 -> 112 MiB
    return cap, cap - headroom


# ---------------------------------------------------------------------------
# Variant 1: row-only grid, both weights fully resident in VMEM (bf16).
# ---------------------------------------------------------------------------
def _mlp_kernel_fused(x_ref, gamma_ref, beta_ref, w1_ref, b1_ref, w2_ref,
                      b2_ref, o_ref, *, eps: float):
    x = x_ref[...].astype(jnp.float32)

    # LayerNorm over the embed dim, stats in f32.
    mean = jnp.mean(x, axis=-1, keepdims=True)
    var = jnp.mean((x - mean) ** 2, axis=-1, keepdims=True)
    xn = (x - mean) * jax.lax.rsqrt(var + eps)
    xn = xn * gamma_ref[...] + beta_ref[...]                      # (tm, D) f32

    # Linear 1: bf16 operands on the MXU, f32 accumulation + f32 bias.
    h = jnp.dot(xn.astype(jnp.bfloat16), w1_ref[...],
                preferred_element_type=jnp.float32) + b1_ref[...]  # (tm, H)

    # GELU (exact erf, matching nn.GELU default).
    h = 0.5 * h * (1.0 + jax.lax.erf(h * (1.0 / math.sqrt(2.0))))

    # (Dropout: identity in eval mode.)

    # Linear 2: bf16 operands, f32 accumulation + f32 bias.
    out = jnp.dot(h.astype(jnp.bfloat16), w2_ref[...],
                  preferred_element_type=jnp.float32) + b2_ref[...]
    o_ref[...] = out.astype(o_ref.dtype)


# ---------------------------------------------------------------------------
# Variant 2: hidden dim tiled (for wide MLPs / tight VMEM, e.g. ViT-H on v7x).
# Grid = (rows, hidden_tiles); hidden axis is the reduction ("arbitrary").
# ---------------------------------------------------------------------------
def _mlp_kernel_htiled(x_ref, gamma_ref, beta_ref, w1_ref, b1_ref, w2_ref,
                       b2_ref, o_ref, xn_ref, acc_ref, *, eps: float):
    k = pl.program_id(1)

    @pl.when(k == 0)
    def _():
        x = x_ref[...].astype(jnp.float32)
        mean = jnp.mean(x, axis=-1, keepdims=True)
        var = jnp.mean((x - mean) ** 2, axis=-1, keepdims=True)
        xn = (x - mean) * jax.lax.rsqrt(var + eps)
        xn = xn * gamma_ref[...] + beta_ref[...]
        xn_ref[...] = xn.astype(jnp.bfloat16)       # LN computed once per row tile
        acc_ref[...] = jnp.zeros_like(acc_ref)

    # This hidden-dim slice of Linear1 -> GELU -> Linear2 partial sum.
    h = jnp.dot(xn_ref[...], w1_ref[...],
                preferred_element_type=jnp.float32) + b1_ref[...]   # (tm, th) f32
    h = 0.5 * h * (1.0 + jax.lax.erf(h * (1.0 / math.sqrt(2.0))))
    # (Dropout: identity in eval mode.)
    acc_ref[...] += jnp.dot(h.astype(jnp.bfloat16), w2_ref[...],
                            preferred_element_type=jnp.float32)

    @pl.when(k == pl.num_programs(1) - 1)
    def _():
        o_ref[...] = (acc_ref[...] + b2_ref[...]).astype(o_ref.dtype)


# ---------------------------------------------------------------------------
# Wrapper
# ---------------------------------------------------------------------------
def mlp_forward(x, gamma, beta, w1, b1, w2, b2, *, eps=1e-5,
                row_tile=None, h_tile=None):
    """x: (batch, seq, embed) -> (batch, seq, embed).

    w1: (embed, hidden), w2: (hidden, embed) -- i.e. nn.Linear weight.T.
    Weights should be stored bf16 at rest; other dtypes are cast here (extra
    HBM pass per call).  Output dtype == x.dtype.
    """
    B, S, D = x.shape
    H = w1.shape[1]
    assert w1.shape == (D, H) and w2.shape == (H, D), \
        "w1/w2 must be (embed,hidden)/(hidden,embed) = nn.Linear weight.T"
    assert b1.shape == (H,) and b2.shape == (D,)
    assert gamma.shape == (D,) and beta.shape == (D,)
    assert D % 128 == 0, "embed dim must be a multiple of 128 (pad upstream)"
    assert H % 128 == 0, "mlp hidden dim must be a multiple of 128"

    R = B * S
    x2 = x.reshape(R, D)

    # bf16 weights for MXU bf16 peak; only cast if the caller didn't already.
    w1b = w1 if w1.dtype == jnp.bfloat16 else w1.astype(jnp.bfloat16)
    w2b = w2 if w2.dtype == jnp.bfloat16 else w2.astype(jnp.bfloat16)

    # 1-D params as (1, N) f32 rows (clean VMEM blocks, f32 elementwise math).
    gamma2 = gamma.reshape(1, D).astype(jnp.float32)
    beta2 = beta.reshape(1, D).astype(jnp.float32)
    b1_2 = b1.reshape(1, H).astype(jnp.float32)
    b2_2 = b2.reshape(1, D).astype(jnp.float32)

    cap, vmem_limit = _vmem_budget_bytes()

    # Generation-aware row tile: bigger on 128 MiB parts (v5e/v6e), 256 on v7x.
    if row_tile is None:
        row_tile = 512 if cap >= 128 * _MIB else 256
    tm = min(int(row_tile), _round_up(R, 16))
    tm = max(16, _round_up(tm, 16))          # 16-row multiple (bf16 sublane packing)
    grid_rows = pl.cdiv(R, tm)               # partial tail handled by masked writeback

    # VMEM heuristic for the fused (weights-resident) path: single-buffered
    # bf16 weights + double-buffered x/out tiles + (tm,H) f32/bf16 intermediates.
    io_bytes = x2.dtype.itemsize
    fused_est = (2 * D * H * 2                 # W1 + W2, bf16, single-buffered
                 + 4 * tm * D * io_bytes       # x tile + out tile, double-buffered
                 + tm * H * 6                  # h in f32 + bf16 copy
                 + 2 * tm * D * 4)             # xn / misc f32 temporaries
    use_htiled = (h_tile is not None) or (fused_est > 0.75 * vmem_limit)

    if use_htiled and h_tile is None:
        for cand in (2048, 1536, 1024, 768, 512, 384, 256, 128):
            if cand <= H and H % cand == 0:
                h_tile = cand
                break
    if use_htiled:
        h_tile = int(h_tile)
        assert H % h_tile == 0, "h_tile must divide the hidden dim"

    if not use_htiled:
        out2 = pl.pallas_call(
            functools.partial(_mlp_kernel_fused, eps=eps),
            out_shape=jax.ShapeDtypeStruct((R, D), x.dtype),
            grid_spec=pltpu.PrefetchScalarGridSpec(
                num_scalar_prefetch=0,
                grid=(grid_rows,),
                in_specs=[
                    pl.BlockSpec((tm, D), lambda i: (i, 0)),              # x rows
                    pl.BlockSpec((1, D), lambda i: (0, 0),
                                 pipeline_mode=pl.Buffered(1)),           # gamma
                    pl.BlockSpec((1, D), lambda i: (0, 0),
                                 pipeline_mode=pl.Buffered(1)),           # beta
                    pl.BlockSpec((D, H), lambda i: (0, 0),
                                 pipeline_mode=pl.Buffered(1)),           # W1
                    pl.BlockSpec((1, H), lambda i: (0, 0),
                                 pipeline_mode=pl.Buffered(1)),           # b1
                    pl.BlockSpec((H, D), lambda i: (0, 0),
                                 pipeline_mode=pl.Buffered(1)),           # W2
                    pl.BlockSpec((1, D), lambda i: (0, 0),
                                 pipeline_mode=pl.Buffered(1)),           # b2
                ],
                out_specs=pl.BlockSpec((tm, D), lambda i: (i, 0)),
            ),
            compiler_params=pltpu.CompilerParams(
                dimension_semantics=("parallel",),
                vmem_limit_bytes=vmem_limit,
            ),
        )(x2, gamma2, beta2, w1b, b1_2, w2b, b2_2)
    else:
        kt = H // h_tile
        out2 = pl.pallas_call(
            functools.partial(_mlp_kernel_htiled, eps=eps),
            out_shape=jax.ShapeDtypeStruct((R, D), x.dtype),
            grid_spec=pltpu.PrefetchScalarGridSpec(
                num_scalar_prefetch=0,
                grid=(grid_rows, kt),
                in_specs=[
                    pl.BlockSpec((tm, D), lambda i, k: (i, 0)),           # x rows
                    pl.BlockSpec((1, D), lambda i, k: (0, 0),
                                 pipeline_mode=pl.Buffered(1)),           # gamma
                    pl.BlockSpec((1, D), lambda i, k: (0, 0),
                                 pipeline_mode=pl.Buffered(1)),           # beta
                    pl.BlockSpec((D, h_tile), lambda i, k: (0, k)),       # W1 slice
                    pl.BlockSpec((1, h_tile), lambda i, k: (0, k)),       # b1 slice
                    pl.BlockSpec((h_tile, D), lambda i, k: (k, 0)),       # W2 slice
                    pl.BlockSpec((1, D), lambda i, k: (0, 0),
                                 pipeline_mode=pl.Buffered(1)),           # b2
                ],
                out_specs=pl.BlockSpec((tm, D), lambda i, k: (i, 0)),
                scratch_shapes=[
                    pltpu.VMEM((tm, D), jnp.bfloat16),   # LayerNorm output (per row tile)
                    pltpu.VMEM((tm, D), jnp.float32),    # output accumulator
                ],
            ),
            compiler_params=pltpu.CompilerParams(
                dimension_semantics=("parallel", "arbitrary"),
                vmem_limit_bytes=vmem_limit,
            ),
        )(x2, gamma2, beta2, w1b, b1_2, w2b, b2_2)

    return out2.reshape(B, S, D)


# ---------------------------------------------------------------------------
# Pure-JAX reference (same math contract: bf16 matmul operands, f32 accum).
# ---------------------------------------------------------------------------
def _reference(x, gamma, beta, w1, b1, w2, b2, eps=1e-5):
    xf = x.astype(jnp.float32)
    mean = jnp.mean(xf, axis=-1, keepdims=True)
    var = jnp.mean((xf - mean) ** 2, axis=-1, keepdims=True)
    xn = (xf - mean) * jax.lax.rsqrt(var + eps) * gamma.astype(jnp.float32) \
        + beta.astype(jnp.float32)
    h = jnp.dot(xn.astype(jnp.bfloat16), w1.astype(jnp.bfloat16),
                preferred_element_type=jnp.float32) + b1.astype(jnp.float32)
    h = 0.5 * h * (1.0 + jax.lax.erf(h / math.sqrt(2.0)))
    out = jnp.dot(h.astype(jnp.bfloat16), w2.astype(jnp.bfloat16),
                  preferred_element_type=jnp.float32) + b2.astype(jnp.float32)
    return out.astype(x.dtype)


if __name__ == "__main__":
    # Small shapes consistent with the module (embed -> 4x hidden -> embed),
    # lane-dense D, token count that exercises tiling + a partial tail tile.
    B, S, D, H = 2, 100, 128, 512

    key = jax.random.PRNGKey(0)
    kx, kw1, kb1, kw2, kb2 = jax.random.split(key, 5)

    x = jax.random.normal(kx, (B, S, D), dtype=jnp.float32)

    # Deterministic parameter init; weights stored bf16 "at rest" so the
    # wrapper never re-casts them per call.
    gamma = jnp.ones((D,), jnp.float32)
    beta = jnp.zeros((D,), jnp.float32)
    w1 = (jax.random.normal(kw1, (D, H), jnp.float32)
          * (1.0 / math.sqrt(D))).astype(jnp.bfloat16)
    b1 = jax.random.normal(kb1, (H,), jnp.float32) * 0.01
    w2 = (jax.random.normal(kw2, (H, D), jnp.float32)
          * (1.0 / math.sqrt(H))).astype(jnp.bfloat16)
    b2 = jax.random.normal(kb2, (D,), jnp.float32) * 0.01

    ref = _reference(x, gamma, beta, w1, b1, w2, b2)

    # Path 1: fused (weights resident), small row tile so the demo runs a
    # multi-step parallel grid with a masked partial tail (200 rows, tm=64).
    out_fused = mlp_forward(x, gamma, beta, w1, b1, w2, b2, row_tile=64)
    out_fused = jax.block_until_ready(out_fused)
    assert out_fused.shape == (B, S, D)
    assert jnp.allclose(out_fused, ref, atol=2e-2, rtol=2e-2), \
        "fused kernel mismatch vs reference"

    # Path 2: hidden-dim-tiled variant (the wide-MLP / v7x structure),
    # forced here with h_tile=256 so the reduction axis has 2 steps.
    out_ht = mlp_forward(x, gamma, beta, w1, b1, w2, b2, row_tile=64, h_tile=256)
    out_ht = jax.block_until_ready(out_ht)
    assert out_ht.shape == (B, S, D)
    assert jnp.allclose(out_ht, ref, atol=2e-2, rtol=2e-2), \
        "h-tiled kernel mismatch vs reference"

    print("KERNEL_OK")
</pallas_src>

<mosaic_0001>
module attributes {stable_mosaic.version = 11 : i64} {
  func.func @_mlp_kernel_fused(%arg0: i32, %arg1: memref<64x128xf32, #tpu.memory_space<vmem>>, %arg2: memref<1x128xf32, #tpu.memory_space<vmem>>, %arg3: memref<1x128xf32, #tpu.memory_space<vmem>>, %arg4: memref<128x512xbf16, #tpu.memory_space<vmem>>, %arg5: memref<1x512xf32, #tpu.memory_space<vmem>>, %arg6: memref<512x128xbf16, #tpu.memory_space<vmem>>, %arg7: memref<1x128xf32, #tpu.memory_space<vmem>>, %arg8: memref<64x128xf32, #tpu.memory_space<vmem>>) attributes {dimension_semantics = [#tpu.dimension_semantics<parallel>], iteration_bounds = array<i64: 4>, scalar_prefetch = 0 : i64, scratch_operands = 0 : i64, tpu.core_type = #tpu.core_type<tc>, window_params = [{transform_indices = @transform_0, window_bounds = array<i64: 64, 128>}, {pipeline_mode = #tpu.pipeline_mode<synchronous>, transform_indices = @transform_1, window_bounds = array<i64: 1, 128>}, {pipeline_mode = #tpu.pipeline_mode<synchronous>, transform_indices = @transform_2, window_bounds = array<i64: 1, 128>}, {pipeline_mode = #tpu.pipeline_mode<synchronous>, transform_indices = @transform_3, window_bounds = array<i64: 128, 512>}, {pipeline_mode = #tpu.pipeline_mode<synchronous>, transform_indices = @transform_4, window_bounds = array<i64: 1, 512>}, {pipeline_mode = #tpu.pipeline_mode<synchronous>, transform_indices = @transform_5, window_bounds = array<i64: 512, 128>}, {pipeline_mode = #tpu.pipeline_mode<synchronous>, transform_indices = @transform_6, window_bounds = array<i64: 1, 128>}, {transform_indices = @transform_7, window_bounds = array<i64: 64, 128>}]} {
    %c0 = arith.constant 0 : index
    %c0_0 = arith.constant 0 : index
    %0 = vector.load %arg1[%c0, %c0_0] : memref<64x128xf32, #tpu.memory_space<vmem>>, vector<64x128xf32>
    %cst = arith.constant dense<0.000000e+00> : vector<64xf32>
    %1 = vector.multi_reduction <add>, %0, %cst [1] : vector<64x128xf32> to vector<64xf32>
    %2 = vector.shape_cast %1 : vector<64xf32> to vector<64x1xf32>
    %cst_1 = arith.constant 1.280000e+02 : f32
    %3 = vector.broadcast %cst_1 : f32 to vector<64x1xf32>
    %4 = arith.divf %2, %3 : vector<64x1xf32>
    %5 = vector.broadcast %4 : vector<64x1xf32> to vector<64x128xf32>
    %6 = arith.subf %0, %5 : vector<64x128xf32>
    %7 = arith.mulf %6, %6 : vector<64x128xf32>
    %cst_2 = arith.constant dense<0.000000e+00> : vector<64xf32>
    %8 = vector.multi_reduction <add>, %7, %cst_2 [1] : vector<64x128xf32> to vector<64xf32>
    %9 = vector.shape_cast %8 : vector<64xf32> to vector<64x1xf32>
    %cst_3 = arith.constant 1.280000e+02 : f32
    %10 = vector.broadcast %cst_3 : f32 to vector<64x1xf32>
    %11 = arith.divf %9, %10 : vector<64x1xf32>
    %12 = vector.broadcast %4 : vector<64x1xf32> to vector<64x128xf32>
    %13 = arith.subf %0, %12 : vector<64x128xf32>
    %cst_4 = arith.constant 9.99999974E-6 : f32
    %14 = vector.broadcast %cst_4 : f32 to vector<64x1xf32>
    %15 = arith.addf %11, %14 : vector<64x1xf32>
    %16 = math.rsqrt %15 : vector<64x1xf32>
    %17 = vector.broadcast %16 : vector<64x1xf32> to vector<64x128xf32>
    %18 = arith.mulf %13, %17 : vector<64x128xf32>
    %c0_5 = arith.constant 0 : index
    %c0_6 = arith.constant 0 : index
    %19 = vector.load %arg2[%c0_5, %c0_6] : memref<1x128xf32, #tpu.memory_space<vmem>>, vector<1x128xf32>
    %20 = vector.broadcast %19 : vector<1x128xf32> to vector<64x128xf32>
    %21 = arith.mulf %18, %20 : vector<64x128xf32>
    %c0_7 = arith.constant 0 : index
    %c0_8 = arith.constant 0 : index
    %22 = vector.load %arg3[%c0_7, %c0_8] : memref<1x128xf32, #tpu.memory_space<vmem>>, vector<1x128xf32>
    %23 = vector.broadcast %22 : vector<1x128xf32> to vector<64x128xf32>
    %24 = arith.addf %21, %23 : vector<64x128xf32>
    %25 = arith.truncf %24 : vector<64x128xf32> to vector<64x128xbf16>
    %c0_9 = arith.constant 0 : index
    %c0_10 = arith.constant 0 : index
    %26 = vector.load %arg4[%c0_9, %c0_10] : memref<128x512xbf16, #tpu.memory_space<vmem>>, vector<128x512xbf16>
    %cst_11 = arith.constant dense<0.000000e+00> : vector<64x512xf32>
    %27 = tpu.matmul %25, %26, %cst_11 {dimension_numbers = #tpu.dot_dimension_numbers<[1], [0], [0], [1], [0, 0, 1, 1], [], []>} : vector<64x128xbf16>, vector<128x512xbf16>, vector<64x512xf32> -> vector<64x512xf32>
    %c0_12 = arith.constant 0 : index
    %c0_13 = arith.constant 0 : index
    %28 = vector.load %arg5[%c0_12, %c0_13] : memref<1x512xf32, #tpu.memory_space<vmem>>, vector<1x512xf32>
    %29 = vector.broadcast %28 : vector<1x512xf32> to vector<64x512xf32>
    %30 = arith.addf %27, %29 : vector<64x512xf32>
    %cst_14 = arith.constant 5.000000e-01 : f32
    %31 = vector.broadcast %cst_14 : f32 to vector<64x512xf32>
    %32 = arith.mulf %31, %30 : vector<64x512xf32>
    %cst_15 = arith.constant 0.707106769 : f32
    %33 = vector.broadcast %cst_15 : f32 to vector<64x512xf32>
    %34 = arith.mulf %30, %33 : vector<64x512xf32>
    %35 = math.erf %34 : vector<64x512xf32>
    %cst_16 = arith.constant 1.000000e+00 : f32
    %36 = vector.broadcast %cst_16 : f32 to vector<64x512xf32>
    %37 = arith.addf %36, %35 : vector<64x512xf32>
    %38 = arith.mulf %32, %37 : vector<64x512xf32>
    %39 = arith.truncf %38 : vector<64x512xf32> to vector<64x512xbf16>
    %c0_17 = arith.constant 0 : index
    %c0_18 = arith.constant 0 : index
    %40 = vector.load %arg6[%c0_17, %c0_18] : memref<512x128xbf16, #tpu.memory_space<vmem>>, vector<512x128xbf16>
    %cst_19 = arith.constant dense<0.000000e+00> : vector<64x128xf32>
    %41 = tpu.matmul %39, %40, %cst_19 {dimension_numbers = #tpu.dot_dimension_numbers<[1], [0], [0], [1], [0, 0, 1, 1], [], []>} : vector<64x512xbf16>, vector<512x128xbf16>, vector<64x128xf32> -> vector<64x128xf32>
    %c0_20 = arith.constant 0 : index
    %c0_21 = arith.constant 0 : index
    %42 = vector.load %arg7[%c0_20, %c0_21] : memref<1x128xf32, #tpu.memory_space<vmem>>, vector<1x128xf32>
    %43 = vector.broadcast %42 : vector<1x128xf32> to vector<64x128xf32>
    %44 = arith.addf %41, %43 : vector<64x128xf32>
    %c0_22 = arith.constant 0 : index
    %c0_23 = arith.constant 0 : index
    %45 = vector.load %arg8[%c0_22, %c0_23] : memref<64x128xf32, #tpu.memory_space<vmem>>, vector<64x128xf32>
    tpu.vector_store %arg8[%c0_22, %c0_23], %44 {strides = array<i32>} : memref<64x128xf32, #tpu.memory_space<vmem>>, vector<64x128xf32>,
    return
  }
  func.func @transform_0(%arg0: i32) -> (i32, i32) {
    %c0_i32 = arith.constant 0 : i32
    %c0_i32_0 = arith.constant 0 : i32
    return %arg0, %c0_i32 : i32, i32
  }
  func.func @transform_1(%arg0: i32) -> (i32, i32) {
    %c0_i32 = arith.constant 0 : i32
    %c0_i32_0 = arith.constant 0 : i32
    %c0_i32_1 = arith.constant 0 : i32
    return %c0_i32, %c0_i32_0 : i32, i32
  }
  func.func @transform_2(%arg0: i32) -> (i32, i32) {
    %c0_i32 = arith.constant 0 : i32
    %c0_i32_0 = arith.constant 0 : i32
    %c0_i32_1 = arith.constant 0 : i32
    return %c0_i32, %c0_i32_0 : i32, i32
  }
  func.func @transform_3(%arg0: i32) -> (i32, i32) {
    %c0_i32 = arith.constant 0 : i32
    %c0_i32_0 = arith.constant 0 : i32
    %c0_i32_1 = arith.constant 0 : i32
    return %c0_i32, %c0_i32_0 : i32, i32
  }
  func.func @transform_4(%arg0: i32) -> (i32, i32) {
    %c0_i32 = arith.constant 0 : i32
    %c0_i32_0 = arith.constant 0 : i32
    %c0_i32_1 = arith.constant 0 : i32
    return %c0_i32, %c0_i32_0 : i32, i32
  }
  func.func @transform_5(%arg0: i32) -> (i32, i32) {
    %c0_i32 = arith.constant 0 : i32
    %c0_i32_0 = arith.constant 0 : i32
    %c0_i32_1 = arith.constant 0 : i32
    return %c0_i32, %c0_i32_0 : i32, i32
  }
  func.func @transform_6(%arg0: i32) -> (i32, i32) {
    %c0_i32 = arith.constant 0 : i32
    %c0_i32_0 = arith.constant 0 : i32
    %c0_i32_1 = arith.constant 0 : i32
    return %c0_i32, %c0_i32_0 : i32, i32
  }
  func.func @transform_7(%arg0: i32) -> (i32, i32) {
    %c0_i32 = arith.constant 0 : i32
    %c0_i32_0 = arith.constant 0 : i32
    return %arg0, %c0_i32 : i32, i32
  }
}

</mosaic_0001>

<bundles_post_ra>
// kernel: tpu_custom_call.1
= control target key start
LH: loop header
LB: loop body
LE: loop exit
PB: predicated region body
PF: predicated region fallthrough
CT: control target
= control target key end

     0   :  { %s5482_s0 = inlined_call_operand.hbm [shape: f32[200,128], index: 0, kind: input, shape index: {}]   ;;  %s5483_s1 = inlined_call_operand.hbm [shape: f32[1,128], index: 1, kind: input, shape index: {}]   ;;  %s5484_s2 = inlined_call_operand.vmem [shape: f32[1,128], index: 2, kind: input, shape index: {}]   ;;  %s5485_s3 = inlined_call_operand.hbm [shape: bf16[128,512], index: 3, kind: input, shape index: {}]   ;;  %s5486_s4 = inlined_call_operand.hbm [shape: f32[1,512], index: 4, kind: input, shape index: {}]   ;;  %s5487_s5 = inlined_call_operand.hbm [shape: bf16[512,128], index: 5, kind: input, shape index: {}]   ;;  %s5488_s6 = inlined_call_operand.vmem [shape: f32[1,128], index: 6, kind: input, shape index: {}]   ;;  %s5489_s7 = inlined_call_operand.hbm [shape: f32[200,128], index: 7, kind: output, shape index: {}]  }
   0x1   :  { %5514 = sst [smem:[#allocation40_spill]] %s5483_s1 }
   0x2   :  { %5515 = sst [smem:[#allocation41_spill]] %s5486_s4 }
   0x3   :  { %12 = vsyncpa [#allocation3], 0 }
   0x4   :  { %14 = vsyncpa [#allocation3 + $0x1], 0 }
   0x5   :  { %15 = vsyncpa [#allocation6], 0 }
   0x6   :  { %16 = vsyncpa [#allocation9], 0 }
   0x7   :  { %17 = vsyncpa [#allocation4], 0 }
   0x8   :  { %19 = vsyncpa [#allocation4 + $0x1], 0  ;;  %s3700_s24 = smov 0   ;;  %s3702_s25 = smov 0  }
   0x9   :  { %s3704_s26 = smov 0   ;;  %s3706_s27 = smov 0  }
   0xa LB: > { %s3721_s28 = sadd.s32 4294967295, %s3643_s27   ;;  %s2841_s29 = sadd.s32 4294967294, %s3643_s27   ;;  %s3643_s27 = sphi %s3706_s27, %s5641_s27   ;;  %s3639_s26 = sphi %s3704_s26, %s5645_s26   ;;  %s3635_s25 = sphi %s3702_s25, %s5644_s25   ;;  %s3631_s24 = sphi %s3700_s24, %s5643_s24  }
   0xb   : > { %s3725_s30 = sadd.s32 1, %s3643_s27   ;;  %s32_s8 = sadd.s32 1, %s3639_s26 }
   0xc   : > { %5516 = sst [smem:[#allocation16_spill]] %s3725_s30  ;;  %s29_s9 = ssub.s32 %s3643_s27, %s3725_s30 }
   0xd   : > { %p39_p0 = scmp.ne.s32.totalorder %s3639_s26, %s3635_s25  ;;  %p30_p1 = scmp.eq.s32.totalorder %s29_s9, 0 }
   0xe   : > { %p40_p2 = scmp.eq.s32.totalorder %s3643_s27, 0  ;;  %p45_p3 = scmp.ne.s32.totalorder %s3635_s25, %s3631_s24 }
   0xf   : > { %p5492_p4 = scmp.eq.s32.totalorder %s3721_s28, 0  ;;  %p195_p7 = scmp.eq.s32.totalorder %s3721_s28, 3 }
  0x10   : > { %s3737_s10 = scalar_select %p30_p1, %s3639_s26, %s32_s8  }
  0x11   : > { %p3739_p5 = por %p40_p2, %p39_p0  ;;  %p3745_p6 = por %p5492_p4, %p45_p3 }
  0x12   : > { %5517 = sst [smem:[#allocation17_spill]] %s3737_s10  ;;  %p201_p8 = scmp.eq.s32.totalorder %s2841_s29, 3 }
  0x13   : > { %p2842_p9 = scmp.ge.s32.totalorder %s3643_s27, 1  ;;  %p208_p10 = scmp.lt.s32.totalorder %s3643_s27, 5 }
  0x14   : > { %p3752_p11 = por %p195_p7, %p39_p0  ;;  %p3756_p12 = por %p201_p8, %p45_p3 }
  0x15   : > { %p3760_p13 = pnand %p2842_p9, %p208_p10  ;;  %s5523_s1 = sld [smem:[#allocation40_spill]] }
  0x16   : > { %s5521_s14 = scalar_select %p3756_p12, 1, 0 }
  0x17   : > { %p3243_p1 = pneg %p3760_p13  ;;  %s3645_s19 = smov [#allocation5]  }
  0x18   : > { %s222_s20 = sshll.u32 %s3645_s19, 4  ;;  %s5524_s4 = sld [smem:[#allocation41_spill]]  ;;  %s223_s20 = int_to_ptr.vmem [resolvable:$true] %s222_s20 }
  0x19   : > { %p3774_p0 = pnand %p3243_p1, %p5492_p4  ;;  %s3646_s8 = smov [#allocation8]  }
  0x1a   : > { %s251_s9 = sshll.u32 %s3646_s8, 4  ;;  %s234_s19 = sshll.u32 %s5485_s3, 4  ;;  %s252_s9 = int_to_ptr.vmem [resolvable:$true] %s251_s9  ;;  %s235_s19 = int_to_ptr.hbm [resolvable:$true] %s234_s19 }
  0x1b   : > { %s220_s18 = sshll.u32 %s5523_s1, 4  ;;  %s3647_s21 = smov [#allocation7]   ;;  %s221_s18 = int_to_ptr.hbm [resolvable:$true] %s220_s18 }
  0x1c   : > { %3246 = dma.hbm_to_vmem [thread:$0]  (!%p3774_p0), %s221_s18, 16, %s223_s20, [#allocation6]  }
  0x1d   : > { %s236_s22 = sshll.u32 %s3647_s21, 4  ;;  %s3648_s1 = smov 256   ;;  %s237_s22 = int_to_ptr.vmem [resolvable:$true] %s236_s22 }
  0x1e   : > { %s249_s23 = sshll.u32 %s5524_s4, 4  ;;  %s3649_s4 = smov 16   ;;  %s250_s23 = int_to_ptr.hbm [resolvable:$true] %s249_s23 }
  0x1f   : > { %3252 = dma.hbm_to_vmem [thread:$0]  (!%p3774_p0), %s250_s23, 64, %s252_s9, [#allocation9]  }
  0x20   : > { %3249 = dma.hbm_to_vmem [thread:$0]  (!%p3774_p0), %s235_s19, 4096, %s237_s22, [#allocation6], %s3648_s1, %s3648_s1, %s3649_s4  }
  0x21   : > { %s260_s18 = sshll.u32 %s5487_s5, 4  ;;  %s3650_s20 = smov [#allocation10]   ;;  %s261_s18 = int_to_ptr.hbm [resolvable:$true] %s260_s18 }
  0x22   : > { %s262_s30 = sshll.u32 %s3650_s20, 4  ;;  %s3651_s16 = smov 64   ;;  %s263_s30 = int_to_ptr.vmem [resolvable:$true] %s262_s30 }
  0x23   : > { %s3652_s17 = smov 4   ;;  %p2847_p2 = scmp.ge.s32.totalorder %s3643_s27, 4 }
  0x24   : > { %3255 = dma.hbm_to_vmem [thread:$0]  (!%p3774_p0), %s261_s18, 4096, %s263_s30, [#allocation9], %s3651_s16, %s3651_s16, %s3652_s17  }
  0x25   : > { %275 = sbr.rel (%p2847_p2) target bundleno = 78 (0x4e), region = 40 }
  0x2a   : > { %278 = sbr.rel (!%p3739_p5) target bundleno = 78 (0x4e), region = 44  ;;  %s279_s1 = sand.u32 (%p3739_p5), 1, %s3639_s26  }
  0x2b   : > { %s2849_s4 = sshll.u32 (%p3739_p5), %s3643_s27, 3  ;;  %s2848_s10 = sshll.u32 (%p3739_p5), %s279_s1, 6 }
  0x2c   : > { %s285_s23 = ssub.s32 (%p3739_p5), 25, %s2849_s4  ;;  %s3800_s30 = scalar_lea.sflag (%p3739_p5), [#allocation3], %s279_s1 }
  0x2d   : > { %p286_p3 = scmp.lt.s32.totalorder (%p3739_p5), %s285_s23, 8  ;;  %s283_s21 = scalar_lea.vmem (%p3739_p5), [#allocation2], %s2848_s10 }
  0x2f   : > { %s5647_s23 = smov (!%p286_p3, %s285_s23), 8 }
  0x30   : > { %s2850_s9 = sshll.u32 %s5647_s23, 3 }
  0x31   : > { %s289_s19 = ssub.s32 64, %s2850_s9 }
  0x32   : > { %s290_s29 = sshll.u32 %s289_s19, 4 }
  0x33   : > { %291 = vsyncadd %s3800_s30, %s290_s29  ;;  %p3803_p5 = scmp.ne.s32.totalorder %s2850_s9, 0  ;;  %s3159_s22 = sshll.u32 %s3643_s27, 6 }
  0x34   : > { %s294_s20 = scalar_lea.hbm %s5482_s0, %s3159_s22  ;;  %s3811_s16 = sshll.u32 %s283_s21, 4  ;;  %s299_s16 = int_to_ptr.vmem [resolvable:$true] %s3811_s16 }
  0x35   : > { %s296_s17 = sshll.u32 %s294_s20, 4  ;;  %s2854_s1 = sshll.u32 %s5647_s23, 7  ;;  %s3814_s17 = int_to_ptr.hbm [resolvable:$true] %s296_s17 }
  0x36   : > { %s3519_s4 = sshra.s32 %s3814_s17, 4  ;;  %s3521_s10 = sshrl.u32 %s2854_s1, 4  ;;  %s3520_s4 = int_to_ptr.hbm [resolvable:$true] %s3519_s4 }
  0x37   : > { %s3526_s9 = scalar_lea.hbm %s3520_s4, %s3521_s10  ;;  %s3530_s21 = scalar_lea.hbm %s5482_s0, 200 }
  0x38   : > { %p3527_p7 = scmp.ne.s32.totalorder %s3520_s4, %s3526_s9  ;;  %p3531_p10 = scmp.lt.s32.totalorder %s3520_s4, %s5482_s0 }
  0x39   : > { %p3532_p1 = scmp.lt.s32.totalorder %s3530_s21, %s3526_s9 }
  0x3a   : > { %p3528_p8 = pnand %p3527_p7, %p3803_p5 }
  0x3b   : > { %p3533_p0 = por %p3532_p1, %p3531_p10 }
  0x3c   : > { %p3529_p9 = pneg %p3528_p8 }
  0x3e   : > { %p3534_p2 = pnand %p3533_p0, %p3529_p9 }
  0x40   : > { %3537 = shalt.err (!%p3534_p2)
}
  0x41   : > { %s3538_s18 = sshra.s32 %s299_s16, 4  ;;  %s3653_s19 = smov [#allocation2]   ;;  %s3539_s18 = int_to_ptr.vmem [resolvable:$true] %s3538_s18 }
  0x42   : > { %s3545_s20 = scalar_lea.vmem %s3539_s18, %s3521_s10  ;;  %s3549_s29 = scalar_lea.vmem %s3653_s19, 128 }
  0x43   : > { %p3546_p3 = scmp.ne.s32.totalorder %s3539_s18, %s3545_s20  ;;  %p3551_p4 = scmp.lt.s32.totalorder %s3549_s29, %s3545_s20 }
  0x45   : > { %p3547_p7 = pnand %p3546_p3, %p3803_p5 }
  0x47   : > { %p3548_p8 = pneg %p3547_p7 }
  0x49   : > { %p3553_p12 = pnand %p3551_p4, %p3548_p8 }
  0x4b   : > { %3556 = shalt.err (!%p3553_p12)
}
  0x4c   : > { %s3654_s4 = smov 128   ;;  %s3655_s9 = smov 8  }
  0x4d   : > { %304 = dma.hbm_to_vmem [thread:$0]  (%p3803_p5), %s3814_s17, %s2854_s1, %s299_s16, %s3800_s30, %s3654_s4, %s3654_s4, %s3655_s9  }
  0x4e PF: > { %310 = sbr.rel (%p3760_p13) target bundleno = 1040 (0x410), region = 48 }
  0x53   : > { %s3843_s10 = sand.u32 1, %s3635_s25  }
  0x54   : > { %s2856_s21 = sshll.u32 %s3843_s10, 6  ;;  %s313_s22 = scalar_lea.sflag [#allocation3], %s3843_s10 }
  0x55   : > { %s3849_s8 = scalar_lea.vmem [#allocation2], %s2856_s21 }
  0x56   : > { %3614 = dma.done.wait (%p3745_p6), %s313_s22, 1024  }
  0x57   : > { %3616 = vsyncadd (%p3745_p6), %s313_s22, 4294966272  ;;  %p5527_p4 = scmp.eq.s32.totalorder %s3721_s28, 0 }
  0x59   : > { %3618 = dma.done.wait (%p5527_p4), [#allocation6], 4112   ;;  %p5528_p12 = pmov %p5527_p4 }
  0x5a   : > { %p5529_p13 = pmov %p5527_p4 }
  0x5b   : > { %3620 = vsyncadd (%p5528_p12), [#allocation6], 4294963184 }
  0x5c   : > { %3622 = dma.done.wait (%p5529_p13), [#allocation9], 4160   ;;  %p5530_p5 = pmov %p5527_p4 }
  0x5d   : > { %v382_v0 = vld [vmem:[%s3849_s8 + $0x20] sm:$0xff]  ;;  %v380_v1 = vld [vmem:[%s3849_s8 + $0x10] sm:$0xff]  ;;  %v383_v3 = vld [vmem:[%s3849_s8 + $0x28] sm:$0xff]  ;;  %v3656_v7 = vmov 128.0   ;;  %s5389_s11 = scalar_lea.vmem [#allocation11], %s2856_s21  ;;  %s2708_s16 = scalar_lea.sflag [#allocation4], %s3843_s10 }
  0x5e   : > { %3624 = vsyncadd (%p5530_p5), [#allocation9], 4294963136  ;;  %v378_v2 = vld [vmem:[%s3849_s8] sm:$0xff]  ;;  %394 = vadd.xlane.f32.xlu2 %v382_v0  ;;  %390 = vadd.xlane.f32.xlu1 %v380_v1  ;;  %v381_v4 = vld [vmem:[%s3849_s8 + $0x18] sm:$0xff]  ;;  %3317 = vrcp.f32 %v3656_v7  ;;  %s3151_s17 = sshll.u32 (%p3752_p11), %s3721_s28, 3 }
  0x5f   : > { %386 = vadd.xlane.f32.xlu0 %v378_v2  ;;  %v379_v5 = vld [vmem:[%s3849_s8 + $0x8] sm:$0xff]  ;;  %v384_v6 = vld [vmem:[%s3849_s8 + $0x30] sm:$0xff]  ;;  %v3888_v30 = vld [vmem:[%s3849_s8 + $0x38] sm:$0xff]  ;;  %s2716_s1 = ssub.s32 (%p3752_p11), 25, %s3151_s17 }
  0x60   : > { %v2976_v43 = vld [vmem:[#allocation7 + $0xe0] sm:$0xf]  ;;  %v3190_v44 = vld [vmem:[#allocation7 + $0xec] sm:$0xf0]  ;;  %v3188_v45 = vld [vmem:[#allocation7 + $0xe4] sm:$0xf] }
  0x61   : > { %v2977_v46 = vor.u32 %v3190_v44, %v2976_v43  ;;  %v2978_v47 = vld [vmem:[#allocation7 + $0xf0] sm:$0xf0]  ;;  %v2984_v48 = vld [vmem:[#allocation7 + $0xe8] sm:$0xf]  ;;  %v3191_v49 = vld [vmem:[#allocation7 + $0xf4] sm:$0xf0] }
  0x62   : > { %v2981_v50 = vor.u32 %v3188_v45, %v2978_v47  ;;  %v2985_v51 = vor.u32 %v3191_v49, %v2984_v48  ;;  %v3189_v52 = vld [vmem:[#allocation7 + $0xec] sm:$0xf]  ;;  %v2986_v53 = vld [vmem:[#allocation7 + $0xf8] sm:$0xf0]  ;;  %v2960_v55 = vld [vmem:[#allocation7 + $0xc0] sm:$0xf] }
  0x63   : > { %783 = vmatpush.bf16.msra.mxu0 %v2977_v46  ;;  %v2989_v54 = vor.u32 %v3189_v52, %v2986_v53  ;;  %v3186_v56 = vld [vmem:[#allocation7 + $0xcc] sm:$0xf0]  ;;  %v3184_v57 = vld [vmem:[#allocation7 + $0xc4] sm:$0xf]  ;;  %v2962_v59 = vld [vmem:[#allocation7 + $0xd0] sm:$0xf0] }
  0x64   : > { %v3318_v8 = vpop.eup %3317  ;;  %812 = vmatpush.bf16.msra.mxu1 %v2981_v50  ;;  %841 = vmatpush.bf16.msra.mxu2 %v2985_v51  ;;  %v2961_v58 = vor.u32 %v3186_v56, %v2960_v55  ;;  %v2968_v60 = vld [vmem:[#allocation7 + $0xc8] sm:$0xf]  ;;  %v3187_v61 = vld [vmem:[#allocation7 + $0xd4] sm:$0xf0]  ;;  %v2965_v62 = vor.u32 %v3184_v57, %v2962_v59  ;;  %v2946_v7 = vld [vmem:[#allocation7 + $0xb0] sm:$0xf0] }
  0x65   : > { %v403_v9 = vmul.f32 128.0, %v3318_v8  ;;  %vm407_vm0 = vweird.f32 %v3318_v8  ;;  %870 = vmatpush.bf16.msra.mxu3 %v2989_v54  ;;  %v2969_v63 = vor.u32 %v3187_v61, %v2968_v60  ;;  %v3173_v45 = vld [vmem:[#allocation7 + $0x6c] sm:$0xf]  ;;  %v2922_v46 = vld [vmem:[#allocation7 + $0x78] sm:$0xf0]  ;;  %p2717_p6 = scmp.lt.s32.totalorder (%p3752_p11), %s2716_s1, 8 }
  0x66   : > { %396 = vadd.xlane.f32.xlu2 %v383_v3  ;;  %392 = vadd.xlane.f32.xlu1 %v381_v4  ;;  %v2925_v47 = vor.u32 %v3173_v45, %v2922_v46  ;;  %v2896_v48 = vld [vmem:[#allocation7 + $0x40] sm:$0xf]  ;;  %v3170_v49 = vld [vmem:[#allocation7 + $0x4c] sm:$0xf0]  ;;  %v3168_v50 = vld [vmem:[#allocation7 + $0x44] sm:$0xf] }
  0x67   : > { %388 = vadd.xlane.f32.xlu0 %v379_v5  ;;  %v404_v10 = vsub.f32 1.0, %v403_v9  ;;  %784 = vmatpush.bf16.msra.mxu0 %v2961_v58  ;;  %v3183_v9 = vld [vmem:[#allocation7 + $0xb4] sm:$0xf0]  ;;  %v2897_v51 = vor.u32 %v3170_v49, %v2896_v48  ;;  %v2898_v52 = vld [vmem:[#allocation7 + $0x50] sm:$0xf0] }
  0x68   : > { %813 = vmatpush.bf16.msra.mxu1 %v2965_v62  ;;  %842 = vmatpush.bf16.msra.mxu2 %v2969_v63  ;;  %v2904_v53 = vld [vmem:[#allocation7 + $0x48] sm:$0xf]  ;;  %v3171_v54 = vld [vmem:[#allocation7 + $0x54] sm:$0xf0]  ;;  %v2901_v55 = vor.u32 %v3168_v50, %v2898_v52  ;;  %v3169_v57 = vld [vmem:[#allocation7 + $0x4c] sm:$0xf] }
  0x69   : > { %v405_v11 = vmul.f32 %v3318_v8, %v404_v10  ;;  %v2905_v56 = vor.u32 %v3171_v54, %v2904_v53  ;;  %v2906_v58 = vld [vmem:[#allocation7 + $0x58] sm:$0xf0]  ;;  %v2880_v60 = vld [vmem:[#allocation7 + $0x20] sm:$0xf]  ;;  %v3166_v61 = vld [vmem:[#allocation7 + $0x2c] sm:$0xf0] }
  0x6a   : > { %v2909_v59 = vor.u32 %v3169_v57, %v2906_v58  ;;  %v3164_v62 = vld [vmem:[#allocation7 + $0x24] sm:$0xf]  ;;  %v2881_v63 = vor.u32 %v3166_v61, %v2880_v60 }
  0x6b   : > { %v406_v12 = vadd.f32 %v3318_v8, %v405_v11 }
  0x6d   : > { %v3870_v13 = vsel %vm407_vm0, %v3318_v8, %v406_v12  ;;  %v2952_v8 = vld [vmem:[#allocation7 + $0xa8] sm:$0xf]  ;;  %v3181_v12 = vld [vmem:[#allocation7 + $0xac] sm:$0xf] }
  0x6e   : > { %398 = vadd.xlane.f32.xlu2 %v384_v6  ;;  %v2953_v11 = vor.u32 %v3183_v9, %v2952_v8 }
  0x70   : > { %843 = vmatpush.bf16.msra.mxu2 %v2953_v11  ;;  %v3162_v11 = vld [vmem:[#allocation7 + $0xc] sm:$0xf0] }
  0xd1   : > { %v395_v14 = vpop.xlane.xlu2 %394  ;;  %v391_v15 = vpop.xlane.xlu1 %390 }
  0xd2   : > { %v387_v16 = vpop.xlane.xlu0 %386  ;;  %v413_v26 = vmul.f32 %v3870_v13, %v395_v14  ;;  %v411_v27 = vmul.f32 %v3870_v13, %v391_v15  ;;  %v2954_v14 = vld [vmem:[#allocation7 + $0xb8] sm:$0xf0] }
  0xd3   : > { %v409_v17 = vmul.f32 %v3870_v13, %v387_v16  ;;  %v2957_v15 = vor.u32 %v3181_v12, %v2954_v14  ;;  %v2928_v16 = vld [vmem:[#allocation7 + $0x80] sm:$0xf]  ;;  %v3160_v12 = vld [vmem:[#allocation7 + $0x4] sm:$0xf] }
  0xd4   : > { %v3892_v32 = vsub.f32 %v382_v0, %v413_v26  ;;  %v3894_v33 = vsub.f32 %v380_v1, %v411_v27  ;;  %v3185_v0 = vld [vmem:[#allocation7 + $0xcc] sm:$0xf]  ;;  %v2970_v1 = vld [vmem:[#allocation7 + $0xd8] sm:$0xf0] }
  0xd5   : > { %v3873_v18 = vsub.f32 %v378_v2, %v409_v17  ;;  %v2973_v2 = vor.u32 %v3185_v0, %v2970_v1  ;;  %v3178_v17 = vld [vmem:[#allocation7 + $0x8c] sm:$0xf0]  ;;  %v3177_v27 = vld [vmem:[#allocation7 + $0x8c] sm:$0xf]  ;;  %v2882_v0 = vld [vmem:[#allocation7 + $0x30] sm:$0xf0] }
  0xd6   : > { %v429_v38 = vmul.f32 %v3892_v32, %v3892_v32  ;;  %v427_v39 = vmul.f32 %v3894_v33, %v3894_v33  ;;  %v2888_v1 = vld [vmem:[#allocation7 + $0x28] sm:$0xf] }
  0xd7   : > { %v425_v19 = vmul.f32 %v3873_v18, %v3873_v18  ;;  %871 = vmatpush.bf16.msra.mxu3 %v2973_v2  ;;  %v3167_v2 = vld [vmem:[#allocation7 + $0x34] sm:$0xf0] }
  0xd9   : > { %433 = vadd.xlane.f32.xlu0 %v425_v19  ;;  %v397_v20 = vpop.xlane.xlu2 %396  ;;  %v393_v21 = vpop.xlane.xlu1 %392  ;;  %v3176_v19 = vld [vmem:[#allocation7 + $0x84] sm:$0xf] }
  0xda   : > { %v412_v22 = vmul.f32 %v3870_v13, %v393_v21  ;;  %v389_v23 = vpop.xlane.xlu0 %388  ;;  %v414_v37 = vmul.f32 %v3870_v13, %v397_v20  ;;  %v2929_v20 = vor.u32 %v3178_v17, %v2928_v16  ;;  %v2930_v21 = vld [vmem:[#allocation7 + $0x90] sm:$0xf0]  ;;  %v2872_v17 = vld [vmem:[#allocation7 + $0x8] sm:$0xf] }
  0xdb   : > { %v410_v24 = vmul.f32 %v3870_v13, %v389_v23  ;;  %872 = vmatpush.bf16.msra.mxu3 %v2957_v15  ;;  %v3179_v23 = vld [vmem:[#allocation7 + $0x94] sm:$0xf0]  ;;  %v2866_v16 = vld [vmem:[#allocation7 + $0x10] sm:$0xf0] }
  0xdc   : > { %v3879_v25 = vsub.f32 %v381_v4, %v412_v22  ;;  %v3907_v41 = vsub.f32 %v383_v3, %v414_v37  ;;  %v2944_v3 = vld [vmem:[#allocation7 + $0xa0] sm:$0xf]  ;;  %v3182_v4 = vld [vmem:[#allocation7 + $0xac] sm:$0xf0]  ;;  %v2936_v22 = vld [vmem:[#allocation7 + $0x88] sm:$0xf] }
  0xdd   : > { %v3883_v28 = vsub.f32 %v379_v5, %v410_v24  ;;  %v3180_v5 = vld [vmem:[#allocation7 + $0xa4] sm:$0xf]  ;;  %v2933_v24 = vor.u32 %v3176_v19, %v2930_v21  ;;  %v2937_v26 = vor.u32 %v3179_v23, %v2936_v22  ;;  %v2869_v19 = vor.u32 %v3160_v12, %v2866_v16  ;;  %v3161_v21 = vld [vmem:[#allocation7 + $0xc] sm:$0xf]  ;;  %v2874_v22 = vld [vmem:[#allocation7 + $0x18] sm:$0xf0] }
  0xde   : > { %v428_v29 = vmul.f32 %v3879_v25, %v3879_v25  ;;  %v430_v42 = vmul.f32 %v3907_v41, %v3907_v41  ;;  %v2949_v10 = vor.u32 %v3180_v5, %v2946_v7  ;;  %v3172_v37 = vld [vmem:[#allocation7 + $0x64] sm:$0xf]  ;;  %v2889_v5 = vor.u32 %v3167_v2, %v2888_v1  ;;  %v2890_v7 = vld [vmem:[#allocation7 + $0x38] sm:$0xf0] }
  0xdf   : > { %v426_v31 = vmul.f32 %v3883_v28, %v3883_v28  ;;  %844 = vmatpush.bf16.msra.mxu2 %v2937_v26  ;;  %v3942_v12 = vld [vmem:[%s5484_s2] ss:$0 sm:$0xff] }
  0xe0   : > { %439 = vadd.xlane.f32.xlu2 %v428_v29  ;;  %814 = vmatpush.bf16.msra.mxu1 %v2949_v10  ;;  %v2938_v29 = vld [vmem:[#allocation7 + $0x98] sm:$0xf0]  ;;  %v2864_v10 = vld [vmem:[#allocation7] sm:$0xf] }
  0xe1   : > { %400 = vadd.xlane.f32.xlu0 %v3888_v30  ;;  %435 = vadd.xlane.f32.xlu1 %v426_v31  ;;  %v399_v34 = vpop.xlane.xlu2 %398  ;;  %v2941_v31 = vor.u32 %v3177_v27, %v2938_v29  ;;  %v2865_v15 = vor.u32 %v3162_v11, %v2864_v10 }
  0xe2   : > { %v415_v35 = vmul.f32 %v3870_v13, %v399_v34  ;;  %v2912_v34 = vld [vmem:[#allocation7 + $0x60] sm:$0xf] }
  0xe3   : > { %873 = vmatpush.bf16.msra.mxu3 %v2941_v31 }
  0xe4   : > { %v3898_v36 = vsub.f32 %v384_v6, %v415_v35  ;;  %v2945_v6 = vor.u32 %v3182_v4, %v2944_v3  ;;  %815 = vmatpush.bf16.msra.mxu1 %v2933_v24  ;;  %v3174_v35 = vld [vmem:[#allocation7 + $0x6c] sm:$0xf0]  ;;  %v2885_v4 = vor.u32 %v3164_v62, %v2882_v0  ;;  %v2877_v24 = vor.u32 %v3161_v21, %v2874_v22 }
  0xe6   : > { %v431_v40 = vmul.f32 %v3898_v36, %v3898_v36  ;;  %785 = vmatpush.bf16.msra.mxu0 %v2945_v6  ;;  %v3165_v6 = vld [vmem:[#allocation7 + $0x2c] sm:$0xf] }
  0xe7   : > { %874 = vmatpush.bf16.msra.mxu3 %v2925_v47  ;;  %v2893_v9 = vor.u32 %v3165_v6, %v2890_v7 }
  0xe8   : > { %445 = vadd.xlane.f32.xlu2 %v431_v40  ;;  %v2920_v40 = vld [vmem:[#allocation7 + $0x68] sm:$0xf] }
  0xe9   : > { %441 = vadd.xlane.f32.xlu0 %v429_v38  ;;  %437 = vadd.xlane.f32.xlu1 %v427_v39  ;;  %v2913_v38 = vor.u32 %v3174_v35, %v2912_v34  ;;  %v2914_v39 = vld [vmem:[#allocation7 + $0x70] sm:$0xf0] }
  0xea   : > { %786 = vmatpush.bf16.msra.mxu0 %v2929_v20  ;;  %v2917_v43 = vor.u32 %v3172_v37, %v2914_v39  ;;  %v3163_v20 = vld [vmem:[#allocation7 + $0x14] sm:$0xf0] }
  0xeb   : > { %875 = vmatpush.bf16.msra.mxu3 %v2909_v59  ;;  %v2873_v23 = vor.u32 %v3163_v20, %v2872_v17 }
  0xec   : > { %816 = vmatpush.bf16.msra.mxu1 %v2917_v43 }
  0xee   : > { %787 = vmatpush.bf16.msra.mxu0 %v2913_v38 }
  0xef   : > { %876 = vmatpush.bf16.msra.mxu3 %v2893_v9 }
  0xf0   : > { %817 = vmatpush.bf16.msra.mxu1 %v2901_v55 }
  0xf1   : > { %443 = vadd.xlane.f32.xlu1 %v430_v42  ;;  %v3175_v42 = vld [vmem:[#allocation7 + $0x74] sm:$0xf0] }
  0xf2   : > { %v2921_v44 = vor.u32 %v3175_v42, %v2920_v40  ;;  %788 = vmatpush.bf16.msra.mxu0 %v2897_v51 }
  0xf3   : > { %877 = vmatpush.bf16.msra.mxu3 %v2877_v24 }
  0xf4   : > { %845 = vmatpush.bf16.msra.mxu2 %v2921_v44  ;;  %818 = vmatpush.bf16.msra.mxu1 %v2885_v4 }
  0xf6   : > { %789 = vmatpush.bf16.msra.mxu0 %v2881_v63 }
  0xf8   : > { %846 = vmatpush.bf16.msra.mxu2 %v2905_v56  ;;  %819 = vmatpush.bf16.msra.mxu1 %v2869_v19 }
  0xfa   : > { %790 = vmatpush.bf16.msra.mxu0 %v2865_v15 }
  0xfc   : > { %847 = vmatpush.bf16.msra.mxu2 %v2889_v5  ;;  %v3935_v5 = vld [vmem:[#allocation5] ss:$0 sm:$0xff] }
 0x100   : > { %848 = vmatpush.bf16.msra.mxu2 %v2873_v23 }
 0x14c   : > { %v434_v3 = vpop.xlane.xlu0 %433 }
 0x14d   : > { %v449_v8 = vmul.f32 %v434_v3, %v3870_v13 }
 0x14f   : > { %v457_v14 = vadd.f32 1e-05, %v449_v8 }
 0x151   : > { %3319 = vrsqrt.f32 %v457_v14  ;;  %vm471_vm2 = vweird.f32 %v457_v14 }
 0x153   : > { %v440_v26 = vpop.xlane.xlu2 %439 }
 0x154   : > { %v452_v27 = vmul.f32 %v440_v26, %v3870_v13  ;;  %v436_v29 = vpop.xlane.xlu1 %435  ;;  %v401_v31 = vpop.xlane.xlu0 %400 }
 0x155   : > { %v450_v34 = vmul.f32 %v436_v29, %v3870_v13  ;;  %v416_v35 = vmul.f32 %v3870_v13, %v401_v31 }
 0x156   : > { %v3915_v37 = vadd.f32 1e-05, %v452_v27 }
 0x157   : > { %v3320_v38 = vpop.eup %3319  ;;  %v458_v39 = vadd.f32 1e-05, %v450_v34  ;;  %v3918_v40 = vsub.f32 %v3888_v30, %v416_v35 }
 0x158   : > { %v466_v42 = vmul.f32 %v3320_v38, %v457_v14  ;;  %3321 = vrsqrt.f32 %v3915_v37  ;;  %vm472_vm1 = vweird.f32 %v3320_v38  ;;  %vm501_vm9 = vweird.f32 %v3915_v37 }
 0x159   : > { %3323 = vrsqrt.f32 %v458_v39  ;;  %v432_v43 = vmul.f32 %v3918_v40, %v3918_v40  ;;  %vm473_vm3 = vmor %vm471_vm2, %vm472_vm1  ;;  %vm481_vm4 = vweird.f32 %v458_v39 }
 0x15a   : > { %v467_v44 = vmul.f32 %v3320_v38, %v466_v42 }
 0x15b   : > { %447 = vadd.xlane.f32.xlu0 %v432_v43 }
 0x15c   : > { %v468_v45 = vmul.f32 0.5, %v467_v44  ;;  %v438_v46 = vpop.xlane.xlu1 %437  ;;  %v442_v48 = vpop.xlane.xlu0 %441 }
 0x15d   : > { %v451_v47 = vmul.f32 %v438_v46, %v3870_v13  ;;  %v453_v53 = vmul.f32 %v442_v48, %v3870_v13 }
 0x15e   : > { %v3924_v49 = vpop.eup %3321  ;;  %v469_v50 = vsub.f32 1.5, %v468_v45 }
 0x15f   : > { %v3324_v51 = vpop.eup %3323  ;;  %v459_v30 = vadd.f32 1e-05, %v451_v47  ;;  %v496_v55 = vmul.f32 %v3924_v49, %v3915_v37  ;;  %v3929_v58 = vadd.f32 1e-05, %v453_v53  ;;  %vm502_vm10 = vweird.f32 %v3924_v49 }
 0x160   : > { %v476_v52 = vmul.f32 %v3324_v51, %v458_v39  ;;  %v470_v54 = vmul.f32 %v3320_v38, %v469_v50  ;;  %vm482_vm5 = vweird.f32 %v3324_v51  ;;  %vm503_vm12 = vmor %vm501_vm9, %vm502_vm10 }
 0x161   : > { %3325 = vrsqrt.f32 %v459_v30  ;;  %v497_v61 = vmul.f32 %v3924_v49, %v496_v55  ;;  %vm483_vm6 = vmor %vm481_vm4, %vm482_vm5  ;;  %vm491_vm7 = vweird.f32 %v459_v30  ;;  %vm511_vm15 = vweird.f32 %v3929_v58 }
 0x162   : > { %v477_v56 = vmul.f32 %v3324_v51, %v476_v52  ;;  %v474_v60 = vsel %vm473_vm3, %v3320_v38, %v470_v54  ;;  %3327 = vrsqrt.f32 %v3929_v58 }
 0x163   : > { %v545_v2 = vmul.f32 %v474_v60, %v3873_v18  ;;  %v498_v6 = vmul.f32 0.5, %v497_v61 }
 0x164   : > { %v478_v57 = vmul.f32 0.5, %v477_v56  ;;  %v444_v59 = vpop.xlane.xlu1 %443  ;;  %v446_v56 = vpop.xlane.xlu2 %445 }
 0x165   : > { %v454_v62 = vmul.f32 %v444_v59, %v3870_v13  ;;  %v557_v11 = vmul.f32 %v3935_v5, %v545_v2  ;;  %v499_v18 = vsub.f32 1.5, %v498_v6 }
 0x166   : > { %v479_v63 = vsub.f32 1.5, %v478_v57  ;;  %v455_v57 = vmul.f32 %v446_v56, %v3870_v13 }
 0x167   : > { %v3326_v0 = vpop.eup %3325  ;;  %v462_v1 = vadd.f32 1e-05, %v454_v62  ;;  %v569_v20 = vadd.f32 %v3942_v12, %v557_v11  ;;  %v500_v21 = vmul.f32 %v3924_v49, %v499_v18 }
 0x168   : > { %v480_v3 = vmul.f32 %v3324_v51, %v479_v63  ;;  %v486_v4 = vmul.f32 %v3326_v0, %v459_v30  ;;  %vm492_vm8 = vweird.f32 %v3326_v0  ;;  %v3328_v15 = vpop.eup %3327 }
 0x169   : > { %3329 = vrsqrt.f32 %v462_v1  ;;  %vm493_vm11 = vmor %vm491_vm7, %vm492_vm8  ;;  %v506_v22 = vmul.f32 %v3328_v15, %v3929_v58  ;;  %v504_v29 = vsel %vm503_vm12, %v3924_v49, %v500_v21  ;;  %vm521_vm13 = vweird.f32 %v462_v1 }
 0x16a   : > { %v484_v7 = vsel %vm483_vm6, %v3324_v51, %v480_v3  ;;  %v487_v8 = vmul.f32 %v3326_v0, %v486_v4  ;;  %v548_v37 = vmul.f32 %v504_v29, %v3879_v25  ;;  %vm512_vm0 = vweird.f32 %v3328_v15 }
 0x16b   : > { %v546_v9 = vmul.f32 %v484_v7, %v3883_v28  ;;  %v507_v31 = vmul.f32 %v3328_v15, %v506_v22  ;;  %vm513_vm2 = vmor %vm511_vm15, %vm512_vm0  ;;  %v463_v58 = vadd.f32 1e-05, %v455_v57 }
 0x16c   : > { %v488_v10 = vmul.f32 0.5, %v487_v8  ;;  %v560_v43 = vmul.f32 %v3935_v5, %v548_v37 }
 0x16d   : > { %v558_v14 = vmul.f32 %v3935_v5, %v546_v9  ;;  %v508_v38 = vmul.f32 0.5, %v507_v31  ;;  %3331 = vrsqrt.f32 %v463_v58  ;;  %vm531_vm3 = vweird.f32 %v463_v58 }
 0x16e   : > { %v489_v16 = vsub.f32 1.5, %v488_v10 }
 0x16f   : > { %v570_v28 = vadd.f32 %v3942_v12, %v558_v14  ;;  %v3330_v17 = vpop.eup %3329  ;;  %v509_v44 = vsub.f32 1.5, %v508_v38 }
 0x170   : > { %v490_v19 = vmul.f32 %v3326_v0, %v489_v16  ;;  %v516_v23 = vmul.f32 %v3330_v17, %v462_v1  ;;  %vm522_vm14 = vweird.f32 %v3330_v17 }
 0x171   : > { %v577_v24 = vpack.c.bf16 %v570_v28, %v569_v20  ;;  %vm523_vm1 = vmor %vm521_vm13, %vm522_vm14  ;;  %v510_v47 = vmul.f32 %v3328_v15, %v509_v44 }
 0x172   : > { %v494_v26 = vsel %vm493_vm11, %v3326_v0, %v490_v19  ;;  %v517_v27 = vmul.f32 %v3330_v17, %v516_v23 }
 0x173   : > { %791 = vmatmul.bf16.vlgmr.msra.gmra.mxu0 %v577_v24  ;;  %820 = vmatmul.bf16.vlgmr.msra.gmra.mxu1 %v577_v24  ;;  %v547_v34 = vmul.f32 %v494_v26, %v3894_v33  ;;  %v572_v33 = vadd.f32 %v3942_v12, %v560_v43  ;;  %v514_v49 = vsel %vm513_vm2, %v3328_v15, %v510_v47 }
 0x174   : > { %849 = vmatmul.bf16.vlgmr.msra.gmra.mxu2 %v577_v24  ;;  %878 = vmatmul.bf16.vlgmr.msra.gmra.mxu3 %v577_v24  ;;  %v518_v35 = vmul.f32 0.5, %v517_v27  ;;  %v549_v51 = vmul.f32 %v514_v49, %v3892_v32 }
 0x175   : > { %v559_v39 = vmul.f32 %v3935_v5, %v547_v34 }
 0x176   : > { %v519_v42 = vsub.f32 1.5, %v518_v35  ;;  %v561_v52 = vmul.f32 %v3935_v5, %v549_v51 }
 0x177   : > { %v571_v45 = vadd.f32 %v3942_v12, %v559_v39 }
 0x178   : > { %v520_v46 = vmul.f32 %v3330_v17, %v519_v42  ;;  %v573_v54 = vadd.f32 %v3942_v12, %v561_v52 }
 0x179   : > { %v578_v25 = vpack.c.bf16 %v572_v33, %v571_v45 }
 0x17a   : > { %v524_v48 = vsel %vm523_vm1, %v3330_v17, %v520_v46  ;;  %v613_v17 = vld [vmem:[#allocation8] sm:$0xf] }
 0x17b   : > { %v550_v50 = vmul.f32 %v524_v48, %v3907_v41  ;;  %v3332_v41 = vpop.eup %3331  ;;  %v3975_v19 = vperm.slane %v613_v17, 1  ;;  %v3989_v23 = vperm.slane %v613_v17, 2  ;;  %v3991_v24 = vperm.slane %v613_v17, 3 }
 0x17c   : > { %v526_v32 = vmul.f32 %v3332_v41, %v463_v58  ;;  %vm532_vm4 = vweird.f32 %v3332_v41 }
 0x17d   : > { %v562_v30 = vmul.f32 %v3935_v5, %v550_v50  ;;  %vm533_vm5 = vmor %vm531_vm3, %vm532_vm4  ;;  %5532 = vst [vmem:[#allocation19_spill] sm:$0xff] %v3975_v19 }
 0x17e   : > { %v527_v59 = vmul.f32 %v3332_v41, %v526_v32  ;;  %5533 = vst [vmem:[#allocation20_spill] sm:$0xff] %v3989_v23 }
 0x17f   : > { %v574_v53 = vadd.f32 %v3942_v12, %v562_v30  ;;  %5534 = vst [vmem:[#allocation21_spill] sm:$0xff] %v3991_v24 }
 0x180   : > { %v528_v63 = vmul.f32 0.5, %v527_v59 }
 0x181   : > { %v579_v55 = vpack.c.bf16 %v574_v53, %v573_v54 }
 0x182   : > { %v529_v0 = vsub.f32 1.5, %v528_v63 }
 0x183   : > { %796 = vmatmul.bf16.gmra.mxu0 %v578_v25  ;;  %825 = vmatmul.bf16.gmra.mxu1 %v578_v25 }
 0x184   : > { %854 = vmatmul.bf16.gmra.mxu2 %v578_v25  ;;  %883 = vmatmul.bf16.gmra.mxu3 %v578_v25  ;;  %v530_v2 = vmul.f32 %v3332_v41, %v529_v0 }
 0x186   : > { %v534_v6 = vsel %vm533_vm5, %v3332_v41, %v530_v2 }
 0x187   : > { %v551_v9 = vmul.f32 %v534_v6, %v3898_v36  ;;  %v3973_v36 = vperm.slane %v613_v17, 0 }
 0x189   : > { %v563_v18 = vmul.f32 %v3935_v5, %v551_v9  ;;  %5531 = vst [vmem:[#allocation18_spill] sm:$0xff] %v3973_v36 }
 0x18b   : > { %v575_v15 = vadd.f32 %v3942_v12, %v563_v18 }
 0x193   : > { %801 = vmatmul.bf16.gmra.mxu0 %v579_v55  ;;  %830 = vmatmul.bf16.gmra.mxu1 %v579_v55 }
 0x194   : > { %859 = vmatmul.bf16.gmra.mxu2 %v579_v55  ;;  %888 = vmatmul.bf16.gmra.mxu3 %v579_v55 }
 0x1ce   : > { %v448_v60 = vpop.xlane.xlu0 %447 }
 0x1cf   : > { %v456_v61 = vmul.f32 %v448_v60, %v3870_v13 }
 0x1d1   : > { %v464_v62 = vadd.f32 1e-05, %v456_v61 }
 0x1d3   : > { %3333 = vrsqrt.f32 %v464_v62  ;;  %vm541_vm7 = vweird.f32 %v464_v62 }
 0x1d9   : > { %v3334_v1 = vpop.eup %3333 }
 0x1da   : > { %v536_v3 = vmul.f32 %v3334_v1, %v464_v62  ;;  %vm542_vm6 = vweird.f32 %v3334_v1 }
 0x1db   : > { %vm543_vm8 = vmor %vm541_vm7, %vm542_vm6 }
 0x1dc   : > { %v537_v4 = vmul.f32 %v3334_v1, %v536_v3 }
 0x1de   : > { %v538_v7 = vmul.f32 0.5, %v537_v4 }
 0x1e0   : > { %v539_v8 = vsub.f32 1.5, %v538_v7 }
 0x1e2   : > { %v540_v10 = vmul.f32 %v3334_v1, %v539_v8 }
 0x1e4   : > { %v544_v13 = vsel %vm543_vm8, %v3334_v1, %v540_v10 }
 0x1e5   : > { %v552_v11 = vmul.f32 %v544_v13, %v3918_v40 }
 0x1e7   : > { %v564_v14 = vmul.f32 %v3935_v5, %v552_v11 }
 0x1e9   : > { %v576_v16 = vadd.f32 %v3942_v12, %v564_v14 }
 0x1eb   : > { %v580_v28 = vpack.c.bf16 %v576_v16, %v575_v15 }
 0x1ed   : > { %806 = vmatmul.bf16.gmra.mxu0 %v580_v28  ;;  %835 = vmatmul.bf16.gmra.mxu1 %v580_v28 }
 0x1ee   : > { %864 = vmatmul.bf16.gmra.mxu2 %v580_v28  ;;  %893 = vmatmul.bf16.gmra.mxu3 %v580_v28 }
 0x1f0   : > { %v792_v20 = vpop.f32.mrf.mxu0  ;;  %v821_v40 = vpop.f32.mrf.mxu1 }
 0x1f1   : > { %v3978_v21 = vadd.f32 %v792_v20, %v3973_v36  ;;  %v3981_v5 = vadd.f32 %v821_v40, %v3975_v19 }
 0x1f3   : > { %v3984_v12 = vmul.f32 0.70710677, %v3978_v21  ;;  %v3987_v22 = vmul.f32 0.70710677, %v3981_v5 }
 0x1f5   : > { %v963_v26 = vmul.f32 %v3984_v12, %v3984_v12  ;;  %v1003_v27 = vmul.f32 %v3987_v22, %v3987_v22 }
 0x1f7   : > { %v3997_v29 = vmin.f32 %v963_v26, 16.0  ;;  %v3999_v31 = vmin.f32 %v1003_v27, 16.0  ;;  %v850_v34 = vpop.f32.mrf.mxu2  ;;  %v879_v35 = vpop.f32.mrf.mxu3 }
 0x1f8   : > { %v4002_v37 = vadd.f32 %v850_v34, %v3989_v23  ;;  %v4005_v38 = vadd.f32 %v879_v35, %v3991_v24  ;;  %v794_v59 = vpop.f32.mrf.mxu0 }
 0x1f9   : > { %v965_v39 = vmul.f32 2.1237322e-06, %v3997_v29  ;;  %v976_v42 = vmul.f32 3.8918573e-05, %v3997_v29  ;;  %v1005_v43 = vmul.f32 2.1237322e-06, %v3999_v31  ;;  %v4035_v3 = vadd.f32 %v794_v59, %v3973_v36 }
 0x1fa   : > { %v1016_v44 = vmul.f32 3.8918573e-05, %v3999_v31  ;;  %v4012_v45 = vmul.f32 0.70710677, %v4002_v37  ;;  %v4017_v49 = vmul.f32 0.70710677, %v4005_v38 }
 0x1fb   : > { %v966_v46 = vadd.f32 0.00028619796, %v965_v39  ;;  %v977_v33 = vadd.f32 0.001143296, %v976_v42  ;;  %v1006_v47 = vadd.f32 0.00028619796, %v1005_v43 }
 0x1fc   : > { %v1017_v25 = vadd.f32 0.001143296, %v1016_v44  ;;  %v1043_v48 = vmul.f32 %v4012_v45, %v4012_v45  ;;  %v1083_v54 = vmul.f32 %v4017_v49, %v4017_v49  ;;  %v4045_v16 = vmul.f32 0.70710677, %v4035_v3 }
 0x1fd   : > { %v967_v50 = vmul.f32 %v966_v46, %v3997_v29  ;;  %v978_v51 = vmul.f32 %v977_v33, %v3997_v29  ;;  %v1007_v30 = vmul.f32 %v1006_v47, %v3999_v31 }
 0x1fe   : > { %v1018_v52 = vmul.f32 %v1017_v25, %v3999_v31  ;;  %v4023_v53 = vmin.f32 %v1043_v48, 16.0  ;;  %v4029_v32 = vmin.f32 %v1083_v54, 16.0  ;;  %v1123_v44 = vmul.f32 %v4045_v16, %v4045_v16 }
 0x1ff   : > { %v979_v55 = vadd.f32 0.014752088, %v978_v51  ;;  %v968_v58 = vadd.f32 0.0036580483, %v967_v50  ;;  %v1008_v60 = vadd.f32 0.0036580483, %v1007_v30  ;;  %v823_v50 = vpop.f32.mrf.mxu1 }
 0x200   : > { %v1019_v56 = vadd.f32 0.014752088, %v1018_v52  ;;  %v1056_v57 = vmul.f32 3.8918573e-05, %v4023_v53  ;;  %v1045_v0 = vmul.f32 2.1237322e-06, %v4023_v53 }
 0x201   : > { %v980_v41 = vmul.f32 %v979_v55, %v3997_v29  ;;  %v969_v4 = vmul.f32 %v968_v58, %v3997_v29  ;;  %v1096_v7 = vmul.f32 3.8918573e-05, %v4029_v32  ;;  %v1009_v8 = vmul.f32 %v1008_v60, %v3999_v31 }
 0x202   : > { %v1020_v61 = vmul.f32 %v1019_v56, %v3999_v31  ;;  %v1057_v62 = vadd.f32 0.001143296, %v1056_v57  ;;  %v1046_v11 = vadd.f32 0.00028619796, %v1045_v0  ;;  %v1085_v18 = vmul.f32 2.1237322e-06, %v4029_v32 }
 0x203   : > { %v981_v63 = vadd.f32 0.112945676, %v980_v41  ;;  %v970_v28 = vadd.f32 0.05243302, %v969_v4  ;;  %v1097_v20 = vadd.f32 0.001143296, %v1096_v7  ;;  %v824_v57 = vadd.f32 %v823_v50, %v3975_v19 }
 0x204   : > { %v1021_v1 = vadd.f32 0.112945676, %v1020_v61  ;;  %v1058_v2 = vmul.f32 %v1057_v62, %v4023_v53  ;;  %v1010_v40 = vadd.f32 0.05243302, %v1009_v8  ;;  %v1047_v35 = vmul.f32 %v1046_v11, %v4023_v53  ;;  %v852_v11 = vpop.f32.mrf.mxu2 }
 0x205   : > { %v982_v6 = vmul.f32 %v981_v63, %v3997_v29  ;;  %v1086_v39 = vadd.f32 0.00028619796, %v1085_v18  ;;  %v971_v46 = vmul.f32 %v970_v28, %v3997_v29  ;;  %v1098_v33 = vmul.f32 %v1097_v20, %v4029_v32 }
 0x206   : > { %v1022_v9 = vmul.f32 %v1021_v1, %v3999_v31  ;;  %v1059_v10 = vadd.f32 0.014752088, %v1058_v2  ;;  %v1011_v47 = vmul.f32 %v1010_v40, %v3999_v31  ;;  %v1048_v25 = vadd.f32 0.0036580483, %v1047_v35 }
 0x207   : > { %v983_v13 = vadd.f32 0.4994258, %v982_v6  ;;  %v1087_v48 = vmul.f32 %v1086_v39, %v4029_v32  ;;  %v4063_v30 = vmin.f32 %v1123_v44, 16.0  ;;  %v972_v52 = vadd.f32 0.18741608, %v971_v46 }
 0x208   : > { %v1023_v14 = vadd.f32 0.4994258, %v1022_v9  ;;  %v1060_v15 = vmul.f32 %v1059_v10, %v4023_v53  ;;  %v1099_v54 = vadd.f32 0.014752088, %v1098_v33  ;;  %v1012_v55 = vadd.f32 0.18741608, %v1011_v47 }
 0x209   : > { %v984_v17 = vmul.f32 %v983_v13, %v3997_v29  ;;  %v1049_v41 = vmul.f32 %v1048_v25, %v4023_v53  ;;  %v1088_v59 = vadd.f32 0.0036580483, %v1087_v48  ;;  %v1136_v62 = vmul.f32 3.8918573e-05, %v4063_v30 }
 0x20a   : > { %v1024_v26 = vmul.f32 %v1023_v14, %v3999_v31  ;;  %v1061_v27 = vadd.f32 0.112945676, %v1060_v15  ;;  %v1100_v60 = vmul.f32 %v1099_v54, %v4029_v32  ;;  %v973_v0 = vmul.f32 %v972_v52, %v3997_v29 }
 0x20b   : > { %v4049_v34 = vadd.f32 1.0, %v984_v17  ;;  %v4080_v4 = vmul.f32 0.5, %v3978_v21  ;;  %v4083_v6 = vmul.f32 0.5, %v3981_v5  ;;  %v1013_v7 = vmul.f32 %v1012_v55, %v3999_v31 }
 0x20c   : > { %v4052_v42 = vadd.f32 1.0, %v1024_v26  ;;  %v1062_v43 = vmul.f32 %v1061_v27, %v4023_v53  ;;  %v1101_v2 = vadd.f32 0.112945676, %v1100_v60  ;;  %v4086_v8 = vmul.f32 0.70710677, %v824_v57 }
 0x20d   : > { %3335 = vrcp.f32 %v4049_v34  ;;  %v4089_v9 = vmul.f32 0.5, %v4002_v37  ;;  %v1050_v10 = vadd.f32 0.05243302, %v1049_v41  ;;  %v1089_v29 = vmul.f32 %v1088_v59, %v4029_v32 }
 0x20e   : > { %3337 = vrcp.f32 %v4052_v42  ;;  %v1063_v51 = vadd.f32 0.4994258, %v1062_v43  ;;  %v1102_v13 = vmul.f32 %v1101_v2, %v4029_v32  ;;  %v4097_v5 = vmul.f32 0.5, %v4005_v38 }
 0x20f   : > { %v1137_v31 = vadd.f32 0.001143296, %v1136_v62  ;;  %v974_v18 = vadd.f32 1.1283791, %v973_v0  ;;  %v4100_v37 = vmul.f32 0.5, %v4035_v3  ;;  %v1163_v20 = vmul.f32 %v4086_v8, %v4086_v8 }
 0x210   : > { %v1064_v56 = vmul.f32 %v1063_v51, %v4023_v53  ;;  %v1103_v15 = vadd.f32 0.4994258, %v1102_v13  ;;  %v1014_v28 = vadd.f32 1.1283791, %v1013_v7  ;;  %v853_v40 = vadd.f32 %v852_v11, %v3989_v23 }
 0x211   : > { %v1138_v17 = vmul.f32 %v1137_v31, %v4063_v30  ;;  %v995_v26 = vand.u32 2147483647, %v4049_v34  ;;  %v1051_v38 = vmul.f32 %v1050_v10, %v4023_v53  ;;  %v1090_v27 = vadd.f32 0.05243302, %v1089_v29 }
 0x212   : > { %v4071_v61 = vadd.f32 1.0, %v1064_v56  ;;  %v1104_v35 = vmul.f32 %v1103_v15, %v4029_v32  ;;  %v1125_v43 = vmul.f32 2.1237322e-06, %v4063_v30  ;;  %v4110_v44 = vmul.f32 0.5, %v824_v57 }
 0x213   : > { %v4067_v58 = vpop.eup %3335  ;;  %v1139_v3 = vadd.f32 0.014752088, %v1138_v17  ;;  %v975_v46 = vmul.f32 %v974_v18, %v3984_v12  ;;  %vm991_vm9 = vweird.f32 %v4049_v34  ;;  %v4115_v47 = vmin.f32 %v1163_v20, 16.0 }
 0x214   : > { %v4074_v63 = vpop.eup %3337  ;;  %v987_v1 = vmul.f32 %v4067_v58, %v4049_v34  ;;  %3339 = vrcp.f32 %v4071_v61  ;;  %v997_v48 = vand.u32 2147483648, %v4049_v34  ;;  %v4121_v50 = vmul.f32 %v1014_v28, %v3987_v22 }
 0x215   : > { %v1027_v21 = vmul.f32 %v4074_v63, %v4052_v42  ;;  %v4123_v51 = vadd.f32 1.0, %v1104_v35  ;;  %v4125_v52 = vmul.f32 0.70710677, %v853_v40  ;;  %vm1031_vm10 = vweird.f32 %v4052_v42 }
 0x216   : > { %v988_v14 = vsub.f32 1.0, %v987_v1  ;;  %v1052_v12 = vadd.f32 0.18741608, %v1051_v38  ;;  %v1091_v54 = vmul.f32 %v1090_v27, %v4029_v32  ;;  %v1140_v55 = vmul.f32 %v1139_v3, %v4063_v30 }
 0x217   : > { %v1028_v39 = vsub.f32 1.0, %v1027_v21  ;;  %vm992_vm11 = vweird.f32 %v4067_v58  ;;  %vm4131_vm12 = vcmp.eq.f32.partialorder %v995_v26, 8.507059e+37  ;;  %v1126_v57 = vadd.f32 0.00028619796, %v1125_v43 }
 0x218   : > { %v989_v33 = vmul.f32 %v4067_v58, %v988_v14  ;;  %3341 = vrcp.f32 %v4123_v51  ;;  %v1165_v60 = vmul.f32 2.1237322e-06, %v4115_v47  ;;  %v1035_v62 = vand.u32 2147483647, %v4052_v42  ;;  %vm4152_vm13 = vmor %vm991_vm9, %vm992_vm11 }
 0x219   : > { %v1029_v22 = vmul.f32 %v4074_v63, %v1028_v39  ;;  %v1037_v0 = vand.u32 2147483648, %v4052_v42  ;;  %v1141_v1 = vadd.f32 0.112945676, %v1140_v55  ;;  %v1203_v2 = vmul.f32 %v4125_v52, %v4125_v52  ;;  %v881_v42 = vpop.f32.mrf.mxu3 }
 0x21a   : > { %v4117_v25 = vpop.eup %3339  ;;  %v990_v41 = vadd.f32 %v4067_v58, %v989_v33  ;;  %v998_v7 = vor.u32 1.1754944e-38, %v997_v48  ;;  %v1053_v10 = vmul.f32 %v1052_v12, %v4023_v53  ;;  %v1092_v29 = vadd.f32 0.18741608, %v1091_v54 }
 0x21b   : > { %v1067_v59 = vmul.f32 %v4117_v25, %v4071_v61  ;;  %v4146_v13 = vmul.f32 0.5, %v853_v40  ;;  %vm1032_vm14 = vweird.f32 %v4074_v63  ;;  %v1127_v21 = vmul.f32 %v1126_v57, %v4063_v30 }
 0x21c   : > { %v1142_v31 = vmul.f32 %v1141_v1, %v4063_v30  ;;  %v1176_v18 = vmul.f32 3.8918573e-05, %v4115_v47  ;;  %v994_v53 = vsel %vm4152_vm13, %v4067_v58, %v990_v41  ;;  %v1030_v14 = vadd.f32 %v4074_v63, %v1029_v22  ;;  %vm4180_vm0 = vmor %vm1031_vm10, %vm1032_vm14 }
 0x21d   : > { %v1068_v15 = vsub.f32 1.0, %v1067_v59  ;;  %v1166_v34 = vadd.f32 0.00028619796, %v1165_v60  ;;  %vm4164_vm15 = vcmp.eq.f32.partialorder %v1035_v62, 8.507059e+37  ;;  %v4168_v40 = vmin.f32 %v1203_v2, 16.0 }
 0x21e   : > { %v1143_v17 = vadd.f32 0.4994258, %v1142_v31  ;;  %v1177_v20 = vadd.f32 0.001143296, %v1176_v18  ;;  %v4170_v26 = vpop.eup %3341  ;;  %v1038_v38 = vor.u32 1.1754944e-38, %v1037_v0  ;;  %v1093_v58 = vmul.f32 %v1092_v29, %v4029_v32 }
 0x21f   : > { %v1054_v27 = vadd.f32 1.1283791, %v1053_v10  ;;  %v1075_v35 = vand.u32 2147483647, %v4071_v61  ;;  %v999_v39 = vsel %vm4131_vm12, %v998_v7, %v994_v53  ;;  %v1128_v3 = vadd.f32 0.0036580483, %v1127_v21 }
 0x220   : > { %v1144_v33 = vmul.f32 %v1143_v17, %v4063_v30  ;;  %v1178_v48 = vmul.f32 %v1177_v20, %v4115_v47  ;;  %v1034_v32 = vsel %vm4180_vm0, %v4074_v63, %v1030_v14  ;;  %v1069_v12 = vmul.f32 %v4117_v25, %v1068_v15  ;;  %v797_v17 = vpop.f32.mrf.mxu0 }
 0x221   : > { %v1077_v54 = vand.u32 2147483648, %v4071_v61  ;;  %v1167_v55 = vmul.f32 %v1166_v34, %v4115_v47  ;;  %v1107_v56 = vmul.f32 %v4170_v26, %v4123_v51  ;;  %v1216_v41 = vmul.f32 3.8918573e-05, %v4168_v40 }
 0x222   : > { %v4194_v22 = vadd.f32 1.0, %v1144_v33  ;;  %v1179_v57 = vadd.f32 0.014752088, %v1178_v48  ;;  %v1000_v59 = vmul.f32 %v999_v39, %v975_v46  ;;  %v1055_v60 = vmul.f32 %v1054_v27, %v4012_v45 }
 0x223   : > { %vm1071_vm1 = vweird.f32 %v4071_v61  ;;  %v1094_v63 = vadd.f32 1.1283791, %v1093_v58  ;;  %v1039_v62 = vsel %vm4164_vm15, %v1038_v38, %v1034_v32  ;;  %vm4201_vm2 = vcmp.eq.f32.partialorder %v1075_v35, 8.507059e+37 }
 0x224   : > { %v1129_v1 = vmul.f32 %v1128_v3, %v4063_v30  ;;  %3343 = vrcp.f32 %v4194_v22  ;;  %v4208_v2 = vadd.f32 %v881_v42, %v3991_v24  ;;  %v1078_v46 = vor.u32 1.1754944e-38, %v1077_v54 }
 0x225   : > { %v1168_v7 = vadd.f32 0.0036580483, %v1167_v55  ;;  %v1180_v45 = vmul.f32 %v1179_v57, %v4115_v47  ;;  %v1205_v10 = vmul.f32 2.1237322e-06, %v4168_v40  ;;  %v1070_v29 = vadd.f32 %v4117_v25, %v1069_v12 }
 0x226   : > { %vm1072_vm3 = vweird.f32 %v4117_v25  ;;  %v1108_v11 = vsub.f32 1.0, %v1107_v56  ;;  %v1217_v21 = vadd.f32 0.001143296, %v1216_v41  ;;  %v2990_v31 = vclamps-f32 %v1000_v59, 1.0 }
 0x227   : > { %v1040_v18 = vmul.f32 %v1039_v62, %v4121_v50  ;;  %v4216_v53 = vmul.f32 %v1094_v63, %v4017_v49  ;;  %v1181_v14 = vadd.f32 0.112945676, %v1180_v45  ;;  %vm1111_vm4 = vweird.f32 %v4123_v51  ;;  %vm4225_vm5 = vmor %vm1071_vm1, %vm1072_vm3 }
 0x228   : > { %v1130_v15 = vadd.f32 0.05243302, %v1129_v1  ;;  %v1218_v34 = vmul.f32 %v1217_v21, %v4168_v40  ;;  %v4221_v28 = vmul.f32 0.70710677, %v4208_v2  ;;  %v1115_v50 = vand.u32 2147483647, %v4123_v51 }
 0x229   : > { %v1169_v49 = vmul.f32 %v1168_v7, %v4115_v47  ;;  %v1182_v38 = vmul.f32 %v1181_v14, %v4115_v47  ;;  %v1206_v27 = vadd.f32 0.00028619796, %v1205_v10  ;;  %v1074_v58 = vsel %vm4225_vm5, %v4117_v25, %v1070_v29 }
 0x22a   : > { %v4232_v35 = vpop.eup %3343  ;;  %v1109_v39 = vmul.f32 %v4170_v26, %v1108_v11  ;;  %v1219_v61 = vadd.f32 0.014752088, %v1218_v34  ;;  %v1243_v43 = vmul.f32 %v4221_v28, %v4221_v28  ;;  %v2991_v3 = vclamps-f32 %v1040_v18, 1.0 }
 0x22b   : > { %v1117_v33 = vand.u32 2147483648, %v4123_v51  ;;  %v1147_v48 = vmul.f32 %v4232_v35, %v4194_v22  ;;  %v4244_v32 = vadd.f32 %v797_v17, %v3973_v36  ;;  %v1131_v12 = vmul.f32 %v1130_v15, %v4063_v30 }
 0x22c   : > { %v1183_v54 = vadd.f32 0.4994258, %v1182_v38  ;;  %v1220_v25 = vmul.f32 %v1219_v61, %v4168_v40  ;;  %v4248_v55 = vmin.f32 %v1243_v43, 16.0  ;;  %v1079_v42 = vsel %vm4201_vm2, %v1078_v46, %v1074_v58  ;;  %v826_v46 = vpop.f32.mrf.mxu1 }
 0x22d   : > { %vm1112_vm6 = vweird.f32 %v4170_v26  ;;  %v1170_v56 = vadd.f32 0.05243302, %v1169_v49  ;;  %v1207_v57 = vmul.f32 %v1206_v27, %v4168_v40  ;;  %v1110_v41 = vadd.f32 %v4170_v26, %v1109_v39 }
 0x22e   : > { %v1184_v59 = vmul.f32 %v1183_v54, %v4115_v47  ;;  %v1221_v63 = vadd.f32 0.112945676, %v1220_v25  ;;  %v1245_v62 = vmul.f32 2.1237322e-06, %v4248_v55  ;;  %v4257_v1 = vadd.f32 1.0, %v2990_v31  ;;  %vm4270_vm7 = vmor %vm1111_vm4, %vm1112_vm6 }
 0x22f   : > { %v1148_v7 = vsub.f32 1.0, %v1147_v48  ;;  %v1256_v45 = vmul.f32 3.8918573e-05, %v4248_v55  ;;  %v4261_v0 = vmul.f32 0.70710677, %v4244_v32  ;;  %v1080_v10 = vmul.f32 %v1079_v42, %v1055_v60 }
 0x230   : > { %v4263_v29 = vadd.f32 1.0, %v1184_v59  ;;  %v1222_v11 = vmul.f32 %v1221_v63, %v4168_v40  ;;  %v1246_v21 = vadd.f32 0.00028619796, %v1245_v62  ;;  %v1118_v18 = vor.u32 1.1754944e-38, %v1117_v33 }
 0x231   : > { %v1171_v14 = vmul.f32 %v1170_v56, %v4115_v47  ;;  %v1208_v15 = vadd.f32 0.0036580483, %v1207_v57  ;;  %v1257_v34 = vadd.f32 0.001143296, %v1256_v45  ;;  %v1114_v60 = vsel %vm4270_vm7, %v4170_v26, %v1110_v41  ;;  %v855_v56 = vpop.f32.mrf.mxu2 }
 0x232   : > { %v1132_v17 = vadd.f32 0.18741608, %v1131_v12  ;;  %3345 = vrcp.f32 %v4263_v29  ;;  %v4280_v20 = vadd.f32 %v826_v46, %v3975_v19  ;;  %v1149_v51 = vmul.f32 %v4232_v35, %v1148_v7 }
 0x233   : > { %v1223_v49 = vadd.f32 0.4994258, %v1222_v11  ;;  %v1247_v38 = vmul.f32 %v1246_v21, %v4248_v55  ;;  %v1283_v27 = vmul.f32 %v4261_v0, %v4261_v0  ;;  %v2244_v58 = vadd.f32 1.0, %v2991_v3  ;;  %v3215_v21 = vld [vmem:[#allocation10 + $0xb8] sm:$0xff] }
 0x234   : > { %v2992_v39 = vclamps-f32 %v1080_v10, 1.0  ;;  %vm1116_vm8 = vcmp.eq.f32.partialorder %v1115_v50, 8.507059e+37  ;;  %v1258_v61 = vmul.f32 %v1257_v34, %v4248_v55  ;;  %v1172_v43 = vadd.f32 0.18741608, %v1171_v14  ;;  %2641 = vmatpush.bf16.msrb.mxu2 %v3215_v21 }
 0x235   : > { %v1119_v26 = vsel %vm1116_vm8, %v1118_v18, %v1114_v60  ;;  %v1209_v33 = vmul.f32 %v1208_v15, %v4168_v40  ;;  %v1224_v48 = vmul.f32 %v1223_v49, %v4168_v40  ;;  %v1133_v12 = vmul.f32 %v1132_v17, %v4063_v30  ;;  %v3199_v18 = vld [vmem:[#allocation10 + $0x38] sm:$0xff] }
 0x236   : > { %v1248_v54 = vadd.f32 0.0036580483, %v1247_v38  ;;  %v1259_v25 = vadd.f32 0.014752088, %v1258_v61  ;;  %v4291_v42 = vmul.f32 0.70710677, %v4280_v20  ;;  %v1150_v3 = vadd.f32 %v4232_v35, %v1149_v51  ;;  %2583 = vmatpush.bf16.msrb.mxu0 %v3199_v18 }
 0x237   : > { %vm1152_vm9 = vweird.f32 %v4232_v35  ;;  %v1157_v50 = vand.u32 2147483648, %v4194_v22  ;;  %v4296_v57 = vmin.f32 %v1283_v27, 16.0  ;;  %v1120_v59 = vmul.f32 %v1119_v26, %v4216_v53  ;;  %v3207_v60 = vld [vmem:[#allocation10 + $0x78] sm:$0xff]  ;;  %v3198_v26 = vld [vmem:[#allocation10 + $0x30] sm:$0xff] }
 0x238   : > { %v4298_v41 = vpop.eup %3345  ;;  %v4301_v63 = vadd.f32 1.0, %v1224_v48  ;;  %v1260_v30 = vmul.f32 %v1259_v25, %v4248_v55  ;;  %v1323_v62 = vmul.f32 %v4291_v42, %v4291_v42  ;;  %vm1151_vm10 = vweird.f32 %v4194_v22  ;;  %2612 = vmatpush.bf16.msrb.mxu1 %v3207_v60 }
 0x239   : > { %v1155_v7 = vand.u32 2147483647, %v4194_v22  ;;  %v1210_v45 = vadd.f32 0.05243302, %v1209_v33  ;;  %v4309_v46 = vadd.f32 %v855_v56, %v3989_v23  ;;  %v2245_v10 = vadd.f32 1.0, %v2992_v39  ;;  %vm4311_vm11 = vmor %vm1151_vm10, %vm1152_vm9 }
 0x23a   : > { %v1134_v11 = vadd.f32 1.1283791, %v1133_v12  ;;  %v1173_v53 = vmul.f32 %v1172_v43, %v4115_v47  ;;  %v1249_v31 = vmul.f32 %v1248_v54, %v4248_v55  ;;  %v1154_v14 = vsel %vm4311_vm11, %v4232_v35, %v1150_v3  ;;  %v3206_v43 = vld [vmem:[#allocation10 + $0x70] sm:$0xff]  ;;  %2584 = vmatpush.bf16.msrb.mxu0 %v3198_v26 }
 0x23b   : > { %v1187_v22 = vmul.f32 %v4298_v41, %v4263_v29  ;;  %v1261_v15 = vadd.f32 0.112945676, %v1260_v30  ;;  %v1285_v34 = vmul.f32 2.1237322e-06, %v4296_v57  ;;  %v2993_v17 = vclamps-f32 %v1120_v59, 1.0  ;;  %v884_v59 = vpop.f32.mrf.mxu3 }
 0x23c   : > { %v1158_v51 = vor.u32 1.1754944e-38, %v1157_v50  ;;  %3347 = vrcp.f32 %v4301_v63  ;;  %v4324_v49 = vmin.f32 %v1323_v62, 16.0  ;;  %vm1156_vm12 = vcmp.eq.f32.partialorder %v1155_v7, 8.507059e+37  ;;  %2613 = vmatpush.bf16.msrb.mxu1 %v3206_v43 }
 0x23d   : > { %v1211_v47 = vmul.f32 %v1210_v45, %v4168_v40  ;;  %v1262_v38 = vmul.f32 %v1261_v15, %v4248_v55  ;;  %v4329_v35 = vmul.f32 0.70710677, %v4309_v46  ;;  %v1174_v39 = vadd.f32 1.1283791, %v1173_v53  ;;  %v3223_v53 = vld [vmem:[#allocation10 + $0xf8] sm:$0xff]  ;;  %v799_v15 = vpop.f32.mrf.mxu0 }
 0x23e   : > { %v1159_v27 = vsel %vm1156_vm12, %v1158_v51, %v1154_v14  ;;  %v1250_v61 = vadd.f32 0.05243302, %v1249_v31  ;;  %v1188_v33 = vsub.f32 1.0, %v1187_v22  ;;  %v1286_v12 = vadd.f32 0.00028619796, %v1285_v34  ;;  %2670 = vmatpush.bf16.msrb.mxu3 %v3223_v53 }
 0x23f   : > { %v1263_v48 = vadd.f32 0.4994258, %v1262_v38  ;;  %v1363_v54 = vmul.f32 %v4329_v35, %v4329_v35  ;;  %v4335_v25 = vmul.f32 %v4257_v1, %v4080_v4  ;;  %v2246_v56 = vadd.f32 1.0, %v2993_v17 }
 0x240   : > { %v1135_v3 = vmul.f32 %v1134_v11, %v4045_v16  ;;  %v1325_v50 = vmul.f32 2.1237322e-06, %v4324_v49  ;;  %v4340_v30 = vmul.f32 %v2244_v58, %v4083_v6  ;;  %v1212_v62 = vadd.f32 0.18741608, %v1211_v47 }
 0x241   : > { %v1264_v7 = vmul.f32 %v1263_v48, %v4248_v55  ;;  %v4343_v45 = vmin.f32 %v1363_v54, 16.0  ;;  %v4348_v1 = vmul.f32 %v2245_v10, %v4089_v9  ;;  %v4351_v11 = vmul.f32 %v1174_v39, %v4086_v8 }
 0x242   : > { %v4345_v4 = vpop.eup %3347  ;;  %v1160_v16 = vmul.f32 %v1159_v27, %v1135_v3  ;;  %v1251_v6 = vmul.f32 %v1250_v61, %v4248_v55  ;;  %v1189_v58 = vmul.f32 %v4298_v41, %v1188_v33  ;;  %v4356_v31 = vmul.f32 0.5, %v4208_v2 }
 0x243   : > { %v1287_v18 = vmul.f32 %v1286_v12, %v4296_v57  ;;  %v4360_v14 = vadd.f32 %v884_v59, %v3991_v24  ;;  %v4363_v9 = vmul.f32 %v2246_v56, %v4097_v5  ;;  %v4366_v8 = vmul.f32 0.5, %v4244_v32  ;;  %v828_v12 = vpop.f32.mrf.mxu1  ;;  %v3205_v59 = vld [vmem:[#allocation10 + $0x68] sm:$0xff] }
 0x244   : > { %v1326_v10 = vadd.f32 0.00028619796, %v1325_v50  ;;  %v1365_v22 = vmul.f32 2.1237322e-06, %v4343_v45  ;;  %v1195_v2 = vand.u32 2147483647, %v4263_v29  ;;  %v1213_v34 = vmul.f32 %v1212_v62, %v4168_v40  ;;  %2614 = vmatpush.bf16.msrb.mxu1 %v3205_v59 }
 0x245   : > { %5551 = vst [vmem:[#allocation22_spill] sm:$0xff] %v4366_v8  ;;  %v1227_v60 = vmul.f32 %v4345_v4, %v4301_v63  ;;  %v4373_v17 = vadd.f32 1.0, %v1264_v7  ;;  %v2994_v51 = vclamps-f32 %v1160_v16, 1.0  ;;  %vm1192_vm13 = vweird.f32 %v4298_v41  ;;  %v3197_v50 = vld [vmem:[#allocation10 + $0x28] sm:$0xff] }
 0x246   : > { %v1197_v5 = vand.u32 2147483648, %v4263_v29  ;;  %v1252_v32 = vadd.f32 0.18741608, %v1251_v6  ;;  %v1190_v47 = vadd.f32 %v4298_v41, %v1189_v58  ;;  %v1288_v38 = vadd.f32 0.0036580483, %v1287_v18  ;;  %2585 = vmatpush.bf16.msrb.mxu0 %v3197_v50  ;;  %v3214_v18 = vld [vmem:[#allocation10 + $0xb0] sm:$0xff] }
 0x247   : > { %v4379_v27 = vmul.f32 0.70710677, %v4360_v14  ;;  %v4382_v39 = vadd.f32 %v799_v15, %v3973_v36  ;;  %vm1191_vm14 = vweird.f32 %v4263_v29  ;;  %v4386_v40 = vmul.f32 0.5, %v4280_v20  ;;  %2642 = vmatpush.bf16.msrb.mxu2 %v3214_v18 }
 0x248   : > { %v1327_v61 = vmul.f32 %v1326_v10, %v4324_v49  ;;  %v1366_v26 = vadd.f32 0.00028619796, %v1365_v22  ;;  %v1214_v43 = vadd.f32 1.1283791, %v1213_v34  ;;  %v1228_v33 = vsub.f32 1.0, %v1227_v60  ;;  %vm4394_vm15 = vmor %vm1191_vm14, %vm1192_vm13  ;;  %v3222_v10 = vld [vmem:[#allocation10 + $0xf0] sm:$0xff]  ;;  %v857_v34 = vpop.f32.mrf.mxu2 }
 0x249   : > { %5552 = vst [vmem:[#allocation23_spill] sm:$0xff] %v4386_v40  ;;  %3349 = vrcp.f32 %v4373_v17  ;;  %v1403_v48 = vmul.f32 %v4379_v27, %v4379_v27  ;;  %v2247_v54 = vadd.f32 1.0, %v2994_v51  ;;  %vm4398_vm0 = vcmp.eq.f32.partialorder %v1195_v2, 8.507059e+37  ;;  %2671 = vmatpush.bf16.msrb.mxu3 %v3222_v10 }
 0x24a   : > { %v1198_v20 = vor.u32 1.1754944e-38, %v1197_v5  ;;  %v1253_v3 = vmul.f32 %v1252_v32, %v4248_v55  ;;  %v1194_v62 = vsel %vm4394_vm15, %v4298_v41, %v1190_v47  ;;  %v1289_v7 = vmul.f32 %v1288_v38, %v4296_v57  ;;  %v3204_v32 = vld [vmem:[#allocation10 + $0x60] sm:$0xff] }
 0x24b   : > { %v4407_v21 = vmin.f32 %v1403_v48, 16.0  ;;  %v4410_v53 = vmul.f32 0.70710677, %v4382_v39  ;;  %v1235_v16 = vand.u32 2147483647, %v4301_v63  ;;  %v1367_v58 = vmul.f32 %v1366_v26, %v4343_v45  ;;  %2615 = vmatpush.bf16.msrb.mxu1 %v3204_v32 }
 0x24c   : > { %v1328_v6 = vadd.f32 0.0036580483, %v1327_v61  ;;  %v4415_v55 = vadd.f32 %v828_v12, %v3975_v19  ;;  %v4418_v41 = vmul.f32 %v1214_v43, %v4125_v52  ;;  %v1229_v22 = vmul.f32 %v4345_v4, %v1228_v33  ;;  %v3196_v52 = vld [vmem:[#allocation10 + $0x20] sm:$0xff] }
 0x24d   : > { %v4422_v15 = vmul.f32 0.5, %v4309_v46  ;;  %v1443_v2 = vmul.f32 %v4410_v53, %v4410_v53  ;;  %v1199_v60 = vsel %vm4398_vm0, %v1198_v20, %v1194_v62  ;;  %vm1231_vm1 = vweird.f32 %v4301_v63  ;;  %2586 = vmatpush.bf16.msrb.mxu0 %v3196_v52  ;;  %v886_v62 = vpop.f32.mrf.mxu3 }
 0x24e   : > { %v1237_v51 = vand.u32 2147483648, %v4301_v63  ;;  %v1405_v5 = vmul.f32 2.1237322e-06, %v4407_v21  ;;  %v4434_v46 = vmul.f32 %v2247_v54, %v4100_v37  ;;  %v1254_v38 = vadd.f32 1.1283791, %v1253_v3 }
 0x24f   : > { %5557 = vst [vmem:[#allocation24_spill] sm:$0xff] %v4422_v15  ;;  %v4431_v47 = vpop.eup %3349  ;;  %v1290_v61 = vadd.f32 0.05243302, %v1289_v7  ;;  %v4436_v26 = vmin.f32 %v1443_v2, 16.0  ;;  %vm4438_vm2 = vcmp.eq.f32.partialorder %v1235_v16, 8.507059e+37  ;;  %v1329_v33 = vmul.f32 %v1328_v6, %v4324_v49 }
 0x250   : > { %v1368_v48 = vadd.f32 0.0036580483, %v1367_v58  ;;  %v4444_v12 = vmul.f32 0.70710677, %v4415_v55  ;;  %v4447_v56 = vadd.f32 %v857_v34, %v3989_v23  ;;  %v1200_v37 = vmul.f32 %v1199_v60, %v4351_v11  ;;  %v802_v34 = vpop.f32.mrf.mxu0  ;;  %v3221_v60 = vld [vmem:[#allocation10 + $0xe8] sm:$0xff] }
 0x251   : > { %v1230_v54 = vadd.f32 %v4345_v4, %v1229_v22  ;;  %vm1232_vm3 = vweird.f32 %v4345_v4  ;;  %v1445_v29 = vmul.f32 2.1237322e-06, %v4436_v26  ;;  %v1267_v20 = vmul.f32 %v4431_v47, %v4373_v17  ;;  %2672 = vmatpush.bf16.msrb.mxu3 %v3221_v60  ;;  %v3220_v60 = vld [vmem:[#allocation10 + $0xe0] sm:$0xff] }
 0x252   : > { %v1406_v3 = vadd.f32 0.00028619796, %v1405_v5  ;;  %v1483_v50 = vmul.f32 %v4444_v12, %v4444_v12  ;;  %v4458_v59 = vmul.f32 0.70710677, %v4447_v56  ;;  %v1238_v7 = vor.u32 1.1754944e-38, %v1237_v51  ;;  %vm4466_vm4 = vmor %vm1231_vm1, %vm1232_vm3 }
 0x253   : > { %v4461_v11 = vmul.f32 %v1254_v38, %v4221_v28  ;;  %v1291_v16 = vmul.f32 %v1290_v61, %v4296_v57  ;;  %v1446_v6 = vadd.f32 0.00028619796, %v1445_v29  ;;  %v1330_v18 = vadd.f32 0.05243302, %v1329_v33  ;;  %v3213_v28 = vld [vmem:[#allocation10 + $0xa8] sm:$0xff] }
 0x254   : > { %v1369_v10 = vmul.f32 %v1368_v48, %v4343_v45  ;;  %v4471_v22 = vmin.f32 %v1483_v50, 16.0  ;;  %v1523_v2 = vmul.f32 %v4458_v59, %v4458_v59  ;;  %v2995_v51 = vclamps-f32 %v1200_v37, 1.0  ;;  %2643 = vmatpush.bf16.msrb.mxu2 %v3213_v28  ;;  %v3195_v48 = vld [vmem:[#allocation10 + $0x18] sm:$0xff]  ;;  %v831_v50 = vpop.f32.mrf.mxu1 }
 0x255   : > { %v1234_v63 = vsel %vm4466_vm4, %v4345_v4, %v1230_v54  ;;  %v4479_v5 = vmul.f32 0.5, %v4360_v14  ;;  %v4482_v52 = vadd.f32 %v886_v62, %v3991_v24  ;;  %v1268_v32 = vsub.f32 1.0, %v1267_v20  ;;  %v3203_v37 = vld [vmem:[#allocation10 + $0x58] sm:$0xff]  ;;  %2587 = vmatpush.bf16.msrb.mxu0 %v3195_v48  ;;  %v3194_v48 = vld [vmem:[#allocation10 + $0x10] sm:$0xff]  ;;  %2673 = vmatpush.bf16.msrb.mxu3 %v3220_v60 }
 0x256   : > { %v1407_v38 = vmul.f32 %v1406_v3, %v4407_v21  ;;  %v1485_v61 = vmul.f32 2.1237322e-06, %v4471_v22  ;;  %v4486_v33 = vmin.f32 %v1523_v2, 16.0  ;;  %v1275_v29 = vand.u32 2147483647, %v4373_v17  ;;  %2616 = vmatpush.bf16.msrb.mxu1 %v3203_v37  ;;  %v3212_v2 = vld [vmem:[#allocation10 + $0xa0] sm:$0xff] }
 0x257   : > { %5562 = vst [vmem:[#allocation25_spill] sm:$0xff] %v4479_v5  ;;  %v1292_v4 = vadd.f32 0.18741608, %v1291_v16  ;;  %v1447_v14 = vmul.f32 %v1446_v6, %v4436_v26  ;;  %v4491_v54 = vadd.f32 %v802_v34, %v3973_v36  ;;  %vm1271_vm5 = vweird.f32 %v4373_v17  ;;  %v3202_v37 = vld [vmem:[#allocation10 + $0x50] sm:$0xff] }
 0x258   : > { %v1277_v20 = vand.u32 2147483648, %v4373_v17  ;;  %v1331_v3 = vmul.f32 %v1330_v18, %v4324_v49  ;;  %v1370_v62 = vadd.f32 0.05243302, %v1369_v10  ;;  %v1525_v58 = vmul.f32 2.1237322e-06, %v4486_v33  ;;  %2644 = vmatpush.bf16.msrb.mxu2 %v3212_v2  ;;  %v3192_v17 = vld [vmem:[#allocation10] sm:$0xff] }
 0x259   : > { %v4497_v28 = vadd.f32 1.0, %v2995_v51  ;;  %v1239_v16 = vsel %vm4438_vm2, %v1238_v7, %v1234_v63  ;;  %v1486_v6 = vadd.f32 0.00028619796, %v1485_v61  ;;  %v4502_v34 = vmul.f32 0.70710677, %v4482_v52  ;;  %2588 = vmatpush.bf16.msrb.mxu0 %v3194_v48 }
 0x25a   : > { %v1269_v5 = vmul.f32 %v4431_v47, %v1268_v32  ;;  %v1408_v15 = vadd.f32 0.0036580483, %v1407_v38  ;;  %v1526_v18 = vadd.f32 0.00028619796, %v1525_v58  ;;  %v4506_v10 = vadd.f32 %v831_v50, %v3975_v19  ;;  %v860_v58 = vpop.f32.mrf.mxu2  ;;  %2617 = vmatpush.bf16.msrb.mxu1 %v3202_v37 }
 0x25b   : > { %5563 = vst [vmem:[#allocation26_spill] sm:$0xff] %v4502_v34  ;;  %v1293_v51 = vmul.f32 %v1292_v4, %v4296_v57  ;;  %v1448_v40 = vadd.f32 0.0036580483, %v1447_v14  ;;  %v1563_v43 = vmul.f32 %v4502_v34, %v4502_v34  ;;  %v4512_v7 = vmul.f32 0.70710677, %v4491_v54  ;;  %v3211_v4 = vld [vmem:[#allocation10 + $0x98] sm:$0xff] }
 0x25c   : > { %5564 = vst [vmem:[#allocation27_spill] sm:$0xff] %v4506_v10  ;;  %v1240_v63 = vmul.f32 %v1239_v16, %v4418_v41  ;;  %vm4515_vm6 = vcmp.eq.f32.partialorder %v1275_v29, 8.507059e+37  ;;  %v1278_v38 = vor.u32 1.1754944e-38, %v1277_v20  ;;  %v1332_v61 = vadd.f32 0.18741608, %v1331_v3  ;;  %v3219_v14 = vld [vmem:[#allocation10 + $0xd8] sm:$0xff]  ;;  %2645 = vmatpush.bf16.msrb.mxu2 %v3211_v4 }
 0x25d   : > { %5565 = vst [vmem:[#allocation28_spill] sm:$0xff] %v4512_v7  ;;  %v1371_v50 = vmul.f32 %v1370_v62, %v4343_v45  ;;  %v1487_v2 = vmul.f32 %v1486_v6, %v4471_v22  ;;  %v1527_v8 = vmul.f32 %v1526_v18, %v4486_v33  ;;  %v4522_v60 = vmin.f32 %v1563_v43, 16.0  ;;  %v3193_v62 = vld [vmem:[#allocation10 + $0x8] sm:$0xff]  ;;  %2674 = vmatpush.bf16.msrb.mxu3 %v3219_v14  ;;  %v3210_v4 = vld [vmem:[#allocation10 + $0x90] sm:$0xff]  ;;  %v889_v14 = vpop.f32.mrf.mxu3 }
 0x25e   : > { %v1603_v41 = vmul.f32 %v4512_v7, %v4512_v7  ;;  %v1270_v29 = vadd.f32 %v4431_v47, %v1269_v5  ;;  %vm1272_vm7 = vweird.f32 %v4431_v47  ;;  %v1409_v20 = vmul.f32 %v1408_v15, %v4407_v21  ;;  %v3201_v16 = vld [vmem:[#allocation10 + $0x48] sm:$0xff]  ;;  %2589 = vmatpush.bf16.msrb.mxu0 %v3193_v62 }
 0x25f   : > { %v4530_v3 = vmul.f32 0.70710677, %v4506_v10  ;;  %v1294_v6 = vadd.f32 1.1283791, %v1293_v51  ;;  %v1449_v18 = vmul.f32 %v1448_v40, %v4436_v26  ;;  %v1565_v48 = vmul.f32 2.1237322e-06, %v4522_v60  ;;  %2618 = vmatpush.bf16.msrb.mxu1 %v3201_v16  ;;  %vm4545_vm8 = vmor %vm1271_vm5, %vm1272_vm7 }
 0x260   : > { %v4535_v37 = vadd.f32 %v860_v58, %v3989_v23  ;;  %v2996_v5 = vclamps-f32 %v1240_v63, 1.0  ;;  %v1372_v43 = vadd.f32 0.18741608, %v1371_v50  ;;  %v4537_v7 = vmin.f32 %v1603_v41, 16.0  ;;  %v3218_v10 = vld [vmem:[#allocation10 + $0xd0] sm:$0xff]  ;;  %2646 = vmatpush.bf16.msrb.mxu2 %v3210_v4 }
 0x261   : > { %5568 = vst [vmem:[#allocation29_spill] sm:$0xff] %v4530_v3  ;;  %v1643_v15 = vmul.f32 %v4530_v3, %v4530_v3  ;;  %v1333_v51 = vmul.f32 %v1332_v61, %v4324_v49  ;;  %v1488_v63 = vadd.f32 0.0036580483, %v1487_v2  ;;  %v1528_v50 = vadd.f32 0.0036580483, %v1527_v8  ;;  %2675 = vmatpush.bf16.msrb.mxu3 %v3218_v10 }
 0x262   : > { %5569 = vst [vmem:[#allocation30_spill] sm:$0xff] %v4535_v37  ;;  %v1566_v58 = vadd.f32 0.00028619796, %v1565_v48  ;;  %v1274_v41 = vsel %vm4545_vm8, %v4431_v47, %v1270_v29  ;;  %v1410_v62 = vadd.f32 0.05243302, %v1409_v20  ;;  %v4558_v34 = vmul.f32 %v4497_v28, %v4110_v44  ;;  %v3200_v48 = vld [vmem:[#allocation10 + $0x40] sm:$0xff]  ;;  %v804_v44 = vpop.f32.mrf.mxu0  ;;  %2590 = vmatpush.bf16.msrb.mxu0 %v3192_v17 }
 0x263   : > { %v1605_v16 = vmul.f32 2.1237322e-06, %v4537_v7  ;;  %v4554_v3 = vmin.f32 %v1643_v15, 16.0  ;;  %v1450_v61 = vadd.f32 0.05243302, %v1449_v18  ;;  %v2249_v47 = vadd.f32 1.0, %v2996_v5  ;;  %2619 = vmatpush.bf16.msrb.mxu1 %v3200_v48 }
 0x264   : > { %v1567_v8 = vmul.f32 %v1566_v58, %v4522_v60  ;;  %v4562_v2 = vmul.f32 0.70710677, %v4535_v37  ;;  %v4565_v29 = vmul.f32 %v1294_v6, %v4261_v0  ;;  %v4568_v20 = vmul.f32 0.5, %v4382_v39  ;;  %v3209_v5 = vld [vmem:[#allocation10 + $0x88] sm:$0xff] }
 0x265   : > { %v4571_v15 = vadd.f32 %v889_v14, %v3991_v24  ;;  %v1279_v28 = vsel %vm4515_vm6, %v1278_v38, %v1274_v41  ;;  %v1489_v18 = vmul.f32 %v1488_v63, %v4471_v22  ;;  %v1529_v10 = vmul.f32 %v1528_v50, %v4486_v33  ;;  %v3217_v0 = vld [vmem:[#allocation10 + $0xc8] sm:$0xff]  ;;  %2647 = vmatpush.bf16.msrb.mxu2 %v3209_v5  ;;  %v3208_v41 = vld [vmem:[#allocation10 + $0x80] sm:$0xff] }
 0x266   : > { %5572 = vst [vmem:[#allocation31_spill] sm:$0xff] %v4562_v2  ;;  %v1606_v4 = vadd.f32 0.00028619796, %v1605_v16  ;;  %v1334_v6 = vadd.f32 1.1283791, %v1333_v51  ;;  %v1373_v39 = vmul.f32 %v1372_v43, %v4343_v45  ;;  %v1411_v40 = vmul.f32 %v1410_v62, %v4407_v21  ;;  %2676 = vmatpush.bf16.msrb.mxu3 %v3217_v0  ;;  %v3216_v62 = vld [vmem:[#allocation10 + $0xc0] sm:$0xff] }
 0x267   : > { %5573 = vst [vmem:[#allocation32_spill] sm:$0xff] %v4571_v15  ;;  %v1645_v58 = vmul.f32 2.1237322e-06, %v4554_v3  ;;  %v1451_v14 = vmul.f32 %v1450_v61, %v4436_v26  ;;  %v1568_v17 = vadd.f32 0.0036580483, %v1567_v8  ;;  %v1683_v32 = vmul.f32 %v4562_v2, %v4562_v2 }
 0x268   : > { %v4584_v38 = vadd.f32 %v804_v44, %v3973_v36  ;;  %v4587_v63 = vmul.f32 %v2249_v47, %v4146_v13  ;;  %v1280_v43 = vmul.f32 %v1279_v28, %v4461_v11  ;;  %v4591_v51 = vmul.f32 0.5, %v4415_v55  ;;  %v833_v44 = vpop.f32.mrf.mxu1 }
 0x269   : > { %v4594_v50 = vmul.f32 0.70710677, %v4571_v15  ;;  %v1490_v16 = vadd.f32 0.05243302, %v1489_v18  ;;  %v4597_v61 = vmul.f32 0.5, %v4447_v56  ;;  %v1607_v48 = vmul.f32 %v1606_v4, %v4537_v7  ;;  %2648 = vmatpush.bf16.msrb.mxu2 %v3208_v41 }
 0x26a   : > { %v1530_v8 = vadd.f32 0.05243302, %v1529_v10  ;;  %v4601_v13 = vmul.f32 %v1334_v6, %v4291_v42  ;;  %v1374_v11 = vadd.f32 1.1283791, %v1373_v39  ;;  %v1412_v47 = vadd.f32 0.18741608, %v1411_v40  ;;  %2677 = vmatpush.bf16.msrb.mxu3 %v3216_v62 }
 0x26b   : > { %5574 = vst [vmem:[#allocation33_spill] sm:$0xff] %v4594_v50  ;;  %v1646_v55 = vadd.f32 0.00028619796, %v1645_v58  ;;  %v1452_v28 = vadd.f32 0.18741608, %v1451_v14  ;;  %v1569_v5 = vmul.f32 %v1568_v17, %v4522_v60  ;;  %v4604_v0 = vmin.f32 %v1683_v32, 16.0  ;;  %v862_v14 = vpop.f32.mrf.mxu2 }
 0x26c   : > { %v4607_v18 = vmul.f32 0.70710677, %v4584_v38  ;;  %v2997_v56 = vclamps-f32 %v1280_v43, 1.0  ;;  %v4610_v10 = vmul.f32 0.5, %v4482_v52  ;;  %v1723_v42 = vmul.f32 %v4594_v50, %v4594_v50 }
 0x26d   : > { %v4615_v4 = vadd.f32 %v833_v44, %v3975_v19  ;;  %v1491_v6 = vmul.f32 %v1490_v16, %v4471_v22  ;;  %v1531_v39 = vmul.f32 %v1530_v8, %v4486_v33  ;;  %v1608_v40 = vadd.f32 0.0036580483, %v1607_v48 }
 0x26e   : > { %v1763_v58 = vmul.f32 %v4607_v18, %v4607_v18  ;;  %v4622_v17 = vmul.f32 %v1374_v11, %v4329_v35  ;;  %v1413_v52 = vmul.f32 %v1412_v47, %v4407_v21  ;;  %v1647_v32 = vmul.f32 %v1646_v55, %v4554_v3 }
 0x26f   : > { %5575 = vst [vmem:[#allocation34_spill] sm:$0xff] %v4615_v4  ;;  %v4627_v43 = vmul.f32 0.70710677, %v4615_v4  ;;  %v1453_v41 = vmul.f32 %v1452_v28, %v4436_v26  ;;  %v1570_v62 = vadd.f32 0.05243302, %v1569_v5  ;;  %v2250_v48 = vadd.f32 1.0, %v2997_v56 }
 0x270   : > { %v1685_v16 = vmul.f32 2.1237322e-06, %v4604_v0  ;;  %v4631_v8 = vmin.f32 %v1763_v58, 16.0  ;;  %v4633_v44 = vmin.f32 %v1723_v42, 16.0  ;;  %v4638_v11 = vadd.f32 %v862_v14, %v3989_v23  ;;  %v891_v14 = vpop.f32.mrf.mxu3 }
 0x271   : > { %v1803_v35 = vmul.f32 %v4627_v43, %v4627_v43  ;;  %v1492_v47 = vadd.f32 0.18741608, %v1491_v6  ;;  %v1532_v55 = vadd.f32 0.18741608, %v1531_v39  ;;  %v1609_v15 = vmul.f32 %v1608_v40, %v4537_v7 }
 0x272   : > { %5576 = vst [vmem:[#allocation35_spill] sm:$0xff] %v4638_v11  ;;  %v1765_v28 = vmul.f32 2.1237322e-06, %v4631_v8  ;;  %v1414_v5 = vadd.f32 1.1283791, %v1413_v52  ;;  %v4643_v50 = vmul.f32 0.5, %v4491_v54  ;;  %v1571_v37 = vmul.f32 %v1570_v62, %v4522_v60 }
 0x273   : > { %v1648_v58 = vadd.f32 0.0036580483, %v1647_v32  ;;  %v4645_v56 = vmin.f32 %v1803_v35, 16.0  ;;  %v1454_v42 = vadd.f32 1.1283791, %v1453_v41  ;;  %v2282_v6 = vmul.f32 %v2250_v48, %v4356_v31 }
 0x274   : > { %v1686_v19 = vadd.f32 0.00028619796, %v1685_v16  ;;  %v1766_v36 = vadd.f32 0.00028619796, %v1765_v28  ;;  %v1725_v39 = vmul.f32 2.1237322e-06, %v4633_v44  ;;  %v1493_v54 = vmul.f32 %v1492_v47, %v4471_v22 }
 0x275   : > { %v1805_v40 = vmul.f32 2.1237322e-06, %v4645_v56  ;;  %v4652_v52 = vmul.f32 0.70710677, %v4638_v11  ;;  %v1533_v32 = vmul.f32 %v1532_v55, %v4486_v33  ;;  %v1610_v35 = vadd.f32 0.05243302, %v1609_v15 }
 0x276   : > { %v1767_v41 = vmul.f32 %v1766_v36, %v4631_v8  ;;  %v1649_v62 = vmul.f32 %v1648_v58, %v4554_v3  ;;  %v4661_v48 = vadd.f32 %v891_v14, %v3991_v24  ;;  %v4664_v28 = vmul.f32 %v1414_v5, %v4379_v27 }
 0x277   : > { %5577 = vst [vmem:[#allocation36_spill] sm:$0xff] %v4652_v52  ;;  %v1806_v16 = vadd.f32 0.00028619796, %v1805_v40  ;;  %v1843_v31 = vmul.f32 %v4652_v52, %v4652_v52  ;;  %v1572_v11 = vadd.f32 0.18741608, %v1571_v37  ;;  %v1687_v47 = vmul.f32 %v1686_v19, %v4604_v0 }
 0x278   : > { %5578 = vst [vmem:[#allocation37_spill] sm:$0xff] %v4661_v48  ;;  %v1768_v23 = vadd.f32 0.0036580483, %v1767_v41  ;;  %v4668_v15 = vmul.f32 %v1454_v42, %v4410_v53  ;;  %v1726_v36 = vadd.f32 0.00028619796, %v1725_v39  ;;  %v1611_v14 = vmul.f32 %v1610_v35, %v4537_v7 }
 0x279   : > { %v1807_v55 = vmul.f32 %v1806_v16, %v4645_v56  ;;  %v4671_v58 = vmin.f32 %v1843_v31, 16.0  ;;  %v1494_v40 = vadd.f32 1.1283791, %v1493_v54  ;;  %v1534_v52 = vadd.f32 1.1283791, %v1533_v32 }
 0x27a   : > { %v2307_v27 = vpack.c.bf16 %v4434_v46, %v4335_v25  ;;  %v1650_v5 = vadd.f32 0.05243302, %v1649_v62  ;;  %v1769_v37 = vmul.f32 %v1768_v23, %v4631_v8  ;;  %v4678_v19 = vmul.f32 0.70710677, %v4661_v48 }
 0x27b   : > { %v2308_v53 = vpack.c.bf16 %v4558_v34, %v4340_v30  ;;  %v1573_v42 = vmul.f32 %v1572_v11, %v4522_v60  ;;  %v1688_v39 = vadd.f32 0.0036580483, %v1687_v47  ;;  %v4684_v54 = vmul.f32 0.5, %v4584_v38 }
 0x27c   : > { %5579 = vst [vmem:[#allocation38_spill] sm:$0xff] %v4678_v19  ;;  %2591 = vmatmul.bf16.vlgmr.msrb.gmra.mxu0 %v2307_v27  ;;  %v2309_v32 = vpack.c.bf16 %v4587_v63, %v4348_v1  ;;  %v1727_v25 = vmul.f32 %v1726_v36, %v4633_v44  ;;  %v1808_v46 = vadd.f32 0.0036580483, %v1807_v55  ;;  %v1845_v23 = vmul.f32 2.1237322e-06, %v4671_v58 }
 0x27d   : > { %5580 = vst [vmem:[#allocation39_spill] sm:$0xff] %v4684_v54  ;;  %2620 = vmatmul.bf16.vlgmr.msrb.gmra.mxu1 %v2308_v53  ;;  %v2310_v35 = vpack.c.bf16 %v2282_v6, %v4363_v9  ;;  %v4692_v30 = vmul.f32 %v1494_v40, %v4444_v12  ;;  %v4695_v34 = vmul.f32 %v1534_v52, %v4458_v59  ;;  %v1612_v38 = vadd.f32 0.18741608, %v1611_v14 }
 0x27e   : > { %2649 = vmatmul.bf16.vlgmr.msrb.gmra.mxu2 %v2309_v32  ;;  %v1296_v11 = vmul.f32 3.8918573e-05, %v4296_v57  ;;  %v1651_v1 = vmul.f32 %v1650_v5, %v4554_v3  ;;  %v1770_v63 = vadd.f32 0.05243302, %v1769_v37  ;;  %v1883_v41 = vmul.f32 %v4678_v19, %v4678_v19 }
 0x27f   : > { %2678 = vmatmul.bf16.vlgmr.msrb.gmra.mxu3 %v2310_v35  ;;  %v1456_v62 = vmul.f32 3.8918573e-05, %v4436_v26  ;;  %v1574_v9 = vadd.f32 1.1283791, %v1573_v42  ;;  %v1689_v12 = vmul.f32 %v1688_v39, %v4604_v0  ;;  %v1336_v59 = vmul.f32 3.8918573e-05, %v4324_v49 }
 0x280   : > { %v1297_v6 = vadd.f32 0.001143296, %v1296_v11  ;;  %v1728_v52 = vadd.f32 0.0036580483, %v1727_v25  ;;  %v1809_v16 = vmul.f32 %v1808_v46, %v4645_v56  ;;  %v1846_v31 = vadd.f32 0.00028619796, %v1845_v23 }
 0x281   : > { %v1457_v47 = vadd.f32 0.001143296, %v1456_v62  ;;  %v1613_v36 = vmul.f32 %v1612_v38, %v4537_v7  ;;  %v1337_v40 = vadd.f32 0.001143296, %v1336_v59  ;;  %v1496_v14 = vmul.f32 3.8918573e-05, %v4471_v22 }
 0x282   : > { %v1298_v55 = vmul.f32 %v1297_v6, %v4296_v57  ;;  %v1652_v27 = vadd.f32 0.18741608, %v1651_v1  ;;  %v1771_v5 = vmul.f32 %v1770_v63, %v4631_v8  ;;  %v4709_v37 = vmin.f32 %v1883_v41, 16.0  ;;  %v5581_v42 = vld [vmem:[#allocation26_spill] sm:$0xff] }
 0x283   : > { %v1458_v53 = vmul.f32 %v1457_v47, %v4436_v26  ;;  %v4713_v39 = vmul.f32 %v1574_v9, %v5581_v42  ;;  %v1338_v25 = vmul.f32 %v1337_v40, %v4324_v49  ;;  %v1497_v46 = vadd.f32 0.001143296, %v1496_v14 }
 0x284   : > { %v1299_v32 = vadd.f32 0.014752088, %v1298_v55  ;;  %v1690_v23 = vadd.f32 0.05243302, %v1689_v12  ;;  %v1810_v35 = vadd.f32 0.05243302, %v1809_v16  ;;  %v1847_v38 = vmul.f32 %v1846_v31, %v4671_v58 }
 0x285   : > { %v1459_v11 = vadd.f32 0.014752088, %v1458_v53  ;;  %v1729_v1 = vmul.f32 %v1728_v52, %v4633_v44  ;;  %v1339_v41 = vadd.f32 0.014752088, %v1338_v25  ;;  %v1498_v62 = vmul.f32 %v1497_v46, %v4471_v22 }
 0x286   : > { %v1300_v63 = vmul.f32 %v1299_v32, %v4296_v57  ;;  %v1614_v6 = vadd.f32 1.1283791, %v1613_v36  ;;  %v1772_v59 = vadd.f32 0.18741608, %v1771_v5  ;;  %v1885_v9 = vmul.f32 2.1237322e-06, %v4709_v37 }
 0x287   : > { %v1460_v47 = vmul.f32 %v1459_v11, %v4436_v26  ;;  %v1340_v12 = vmul.f32 %v1339_v41, %v4324_v49  ;;  %v1499_v16 = vadd.f32 0.014752088, %v1498_v62  ;;  %v1376_v31 = vmul.f32 3.8918573e-05, %v4343_v45 }
 0x288   : > { %v1301_v55 = vadd.f32 0.112945676, %v1300_v63  ;;  %v1653_v40 = vmul.f32 %v1652_v27, %v4554_v3  ;;  %v1811_v52 = vmul.f32 %v1810_v35, %v4645_v56  ;;  %v1848_v14 = vadd.f32 0.0036580483, %v1847_v38 }
 0x289   : > { %v1461_v53 = vadd.f32 0.112945676, %v1460_v47  ;;  %v1341_v36 = vadd.f32 0.112945676, %v1340_v12  ;;  %v1500_v5 = vmul.f32 %v1499_v16, %v4471_v22  ;;  %v1377_v32 = vadd.f32 0.001143296, %v1376_v31 }
 0x28a   : > { %v1302_v42 = vmul.f32 %v1301_v55, %v4296_v57  ;;  %v1773_v25 = vmul.f32 %v1772_v59, %v4631_v8  ;;  %v1886_v46 = vadd.f32 0.00028619796, %v1885_v9  ;;  %v1536_v63 = vmul.f32 3.8918573e-05, %v4486_v33 }
 0x28b   : > { %v1462_v11 = vmul.f32 %v1461_v53, %v4436_v26  ;;  %v1342_v27 = vmul.f32 %v1341_v36, %v4324_v49  ;;  %v1501_v62 = vadd.f32 0.112945676, %v1500_v5  ;;  %v1378_v35 = vmul.f32 %v1377_v32, %v4343_v45 }
 0x28c   : > { %v1303_v41 = vadd.f32 0.4994258, %v1302_v42  ;;  %v1654_v38 = vadd.f32 1.1283791, %v1653_v40  ;;  %v1691_v47 = vmul.f32 %v1690_v23, %v4604_v0  ;;  %v1812_v55 = vadd.f32 0.18741608, %v1811_v52 }
 0x28d   : > { %v1463_v12 = vadd.f32 0.4994258, %v1462_v11  ;;  %v1343_v31 = vadd.f32 0.4994258, %v1342_v27  ;;  %v1502_v59 = vmul.f32 %v1501_v62, %v4471_v22  ;;  %v1379_v9 = vadd.f32 0.014752088, %v1378_v35 }
 0x28e   : > { %v1304_v16 = vmul.f32 %v1303_v41, %v4296_v57  ;;  %v1849_v53 = vmul.f32 %v1848_v14, %v4671_v58  ;;  %v1887_v42 = vmul.f32 %v1886_v46, %v4709_v37  ;;  %v1537_v5 = vadd.f32 0.001143296, %v1536_v63  ;;  %v5583_v14 = vld [vmem:[#allocation28_spill] sm:$0xff] }
 0x28f   : > { %v1464_v36 = vmul.f32 %v1463_v12, %v4436_v26  ;;  %v4739_v48 = vadd.f32 0.05243302, %v1729_v1  ;;  %v1774_v40 = vadd.f32 1.1283791, %v1773_v25  ;;  %v1344_v23 = vmul.f32 %v1343_v31, %v4324_v49  ;;  %v5585_v1 = vld [vmem:[#allocation29_spill] sm:$0xff] }
 0x290   : > { %v4741_v32 = vadd.f32 1.0, %v1304_v16  ;;  %v1503_v57 = vadd.f32 0.4994258, %v1502_v59  ;;  %v1380_v11 = vmul.f32 %v1379_v9, %v4343_v45  ;;  %v1538_v41 = vmul.f32 %v1537_v5, %v4486_v33 }
 0x291   : > { %5582 = vst [vmem:[#allocation26_spill] sm:$0xff] %v4739_v48  ;;  %v4744_v52 = vadd.f32 1.0, %v1464_v36  ;;  %v4749_v27 = vmul.f32 %v1614_v6, %v5583_v14  ;;  %v4751_v46 = vadd.f32 0.18741608, %v1691_v47  ;;  %v1813_v26 = vmul.f32 %v1812_v55, %v4645_v56 }
 0x292   : > { %3351 = vrcp.f32 %v4741_v32  ;;  %v4756_v25 = vmul.f32 %v1654_v38, %v5585_v1  ;;  %v1850_v49 = vadd.f32 0.05243302, %v1849_v53  ;;  %v4758_v63 = vadd.f32 0.0036580483, %v1887_v42 }
 0x293   : > { %5584 = vst [vmem:[#allocation28_spill] sm:$0xff] %v4751_v46  ;;  %3353 = vrcp.f32 %v4744_v52  ;;  %v4762_v62 = vmul.f32 %v1774_v40, %v4607_v18  ;;  %v1315_v6 = vand.u32 2147483647, %v4741_v32  ;;  %v4765_v35 = vadd.f32 1.0, %v1344_v23 }
 0x294   : > { %v1416_v47 = vmul.f32 3.8918573e-05, %v4407_v21  ;;  %v1317_v55 = vand.u32 2147483648, %v4741_v32  ;;  %v1504_v12 = vmul.f32 %v1503_v57, %v4471_v22  ;;  %v1381_v38 = vadd.f32 0.112945676, %v1380_v11 }
 0x295   : > { %v1539_v16 = vadd.f32 0.014752088, %v1538_v41  ;;  %v4770_v31 = vadd.f32 1.1283791, %v1813_v26  ;;  %v1475_v59 = vand.u32 2147483647, %v4744_v52  ;;  %3355 = vrcp.f32 %v4765_v35 }
 0x296   : > { %v1477_v9 = vand.u32 2147483648, %v4744_v52  ;;  %v4776_v18 = vmul.f32 %v1850_v49, %v4671_v58  ;;  %v4778_v53 = vadd.f32 1.0, %v1504_v12  ;;  %v1382_v42 = vmul.f32 %v1381_v38, %v4343_v45 }
 0x297   : > { %v1540_v36 = vmul.f32 %v1539_v16, %v4486_v33  ;;  %vm1311_vm9 = vweird.f32 %v4741_v32  ;;  %vm1471_vm10 = vweird.f32 %v4744_v52  ;;  %v1357_v5 = vand.u32 2147483648, %v4765_v35 }
 0x298   : > { %v3352_v22 = vpop.eup %3351  ;;  %v1417_v40 = vadd.f32 0.001143296, %v1416_v47  ;;  %vm4786_vm11 = vcmp.eq.f32.partialorder %v1315_v6, 8.507059e+37  ;;  %v1318_v41 = vor.u32 1.1754944e-38, %v1317_v55  ;;  %v1355_v14 = vand.u32 2147483647, %v4765_v35 }
 0x299   : > { %v3354_v23 = vpop.eup %3353  ;;  %v1307_v57 = vmul.f32 %v3352_v22, %v4741_v32  ;;  %3357 = vrcp.f32 %v4778_v53  ;;  %vm4793_vm12 = vcmp.eq.f32.partialorder %v1475_v59, 8.507059e+37  ;;  %v1478_v49 = vor.u32 1.1754944e-38, %v1477_v9 }
 0x29a   : > { %v1467_v26 = vmul.f32 %v3354_v23, %v4744_v52  ;;  %v1576_v47 = vmul.f32 3.8918573e-05, %v4522_v60  ;;  %vm1351_vm13 = vweird.f32 %v4765_v35  ;;  %v1383_v6 = vadd.f32 0.4994258, %v1382_v42 }
 0x29b   : > { %v1308_v12 = vsub.f32 1.0, %v1307_v57  ;;  %v1541_v38 = vadd.f32 0.112945676, %v1540_v36  ;;  %v3356_v16 = vpop.eup %3355  ;;  %vm1312_vm14 = vweird.f32 %v3352_v22  ;;  %v1358_v19 = vor.u32 1.1754944e-38, %v1357_v5 }
 0x29c   : > { %v1468_v55 = vsub.f32 1.0, %v1467_v26  ;;  %v1418_v24 = vmul.f32 %v1417_v40, %v4407_v21  ;;  %vm1472_vm15 = vweird.f32 %v3354_v23  ;;  %v1347_v59 = vmul.f32 %v3356_v16, %v4765_v35  ;;  %vm1313_vm2 = vmor %vm1311_vm9, %vm1312_vm14 }
 0x29d   : > { %v1309_v2 = vmul.f32 %v3352_v22, %v1308_v12  ;;  %vm4801_vm0 = vcmp.eq.f32.partialorder %v1355_v14, 8.507059e+37  ;;  %v1515_v9 = vand.u32 2147483647, %v4778_v53  ;;  %vm1511_vm1 = vweird.f32 %v4778_v53  ;;  %vm1473_vm4 = vmor %vm1471_vm10, %vm1472_vm15 }
 0x29e   : > { %v1469_v57 = vmul.f32 %v3354_v23, %v1468_v55  ;;  %v1384_v42 = vmul.f32 %v1383_v6, %v4343_v45  ;;  %v1542_v36 = vmul.f32 %v1541_v38, %v4486_v33  ;;  %v1419_v5 = vadd.f32 0.014752088, %v1418_v24 }
 0x29f   : > { %v3358_v26 = vpop.eup %3357  ;;  %v1310_v40 = vadd.f32 %v3352_v22, %v1309_v2  ;;  %v1348_v12 = vsub.f32 1.0, %v1347_v59  ;;  %v1517_v4 = vand.u32 2147483648, %v4778_v53  ;;  %v1577_v48 = vadd.f32 0.001143296, %v1576_v47 }
 0x2a0   : > { %v1470_v14 = vadd.f32 %v3354_v23, %v1469_v57  ;;  %vm1352_vm3 = vweird.f32 %v3356_v16  ;;  %v1507_v55 = vmul.f32 %v3358_v26, %v4778_v53  ;;  %v4814_v54 = vadd.f32 1.0, %v1384_v42  ;;  %v5594_v53 = vld [vmem:[#allocation22_spill] sm:$0xff] }
 0x2a1   : > { %v1314_v45 = vsel %vm1313_vm2, %v3352_v22, %v1310_v40  ;;  %v1349_v24 = vmul.f32 %v3356_v16, %v1348_v12  ;;  %v1543_v2 = vadd.f32 0.4994258, %v1542_v36  ;;  %v1420_v6 = vmul.f32 %v1419_v5, %v4407_v21  ;;  %vm1353_vm6 = vmor %vm1351_vm13, %vm1352_vm3 }
 0x2a2   : > { %v1319_v47 = vsel %vm4786_vm11, %v1318_v41, %v1314_v45  ;;  %v1474_v32 = vsel %vm1473_vm4, %v3354_v23, %v1470_v14  ;;  %v1508_v38 = vsub.f32 1.0, %v1507_v55  ;;  %3359 = vrcp.f32 %v4814_v54 }
 0x2a3   : > { %v1320_v59 = vmul.f32 %v1319_v47, %v4565_v29  ;;  %v1479_v22 = vsel %vm4793_vm12, %v1478_v49, %v1474_v32  ;;  %v1350_v57 = vadd.f32 %v3356_v16, %v1349_v24  ;;  %vm4826_vm5 = vcmp.eq.f32.partialorder %v1515_v9, 8.507059e+37 }
 0x2a4   : > { %v1480_v42 = vmul.f32 %v1479_v22, %v4668_v15  ;;  %v1509_v23 = vmul.f32 %v3358_v26, %v1508_v38  ;;  %vm1512_vm7 = vweird.f32 %v3358_v26  ;;  %v1578_v11 = vmul.f32 %v1577_v48, %v4522_v60 }
 0x2a5   : > { %v2998_v41 = vclamps-f32 %v1320_v59, 1.0  ;;  %v1354_v29 = vsel %vm1353_vm6, %v3356_v16, %v1350_v57  ;;  %v1544_v1 = vmul.f32 %v1543_v2, %v4486_v33  ;;  %v1421_v49 = vadd.f32 0.112945676, %v1420_v6  ;;  %vm1513_vm8 = vmor %vm1511_vm1, %vm1512_vm7 }
 0x2a6   : > { %v3002_v36 = vclamps-f32 %v1480_v42, 1.0  ;;  %v1359_v9 = vsel %vm4801_vm0, %v1358_v19, %v1354_v29  ;;  %v1510_v5 = vadd.f32 %v3358_v26, %v1509_v23  ;;  %v1518_v40 = vor.u32 1.1754944e-38, %v1517_v4 }
 0x2a7   : > { %v2251_v15 = vadd.f32 1.0, %v2998_v41  ;;  %v1360_v12 = vmul.f32 %v1359_v9, %v4601_v13  ;;  %v4841_v35 = vadd.f32 1.0, %v1544_v1  ;;  %v1616_v48 = vmul.f32 3.8918573e-05, %v4537_v7 }
 0x2a8   : > { %v3360_v16 = vpop.eup %3359  ;;  %v2255_v14 = vadd.f32 1.0, %v3002_v36  ;;  %v1514_v33 = vsel %vm1513_vm8, %v3358_v26, %v1510_v5  ;;  %v1395_v55 = vand.u32 2147483647, %v4814_v54  ;;  %v1422_v46 = vmul.f32 %v1421_v49, %v4407_v21 }
 0x2a9   : > { %v2999_v19 = vclamps-f32 %v1360_v12, 1.0  ;;  %v1519_v4 = vsel %vm4826_vm5, %v1518_v40, %v1514_v33  ;;  %v1387_v13 = vmul.f32 %v3360_v16, %v4814_v54  ;;  %v1579_v45 = vadd.f32 0.014752088, %v1578_v11 }
 0x2aa   : > { %v2283_v24 = vmul.f32 %v2251_v15, %v5594_v53  ;;  %v2287_v2 = vmul.f32 %v2255_v14, %v4568_v20  ;;  %v1520_v6 = vmul.f32 %v1519_v4, %v4692_v30  ;;  %3361 = vrcp.f32 %v4841_v35 }
 0x2ab   : > { %v4855_v26 = vmul.f32 %v4758_v63, %v4709_v37  ;;  %v2252_v47 = vadd.f32 1.0, %v2999_v19  ;;  %v1388_v32 = vsub.f32 1.0, %v1387_v13  ;;  %v1397_v38 = vand.u32 2147483648, %v4814_v54 }
 0x2ac   : > { %v4860_v59 = vmul.f32 %v4770_v31, %v4627_v43  ;;  %v2311_v22 = vpack.c.bf16 %v2287_v2, %v2283_v24  ;;  %v3003_v57 = vclamps-f32 %v1520_v6, 1.0  ;;  %v1423_v52 = vadd.f32 0.4994258, %v1422_v46  ;;  %v5597_v43 = vld [vmem:[#allocation23_spill] sm:$0xff] }
 0x2ad   : > { %v1389_v20 = vmul.f32 %v3360_v16, %v1388_v32  ;;  %vm1391_vm9 = vweird.f32 %v4814_v54  ;;  %vm1392_vm10 = vweird.f32 %v3360_v16  ;;  %v1580_v30 = vmul.f32 %v1579_v45, %v4522_v60 }
 0x2ae   : > { %2596 = vmatmul.bf16.gmra.mxu0 %v2311_v22  ;;  %v2256_v63 = vadd.f32 1.0, %v3003_v57  ;;  %vm4864_vm11 = vcmp.eq.f32.partialorder %v1395_v55, 8.507059e+37  ;;  %v1424_v23 = vmul.f32 %v1423_v52, %v4407_v21  ;;  %v1617_v11 = vadd.f32 0.001143296, %v1616_v48  ;;  %vm1393_vm12 = vmor %vm1391_vm9, %vm1392_vm10 }
 0x2af   : > { %v2284_v31 = vmul.f32 %v2252_v47, %v5597_v43  ;;  %v1390_v41 = vadd.f32 %v3360_v16, %v1389_v20  ;;  %v1398_v29 = vor.u32 1.1754944e-38, %v1397_v38  ;;  %v1581_v1 = vadd.f32 0.112945676, %v1580_v30 }
 0x2b0   : > { %v3362_v49 = vpop.eup %3361  ;;  %v2288_v54 = vmul.f32 %v2256_v63, %v4591_v51  ;;  %v4871_v36 = vadd.f32 1.0, %v1424_v23  ;;  %v1618_v9 = vmul.f32 %v1617_v11, %v4537_v7  ;;  %v1776_v5 = vmul.f32 3.8918573e-05, %v4631_v8 }
 0x2b1   : > { %v1394_v40 = vsel %vm1393_vm12, %v3360_v16, %v1390_v41  ;;  %v1547_v15 = vmul.f32 %v3362_v49, %v4841_v35  ;;  %v1557_v21 = vand.u32 2147483648, %v4841_v35  ;;  %v1582_v12 = vmul.f32 %v1581_v1, %v4522_v60 }
 0x2b2   : > { %v2312_v48 = vpack.c.bf16 %v2288_v54, %v2284_v31  ;;  %v1399_v14 = vsel %vm4864_vm11, %v1398_v29, %v1394_v40  ;;  %3363 = vrcp.f32 %v4871_v36  ;;  %v1656_v51 = vmul.f32 3.8918573e-05, %v4554_v3 }
 0x2b3   : > { %v1400_v33 = vmul.f32 %v1399_v14, %v4622_v17  ;;  %v1548_v55 = vsub.f32 1.0, %v1547_v15  ;;  %v1555_v46 = vand.u32 2147483647, %v4841_v35  ;;  %v1816_v16 = vmul.f32 3.8918573e-05, %v4645_v56 }
 0x2b4   : > { %2625 = vmatmul.bf16.gmra.mxu1 %v2312_v48  ;;  %vm1551_vm13 = vweird.f32 %v4841_v35  ;;  %v1583_v19 = vadd.f32 0.4994258, %v1582_v12  ;;  %v1619_v4 = vadd.f32 0.014752088, %v1618_v9  ;;  %v1777_v13 = vadd.f32 0.001143296, %v1776_v5 }
 0x2b5   : > { %v1549_v45 = vmul.f32 %v3362_v49, %v1548_v55  ;;  %vm1552_vm14 = vweird.f32 %v3362_v49  ;;  %v1558_v53 = vor.u32 1.1754944e-38, %v1557_v21  ;;  %v1435_v24 = vand.u32 2147483647, %v4871_v36 }
 0x2b6   : > { %v1584_v2 = vmul.f32 %v1583_v19, %v4522_v60  ;;  %v1620_v17 = vmul.f32 %v1619_v4, %v4537_v7  ;;  %v1778_v6 = vmul.f32 %v1777_v13, %v4631_v8  ;;  %v1657_v47 = vadd.f32 0.001143296, %v1656_v51  ;;  %vm1553_vm15 = vmor %vm1551_vm13, %vm1552_vm14 }
 0x2b7   : > { %v3000_v32 = vclamps-f32 %v1400_v33, 1.0  ;;  %v1550_v38 = vadd.f32 %v3362_v49, %v1549_v45  ;;  %v1437_v22 = vand.u32 2147483648, %v4871_v36  ;;  %v1817_v57 = vadd.f32 0.001143296, %v1816_v16  ;;  %v5600_v33 = vld [vmem:[#allocation24_spill] sm:$0xff] }
 0x2b8   : > { %v3364_v52 = vpop.eup %3363  ;;  %v4893_v20 = vadd.f32 1.0, %v1584_v2  ;;  %v1621_v30 = vadd.f32 0.112945676, %v1620_v17  ;;  %v1779_v63 = vadd.f32 0.014752088, %v1778_v6  ;;  %v1658_v60 = vmul.f32 %v1657_v47, %v4554_v3 }
 0x2b9   : > { %v1554_v42 = vsel %vm1553_vm15, %v3362_v49, %v1550_v38  ;;  %vm1556_vm0 = vcmp.eq.f32.partialorder %v1555_v46, 8.507059e+37  ;;  %v1427_v23 = vmul.f32 %v3364_v52, %v4871_v36  ;;  %vm1431_vm1 = vweird.f32 %v4871_v36 }
 0x2ba   : > { %v1559_v11 = vsel %vm1556_vm0, %v1558_v53, %v1554_v42  ;;  %vm4898_vm2 = vcmp.eq.f32.partialorder %v1435_v24, 8.507059e+37  ;;  %3365 = vrcp.f32 %v4893_v20  ;;  %v1696_v35 = vmul.f32 3.8918573e-05, %v4604_v0 }
 0x2bb   : > { %v1560_v31 = vmul.f32 %v1559_v11, %v4695_v34  ;;  %v2253_v41 = vadd.f32 1.0, %v3000_v32  ;;  %v1428_v29 = vsub.f32 1.0, %v1427_v23  ;;  %v1622_v1 = vmul.f32 %v1621_v30, %v4537_v7 }
 0x2bc   : > { %v1438_v49 = vor.u32 1.1754944e-38, %v1437_v22  ;;  %v1780_v54 = vmul.f32 %v1779_v63, %v4631_v8  ;;  %v1659_v9 = vadd.f32 0.014752088, %v1658_v60  ;;  %v1818_v5 = vmul.f32 %v1817_v57, %v4645_v56 }
 0x2bd   : > { %v3004_v40 = vclamps-f32 %v1560_v31, 1.0  ;;  %v1429_v15 = vmul.f32 %v3364_v52, %v1428_v29  ;;  %vm1432_vm3 = vweird.f32 %v3364_v52  ;;  %v1623_v21 = vadd.f32 0.4994258, %v1622_v1 }
 0x2be   : > { %v1781_v12 = vadd.f32 0.112945676, %v1780_v54  ;;  %v1660_v48 = vmul.f32 %v1659_v9, %v4554_v3  ;;  %v1819_v14 = vadd.f32 0.014752088, %v1818_v5  ;;  %v1697_v51 = vadd.f32 0.001143296, %v1696_v35  ;;  %vm1433_vm4 = vmor %vm1431_vm1, %vm1432_vm3 }
 0x2bf   : > { %v2257_v34 = vadd.f32 1.0, %v3004_v40  ;;  %v2285_v55 = vmul.f32 %v2253_v41, %v5600_v33  ;;  %v1430_v46 = vadd.f32 %v3364_v52, %v1429_v15  ;;  %v1624_v16 = vmul.f32 %v1623_v21, %v4537_v7 }
 0x2c0   : > { %v3366_v19 = vpop.eup %3365  ;;  %v1595_v4 = vand.u32 2147483647, %v4893_v20  ;;  %v1782_v13 = vmul.f32 %v1781_v12, %v4631_v8  ;;  %v1661_v45 = vadd.f32 0.112945676, %v1660_v48  ;;  %v1820_v53 = vmul.f32 %v1819_v14, %v4645_v56 }
 0x2c1   : > { %v2289_v24 = vmul.f32 %v2257_v34, %v4597_v61  ;;  %v1434_v2 = vsel %vm1433_vm4, %v3364_v52, %v1430_v46  ;;  %v1587_v17 = vmul.f32 %v3366_v19, %v4893_v20  ;;  %v1698_v6 = vmul.f32 %v1697_v51, %v4604_v0  ;;  %v5605_v34 = vld [vmem:[#allocation25_spill] sm:$0xff] }
 0x2c2   : > { %v1439_v7 = vsel %vm4898_vm2, %v1438_v49, %v1434_v2  ;;  %v4921_v47 = vadd.f32 1.0, %v1624_v16  ;;  %v1783_v36 = vadd.f32 0.4994258, %v1782_v13  ;;  %v1662_v32 = vmul.f32 %v1661_v45, %v4554_v3 }
 0x2c3   : > { %v2313_v38 = vpack.c.bf16 %v2289_v24, %v2285_v55  ;;  %v1440_v22 = vmul.f32 %v1439_v7, %v4664_v28  ;;  %v1588_v57 = vsub.f32 1.0, %v1587_v17  ;;  %v1821_v30 = vadd.f32 0.112945676, %v1820_v53 }
 0x2c4   : > { %vm1591_vm5 = vweird.f32 %v4893_v20  ;;  %vm1592_vm6 = vweird.f32 %v3366_v19  ;;  %v1597_v61 = vand.u32 2147483648, %v4893_v20  ;;  %3367 = vrcp.f32 %v4921_v47 }
 0x2c5   : > { %2654 = vmatmul.bf16.gmra.mxu2 %v2313_v38  ;;  %v3001_v52 = vclamps-f32 %v1440_v22, 1.0  ;;  %v1589_v63 = vmul.f32 %v3366_v19, %v1588_v57  ;;  %v1784_v60 = vmul.f32 %v1783_v36, %v4631_v8  ;;  %v1663_v42 = vadd.f32 0.4994258, %v1662_v32  ;;  %vm1593_vm8 = vmor %vm1591_vm5, %vm1592_vm6 }
 0x2c6   : > { %vm4929_vm7 = vcmp.eq.f32.partialorder %v1595_v4, 8.507059e+37  ;;  %v1822_v28 = vmul.f32 %v1821_v30, %v4645_v56  ;;  %v1699_v11 = vadd.f32 0.014752088, %v1698_v6  ;;  %v1856_v43 = vmul.f32 3.8918573e-05, %v4671_v58 }
 0x2c7   : > { %v1590_v35 = vadd.f32 %v3366_v19, %v1589_v63  ;;  %v1635_v31 = vand.u32 2147483647, %v4921_v47  ;;  %v4936_v41 = vadd.f32 1.0, %v1784_v60  ;;  %v1664_v29 = vmul.f32 %v1663_v42, %v4554_v3 }
 0x2c8   : > { %v1598_v8 = vor.u32 1.1754944e-38, %v1597_v61  ;;  %v2254_v1 = vadd.f32 1.0, %v3001_v52  ;;  %v1637_v49 = vand.u32 2147483648, %v4921_v47  ;;  %v1823_v54 = vadd.f32 0.4994258, %v1822_v28 }
 0x2c9   : > { %v1594_v9 = vsel %vm1593_vm8, %v3366_v19, %v1590_v35  ;;  %vm1631_vm9 = vweird.f32 %v4921_v47  ;;  %3369 = vrcp.f32 %v4936_v41  ;;  %v1700_v5 = vmul.f32 %v1699_v11, %v4604_v0 }
 0x2ca   : > { %v3368_v40 = vpop.eup %3367  ;;  %v1599_v3 = vsel %vm4929_vm7, %v1598_v8, %v1594_v9  ;;  %v4948_v15 = vadd.f32 1.0, %v1664_v29  ;;  %v1857_v20 = vadd.f32 0.001143296, %v1856_v43  ;;  %v1736_v21 = vmul.f32 3.8918573e-05, %v4633_v44 }
 0x2cb   : > { %v1600_v12 = vmul.f32 %v1599_v3, %v4713_v39  ;;  %v1627_v48 = vmul.f32 %v3368_v40, %v4921_v47  ;;  %vm4953_vm10 = vcmp.eq.f32.partialorder %v1635_v31, 8.507059e+37  ;;  %v1824_v51 = vmul.f32 %v1823_v54, %v4645_v56 }
 0x2cc   : > { %v2286_v33 = vmul.f32 %v2254_v1, %v5605_v34  ;;  %v1638_v55 = vor.u32 1.1754944e-38, %v1637_v49  ;;  %v1795_v46 = vand.u32 2147483647, %v4936_v41  ;;  %3371 = vrcp.f32 %v4948_v15 }
 0x2cd   : > { %v3005_v16 = vclamps-f32 %v1600_v12, 1.0  ;;  %v1628_v19 = vsub.f32 1.0, %v1627_v48  ;;  %vm1632_vm11 = vweird.f32 %v3368_v40  ;;  %v1797_v39 = vand.u32 2147483648, %v4936_v41 }
 0x2ce   : > { %v4962_v4 = vadd.f32 1.0, %v1824_v51  ;;  %v1701_v13 = vadd.f32 0.112945676, %v1700_v5  ;;  %v1858_v45 = vmul.f32 %v1857_v20, %v4671_v58  ;;  %v1737_v53 = vadd.f32 0.001143296, %v1736_v21  ;;  %vm1633_vm15 = vmor %vm1631_vm9, %vm1632_vm11 }
 0x2cf   : > { %v3370_v24 = vpop.eup %3369  ;;  %v2258_v56 = vadd.f32 1.0, %v3005_v16  ;;  %v1629_v2 = vmul.f32 %v3368_v40, %v1628_v19  ;;  %v1675_v17 = vand.u32 2147483647, %v4948_v15  ;;  %v1677_v6 = vand.u32 2147483648, %v4948_v15 }
 0x2d0   : > { %v1787_v7 = vmul.f32 %v3370_v24, %v4936_v41  ;;  %vm1791_vm12 = vweird.f32 %v4936_v41  ;;  %vm4969_vm13 = vcmp.eq.f32.partialorder %v1795_v46, 8.507059e+37  ;;  %3373 = vrcp.f32 %v4962_v4 }
 0x2d1   : > { %v2290_v32 = vmul.f32 %v2258_v56, %v4610_v10  ;;  %v1630_v38 = vadd.f32 %v3368_v40, %v1629_v2  ;;  %v1798_v22 = vor.u32 1.1754944e-38, %v1797_v39  ;;  %vm1671_vm14 = vweird.f32 %v4948_v15 }
 0x2d2   : > { %v3372_v57 = vpop.eup %3371  ;;  %v1788_v30 = vsub.f32 1.0, %v1787_v7  ;;  %v1702_v61 = vmul.f32 %v1701_v13, %v4604_v0  ;;  %v1859_v52 = vadd.f32 0.014752088, %v1858_v45  ;;  %v1738_v63 = vmul.f32 %v1737_v53, %v4633_v44 }
 0x2d3   : > { %v2314_v60 = vpack.c.bf16 %v2290_v32, %v2286_v33  ;;  %v1634_v42 = vsel %vm1633_vm15, %v3368_v40, %v1630_v38  ;;  %v1667_v23 = vmul.f32 %v3372_v57, %v4948_v15  ;;  %vm4982_vm0 = vcmp.eq.f32.partialorder %v1675_v17, 8.507059e+37  ;;  %v5610_v38 = vld [vmem:[#allocation39_spill] sm:$0xff] }
 0x2d4   : > { %v1678_v28 = vor.u32 1.1754944e-38, %v1677_v6  ;;  %v1639_v11 = vsel %vm4953_vm10, %v1638_v55, %v1634_v42  ;;  %v1789_v47 = vmul.f32 %v3370_v24, %v1788_v30  ;;  %vm1792_vm1 = vweird.f32 %v3370_v24  ;;  %v5611_v30 = vld [vmem:[#allocation26_spill] sm:$0xff] }
 0x2d5   : > { %v1835_v43 = vand.u32 2147483647, %v4962_v4  ;;  %2683 = vmatmul.bf16.gmra.mxu3 %v2314_v60  ;;  %v1640_v35 = vmul.f32 %v1639_v11, %v4749_v27  ;;  %v1668_v31 = vsub.f32 1.0, %v1667_v23  ;;  %v1703_v29 = vadd.f32 0.4994258, %v1702_v61  ;;  %vm1793_vm3 = vmor %vm1791_vm12, %vm1792_vm1 }
 0x2d6   : > { %v1860_v8 = vmul.f32 %v1859_v52, %v4671_v58  ;;  %v3374_v1 = vpop.eup %3373  ;;  %v1790_v49 = vadd.f32 %v3370_v24, %v1789_v47  ;;  %vm1672_vm2 = vweird.f32 %v3372_v57  ;;  %v1837_v54 = vand.u32 2147483648, %v4962_v4  ;;  %v5613_v47 = vld [vmem:[#allocation34_spill] sm:$0xff] }
 0x2d7   : > { %v1739_v9 = vadd.f32 0.014752088, %v1738_v63  ;;  %v3006_v5 = vclamps-f32 %v1640_v35, 1.0  ;;  %v1669_v40 = vmul.f32 %v3372_v57, %v1668_v31  ;;  %v1827_v3 = vmul.f32 %v3374_v1, %v4962_v4  ;;  %vm1673_vm5 = vmor %vm1671_vm14, %vm1672_vm2 }
 0x2d8   : > { %v1896_v20 = vmul.f32 3.8918573e-05, %v4709_v37  ;;  %v1794_v27 = vsel %vm1793_vm3, %v3370_v24, %v1790_v49  ;;  %v1704_v21 = vmul.f32 %v1703_v29, %v4604_v0  ;;  %v1861_v12 = vadd.f32 0.112945676, %v1860_v8  ;;  %v5614_v29 = vld [vmem:[#allocation28_spill] sm:$0xff] }
 0x2d9   : > { %v1740_v48 = vmul.f32 %v1739_v9, %v4633_v44  ;;  %v1799_v14 = vsel %vm4969_vm13, %v1798_v22, %v1794_v27  ;;  %v1670_v51 = vadd.f32 %v3372_v57, %v1669_v40  ;;  %v1828_v34 = vsub.f32 1.0, %v1827_v3 }
 0x2da   : > { %vm1832_vm4 = vweird.f32 %v3374_v1  ;;  %v1800_v41 = vmul.f32 %v1799_v14, %v4762_v62  ;;  %v5004_v33 = vadd.f32 1.0, %v1704_v21  ;;  %v1862_v55 = vmul.f32 %v1861_v12, %v4671_v58 }
 0x2db   : > { %v1741_v46 = vadd.f32 0.112945676, %v1740_v48  ;;  %v2259_v16 = vadd.f32 1.0, %v3006_v5  ;;  %v1674_v19 = vsel %vm1673_vm5, %v3372_v57, %v1670_v51  ;;  %v1829_v39 = vmul.f32 %v3374_v1, %v1828_v34 }
 0x2dc   : > { %v1897_v13 = vadd.f32 0.001143296, %v1896_v20  ;;  %v1852_v45 = vadd.f32 0.18741608, %v4776_v18  ;;  %v3010_v53 = vclamps-f32 %v1800_v41, 1.0  ;;  %v1679_v24 = vsel %vm4982_vm0, %v1678_v28, %v1674_v19  ;;  %v5612_v28 = vld [vmem:[#allocation27_spill] sm:$0xff] }
 0x2dd   : > { %3375 = vrcp.f32 %v5004_v33  ;;  %v1680_v62 = vmul.f32 %v1679_v24, %v4756_v25  ;;  %v1830_v15 = vadd.f32 %v3374_v1, %v1829_v39  ;;  %vm1831_vm6 = vweird.f32 %v4962_v4  ;;  %v5615_v39 = vld [vmem:[#allocation31_spill] sm:$0xff] }
 0x2de   : > { %v1838_v56 = vor.u32 1.1754944e-38, %v1837_v54  ;;  %v2263_v2 = vadd.f32 1.0, %v3010_v53  ;;  %vm1833_vm7 = vmor %vm1831_vm6, %vm1832_vm4  ;;  %v1863_v17 = vadd.f32 0.4994258, %v1862_v55  ;;  %v1742_v6 = vmul.f32 %v1741_v46, %v4633_v44 }
 0x2df   : > { %v1898_v18 = vmul.f32 %v1897_v13, %v4709_v37  ;;  %v2291_v7 = vmul.f32 %v2259_v16, %v4643_v50  ;;  %v3007_v36 = vclamps-f32 %v1680_v62, 1.0  ;;  %v1834_v32 = vsel %vm1833_vm7, %v3374_v1, %v1830_v15 }
 0x2e0   : > { %vm1836_vm8 = vcmp.eq.f32.partialorder %v1835_v43, 8.507059e+37  ;;  %v2295_v22 = vmul.f32 %v2263_v2, %v5610_v38  ;;  %v1864_v57 = vmul.f32 %v1863_v17, %v4671_v58  ;;  %v1743_v4 = vadd.f32 0.4994258, %v1742_v6  ;;  %v807_v6 = vpop.f32.mrf.mxu0 }
 0x2e1   : > { %v1839_v25 = vsel %vm1836_vm8, %v1838_v56, %v1834_v32  ;;  %v1731_v61 = vmul.f32 %v5611_v30, %v4633_v44  ;;  %v1899_v63 = vadd.f32 0.014752088, %v1898_v18  ;;  %v2260_v23 = vadd.f32 1.0, %v3007_v36  ;;  %v5617_v36 = vld [vmem:[#allocation18_spill] sm:$0xff] }
 0x2e2   : > { %v1840_v52 = vmul.f32 %v1839_v25, %v4860_v59  ;;  %v2315_v42 = vpack.c.bf16 %v2295_v22, %v2291_v7  ;;  %v5022_v10 = vadd.f32 1.0, %v1864_v57  ;;  %v1744_v50 = vmul.f32 %v1743_v4, %v4633_v44  ;;  %v5618_v25 = vld [vmem:[#allocation19_spill] sm:$0xff]  ;;  %v865_v4 = vpop.f32.mrf.mxu2 }
 0x2e3   : > { %v3376_v60 = vpop.eup %3375  ;;  %v916_v11 = vmul.f32 0.5, %v5612_v28  ;;  %v920_v43 = vmul.f32 0.5, %v5613_v47  ;;  %v1693_v8 = vmul.f32 %v5614_v29, %v4604_v0  ;;  %v1853_v59 = vmul.f32 %v1852_v45, %v4671_v58  ;;  %v5621_v28 = vld [vmem:[#allocation20_spill] sm:$0xff] }
 0x2e4   : > { %v3011_v35 = vclamps-f32 %v1840_v52, 1.0  ;;  %v1707_v31 = vmul.f32 %v3376_v60, %v5004_v33  ;;  %v1890_v1 = vadd.f32 0.05243302, %v4855_v26  ;;  %2601 = vmatmul.bf16.gmra.mxu0 %v2315_v42  ;;  %3377 = vrcp.f32 %v5022_v10 }
 0x2e5   : > { %v5033_v9 = vadd.f32 1.0, %v1744_v50  ;;  %v1900_v5 = vmul.f32 %v1899_v63, %v4709_v37  ;;  %v1732_v40 = vadd.f32 0.18741608, %v1731_v61  ;;  %v2292_v3 = vmul.f32 %v2260_v23, %v916_v11 }
 0x2e6   : > { %v2264_v49 = vadd.f32 1.0, %v3011_v35  ;;  %v1708_v54 = vsub.f32 1.0, %v1707_v31  ;;  %v1715_v20 = vand.u32 2147483647, %v5004_v33  ;;  %v1717_v27 = vand.u32 2147483648, %v5004_v33 }
 0x2e7   : > { %vm1712_vm9 = vweird.f32 %v3376_v60  ;;  %3379 = vrcp.f32 %v5033_v9  ;;  %v1694_v58 = vadd.f32 1.1283791, %v1693_v8  ;;  %v1891_v26 = vmul.f32 %v1890_v1, %v4709_v37  ;;  %v5622_v1 = vld [vmem:[#allocation30_spill] sm:$0xff] }
 0x2e8   : > { %v2296_v0 = vmul.f32 %v2264_v49, %v920_v43  ;;  %v1709_v21 = vmul.f32 %v3376_v60, %v1708_v54  ;;  %v1901_v12 = vadd.f32 0.112945676, %v1900_v5  ;;  %v1854_v48 = vadd.f32 1.1283791, %v1853_v59 }
 0x2e9   : > { %vm1711_vm10 = vweird.f32 %v5004_v33  ;;  %v1718_v41 = vor.u32 1.1754944e-38, %v1717_v27  ;;  %v1733_v46 = vmul.f32 %v1732_v40, %v4633_v44  ;;  %vm1716_vm12 = vcmp.eq.f32.partialorder %v1715_v20, 8.507059e+37  ;;  %v5616_v33 = vld [vmem:[#allocation36_spill] sm:$0xff]  ;;  %v836_v44 = vpop.f32.mrf.mxu1 }
 0x2ea   : > { %v2316_v14 = vpack.c.bf16 %v2296_v0, %v2292_v3  ;;  %v1710_v51 = vadd.f32 %v3376_v60, %v1709_v21  ;;  %v3378_v34 = vpop.eup %3377  ;;  %vm1713_vm11 = vmor %vm1711_vm10, %vm1712_vm9  ;;  %v1902_v55 = vmul.f32 %v1901_v12, %v4709_v37  ;;  %v1695_v13 = vmul.f32 %v1694_v58, %v5615_v39  ;;  %v809_v58 = vpop.f32.mrf.mxu0 }
 0x2eb   : > { %v1867_v19 = vmul.f32 %v3378_v34, %v5022_v10  ;;  %v1875_v53 = vand.u32 2147483647, %v5022_v10  ;;  %v1855_v15 = vmul.f32 %v1854_v48, %v5616_v33  ;;  %v1892_v56 = vadd.f32 0.18741608, %v1891_v26 }
 0x2ec   : > { %2630 = vmatmul.bf16.gmra.mxu1 %v2316_v14  ;;  %v1714_v16 = vsel %vm1713_vm11, %v3376_v60, %v1710_v51  ;;  %v1903_v24 = vadd.f32 0.4994258, %v1902_v55  ;;  %v1877_v17 = vand.u32 2147483648, %v5022_v10  ;;  %vm1871_vm13 = vweird.f32 %v5022_v10  ;;  %v894_v14 = vpop.f32.mrf.mxu3 }
 0x2ed   : > { %v1719_v45 = vsel %vm1716_vm12, %v1718_v41, %v1714_v16  ;;  %v3380_v62 = vpop.eup %3379  ;;  %v1868_v2 = vsub.f32 1.0, %v1867_v19  ;;  %v5052_v32 = vadd.f32 %v807_v6, %v5617_v36  ;;  %vm1872_vm14 = vweird.f32 %v3378_v34 }
 0x2ee   : > { %v1747_v18 = vmul.f32 %v3380_v62, %v5033_v9  ;;  %v1904_v7 = vmul.f32 %v1903_v24, %v4709_v37  ;;  %v1720_v38 = vmul.f32 %v1719_v45, %v1695_v13  ;;  %v5055_v57 = vadd.f32 %v836_v44, %v5618_v25  ;;  %vm1873_vm1 = vmor %vm1871_vm13, %vm1872_vm14  ;;  %v5626_v13 = vld [vmem:[#allocation33_spill] sm:$0xff] }
 0x2ef   : > { %v1869_v22 = vmul.f32 %v3378_v34, %v1868_v2  ;;  %vm5057_vm15 = vcmp.eq.f32.partialorder %v1875_v53, 8.507059e+37  ;;  %v5064_v63 = vmul.f32 0.70710677, %v5052_v32  ;;  %v1878_v42 = vor.u32 1.1754944e-38, %v1877_v17 }
 0x2f0   : > { %v1748_v61 = vsub.f32 1.0, %v1747_v18  ;;  %v5061_v52 = vadd.f32 1.0, %v1904_v7  ;;  %vm1751_vm0 = vweird.f32 %v5033_v9  ;;  %v5068_v23 = vmul.f32 0.70710677, %v5055_v57 }
 0x2f1   : > { %v1870_v60 = vadd.f32 %v3378_v34, %v1869_v22  ;;  %vm1752_vm2 = vweird.f32 %v3380_v62  ;;  %v5074_v11 = vadd.f32 %v865_v4, %v5621_v28  ;;  %v3008_v47 = vclamps-f32 %v1720_v38, 1.0 }
 0x2f2   : > { %v1749_v50 = vmul.f32 %v3380_v62, %v1748_v61  ;;  %3381 = vrcp.f32 %v5061_v52  ;;  %v1757_v35 = vand.u32 2147483648, %v5033_v9  ;;  %v1923_v31 = vmul.f32 %v5064_v63, %v5064_v63  ;;  %vm5087_vm3 = vmor %vm1751_vm0, %vm1752_vm2 }
 0x2f3   : > { %v1874_v43 = vsel %vm1873_vm1, %v3378_v34, %v1870_v60  ;;  %v1755_v10 = vand.u32 2147483647, %v5033_v9  ;;  %v1963_v59 = vmul.f32 %v5068_v23, %v5068_v23  ;;  %v917_v49 = vmul.f32 0.5, %v5622_v1  ;;  %v5625_v34 = vld [vmem:[#allocation35_spill] sm:$0xff]  ;;  %v867_v1 = vpop.f32.mrf.mxu2 }
 0x2f4   : > { %v1879_v29 = vsel %vm5057_vm15, %v1878_v42, %v1874_v43  ;;  %v1750_v8 = vadd.f32 %v3380_v62, %v1749_v50  ;;  %v1734_v54 = vadd.f32 1.1283791, %v1733_v46  ;;  %v5091_v3 = vmin.f32 %v1923_v31, 16.0  ;;  %v5628_v43 = vld [vmem:[#allocation38_spill] sm:$0xff] }
 0x2f5   : > { %v1880_v5 = vmul.f32 %v1879_v29, %v1855_v15  ;;  %v1893_v20 = vmul.f32 %v1892_v56, %v4709_v37  ;;  %v5096_v0 = vmin.f32 %v1963_v59, 16.0  ;;  %v5099_v21 = vmul.f32 0.70710677, %v5074_v11 }
 0x2f6   : > { %v1754_v27 = vsel %vm5087_vm3, %v3380_v62, %v1750_v8  ;;  %v2261_v12 = vadd.f32 1.0, %v3008_v47  ;;  %v1758_v9 = vor.u32 1.1754944e-38, %v1757_v35  ;;  %v1925_v48 = vmul.f32 2.1237322e-06, %v5091_v3  ;;  %v5627_v62 = vld [vmem:[#allocation21_spill] sm:$0xff] }
 0x2f7   : > { %v3012_v26 = vclamps-f32 %v1880_v5, 1.0  ;;  %v921_v41 = vmul.f32 0.5, %v5625_v34  ;;  %vm1756_vm4 = vcmp.eq.f32.partialorder %v1755_v10, 8.507059e+37  ;;  %v1965_v37 = vmul.f32 2.1237322e-06, %v5096_v0 }
 0x2f8   : > { %v3382_v51 = vpop.eup %3381  ;;  %v2003_v55 = vmul.f32 %v5099_v21, %v5099_v21  ;;  %v1759_v16 = vsel %vm1756_vm4, %v1758_v9, %v1754_v27  ;;  %v5108_v39 = vadd.f32 %v809_v58, %v5617_v36  ;;  %v1735_v45 = vmul.f32 %v1734_v54, %v5626_v13  ;;  %v838_v36 = vpop.f32.mrf.mxu1 }
 0x2f9   : > { %v2265_v46 = vadd.f32 1.0, %v3012_v26  ;;  %v1907_v19 = vmul.f32 %v3382_v51, %v5061_v52  ;;  %v1926_v53 = vadd.f32 0.00028619796, %v1925_v48  ;;  %v1966_v24 = vadd.f32 0.00028619796, %v1965_v37 }
 0x2fa   : > { %v5112_v33 = vadd.f32 %v894_v14, %v5627_v62  ;;  %v1894_v15 = vadd.f32 1.1283791, %v1893_v20  ;;  %v2293_v56 = vmul.f32 %v2261_v12, %v917_v49  ;;  %v1760_v6 = vmul.f32 %v1759_v16, %v1735_v45  ;;  %v5629_v14 = vld [vmem:[#allocation32_spill] sm:$0xff] }
 0x2fb   : > { %v2297_v2 = vmul.f32 %v2265_v46, %v921_v41  ;;  %v1908_v17 = vsub.f32 1.0, %v1907_v19  ;;  %v1915_v44 = vand.u32 2147483647, %v5061_v52  ;;  %v1917_v18 = vand.u32 2147483648, %v5061_v52 }
 0x2fc   : > { %v5116_v7 = vmin.f32 %v2003_v55, 16.0  ;;  %vm1912_vm5 = vweird.f32 %v3382_v51  ;;  %v5119_v4 = vmul.f32 0.70710677, %v5108_v39  ;;  %v1927_v30 = vmul.f32 %v1926_v53, %v5091_v3  ;;  %v5630_v55 = vld [vmem:[#allocation37_spill] sm:$0xff] }
 0x2fd   : > { %v2317_v38 = vpack.c.bf16 %v2297_v2, %v2293_v56  ;;  %v1909_v22 = vmul.f32 %v3382_v51, %v1908_v17  ;;  %v1967_v61 = vmul.f32 %v1966_v24, %v5096_v0  ;;  %v5124_v60 = vmul.f32 0.70710677, %v5112_v33 }
 0x2fe   : > { %vm1911_vm6 = vweird.f32 %v5061_v52  ;;  %v2083_v50 = vmul.f32 %v5119_v4, %v5119_v4  ;;  %v5130_v47 = vadd.f32 %v838_v36, %v5618_v25  ;;  %v1895_v35 = vmul.f32 %v1894_v15, %v5628_v43 }
 0x2ff   : > { %2659 = vmatmul.bf16.gmra.mxu2 %v2317_v38  ;;  %v1910_v42 = vadd.f32 %v3382_v51, %v1909_v22  ;;  %vm1913_vm7 = vmor %vm1911_vm6, %vm1912_vm5  ;;  %v1918_v31 = vor.u32 1.1754944e-38, %v1917_v18  ;;  %v2005_v29 = vmul.f32 2.1237322e-06, %v5116_v7  ;;  %v3009_v8 = vclamps-f32 %v1760_v6, 1.0  ;;  %v896_v22 = vpop.f32.mrf.mxu3 }
 0x300   : > { %vm1916_vm8 = vcmp.eq.f32.partialorder %v1915_v44, 8.507059e+37  ;;  %v5134_v59 = vmin.f32 %v2083_v50, 16.0  ;;  %v1928_v52 = vadd.f32 0.0036580483, %v1927_v30  ;;  %v1968_v54 = vadd.f32 0.0036580483, %v1967_v61 }
 0x301   : > { %v1914_v10 = vsel %vm1913_vm7, %v3382_v51, %v1910_v42  ;;  %v2043_v5 = vmul.f32 %v5124_v60, %v5124_v60  ;;  %v5140_v20 = vmul.f32 0.70710677, %v5130_v47  ;;  %v2006_v27 = vadd.f32 0.00028619796, %v2005_v29 }
 0x302   : > { %v1919_v49 = vsel %vm1916_vm8, %v1918_v31, %v1914_v10  ;;  %v2085_v40 = vmul.f32 2.1237322e-06, %v5134_v59  ;;  %v5143_v58 = vadd.f32 %v867_v1, %v5621_v28  ;;  %v2262_v12 = vadd.f32 1.0, %v3009_v8 }
 0x303   : > { %v1920_v25 = vmul.f32 %v1919_v49, %v1895_v35  ;;  %v2123_v48 = vmul.f32 %v5140_v20, %v5140_v20  ;;  %v918_v51 = vmul.f32 0.5, %v5629_v14  ;;  %v1929_v34 = vmul.f32 %v1928_v52, %v5091_v3 }
 0x304   : > { %v2086_v9 = vadd.f32 0.00028619796, %v2085_v40  ;;  %v1969_v41 = vmul.f32 %v1968_v54, %v5096_v0  ;;  %v5150_v37 = vmin.f32 %v2043_v5, 16.0  ;;  %v922_v46 = vmul.f32 0.5, %v5630_v55 }
 0x305   : > { %v3013_v26 = vclamps-f32 %v1920_v25, 1.0  ;;  %v5154_v19 = vmin.f32 %v2123_v48, 16.0  ;;  %v2007_v13 = vmul.f32 %v2006_v27, %v5116_v7  ;;  %v5158_v45 = vmul.f32 0.70710677, %v5143_v58 }
 0x306   : > { %v2087_v28 = vmul.f32 %v2086_v9, %v5134_v59  ;;  %v2294_v53 = vmul.f32 %v2262_v12, %v918_v51  ;;  %v1930_v56 = vadd.f32 0.05243302, %v1929_v34  ;;  %v1970_v2 = vadd.f32 0.05243302, %v1969_v41 }
 0x307   : > { %v2266_v16 = vadd.f32 1.0, %v3013_v26  ;;  %v2125_v15 = vmul.f32 2.1237322e-06, %v5154_v19  ;;  %v2045_v17 = vmul.f32 2.1237322e-06, %v5150_v37  ;;  %v2163_v38 = vmul.f32 %v5158_v45, %v5158_v45 }
 0x308   : > { %v2088_v44 = vadd.f32 0.0036580483, %v2087_v28  ;;  %v2008_v36 = vadd.f32 0.0036580483, %v2007_v13  ;;  %v1931_v61 = vmul.f32 %v1930_v56, %v5091_v3  ;;  %v1971_v42 = vmul.f32 %v1970_v2, %v5096_v0 }
 0x309   : > { %v2298_v24 = vmul.f32 %v2266_v16, %v922_v46  ;;  %v2126_v18 = vadd.f32 0.00028619796, %v2125_v15  ;;  %v2046_v50 = vadd.f32 0.00028619796, %v2045_v17  ;;  %v5169_v31 = vadd.f32 %v896_v22, %v5627_v62 }
 0x30a   : > { %v2089_v43 = vmul.f32 %v2088_v44, %v5134_v59  ;;  %v1936_v29 = vmul.f32 3.8918573e-05, %v5091_v3  ;;  %v2009_v8 = vmul.f32 %v2008_v36, %v5116_v7  ;;  %v5173_v10 = vmin.f32 %v2163_v38, 16.0 }
 0x30b   : > { %v2318_v6 = vpack.c.bf16 %v2298_v24, %v2294_v53  ;;  %v2127_v30 = vmul.f32 %v2126_v18, %v5154_v19  ;;  %v1976_v1 = vmul.f32 3.8918573e-05, %v5096_v0  ;;  %v5177_v49 = vmul.f32 0.5, %v5052_v32 }
 0x30c   : > { %v5180_v52 = vmul.f32 0.5, %v5055_v57  ;;  %v1937_v5 = vadd.f32 0.001143296, %v1936_v29  ;;  %v1932_v25 = vadd.f32 0.18741608, %v1931_v61  ;;  %v2047_v62 = vmul.f32 %v2046_v50, %v5150_v37 }
 0x30d   : > { %2688 = vmatmul.bf16.gmra.mxu3 %v2318_v6  ;;  %v2128_v35 = vadd.f32 0.0036580483, %v2127_v30  ;;  %v5185_v40 = vmul.f32 0.5, %v5108_v39  ;;  %v1977_v27 = vadd.f32 0.001143296, %v1976_v1 }
 0x30e   : > { %v1972_v26 = vadd.f32 0.18741608, %v1971_v42  ;;  %v2090_v12 = vadd.f32 0.05243302, %v2089_v43  ;;  %v5188_v9 = vmul.f32 0.70710677, %v5169_v31  ;;  %v1938_v32 = vmul.f32 %v1937_v5, %v5091_v3 }
 0x30f   : > { %v2129_v54 = vmul.f32 %v2128_v35, %v5154_v19  ;;  %v2010_v48 = vadd.f32 0.05243302, %v2009_v8  ;;  %v2165_v57 = vmul.f32 2.1237322e-06, %v5173_v10  ;;  %v2096_v14 = vmul.f32 3.8918573e-05, %v5134_v59 }
 0x310   : > { %v1978_v51 = vmul.f32 %v1977_v27, %v5096_v0  ;;  %v1939_v41 = vadd.f32 0.014752088, %v1938_v32  ;;  %v2016_v39 = vmul.f32 3.8918573e-05, %v5116_v7  ;;  %v2136_v16 = vmul.f32 3.8918573e-05, %v5154_v19 }
 0x311   : > { %v2130_v34 = vadd.f32 0.05243302, %v2129_v54  ;;  %v2097_v55 = vadd.f32 0.001143296, %v2096_v14  ;;  %v2048_v28 = vadd.f32 0.0036580483, %v2047_v62  ;;  %v2091_v13 = vmul.f32 %v2090_v12, %v5134_v59 }
 0x312   : > { %v1979_v46 = vadd.f32 0.014752088, %v1978_v51  ;;  %v2203_v53 = vmul.f32 %v5188_v9, %v5188_v9  ;;  %v1940_v24 = vmul.f32 %v1939_v41, %v5091_v3  ;;  %v2166_v15 = vadd.f32 0.00028619796, %v2165_v57 }
 0x313   : > { %v2098_v56 = vmul.f32 %v2097_v55, %v5134_v59  ;;  %v2137_v17 = vadd.f32 0.001143296, %v2136_v16  ;;  %v1933_v6 = vmul.f32 %v1932_v25, %v5091_v3  ;;  %v2131_v44 = vmul.f32 %v2130_v34, %v5154_v19 }
 0x314   : > { %v1980_v2 = vmul.f32 %v1979_v46, %v5096_v0  ;;  %v1941_v18 = vadd.f32 0.112945676, %v1940_v24  ;;  %v2017_v36 = vadd.f32 0.001143296, %v2016_v39  ;;  %v1973_v38 = vmul.f32 %v1972_v26, %v5096_v0 }
 0x315   : > { %v2099_v22 = vadd.f32 0.014752088, %v2098_v56  ;;  %v2138_v61 = vmul.f32 %v2137_v17, %v5154_v19  ;;  %v2092_v42 = vadd.f32 0.18741608, %v2091_v13  ;;  %v5206_v50 = vmin.f32 %v2203_v53, 16.0 }
 0x316   : > { %v1981_v30 = vadd.f32 0.112945676, %v1980_v2  ;;  %v1942_v43 = vmul.f32 %v1941_v18, %v5091_v3  ;;  %v2018_v35 = vmul.f32 %v2017_v36, %v5116_v7  ;;  %v2167_v29 = vmul.f32 %v2166_v15, %v5173_v10 }
 0x317   : > { %v2100_v8 = vmul.f32 %v2099_v22, %v5134_v59  ;;  %v2139_v54 = vadd.f32 0.014752088, %v2138_v61  ;;  %v2011_v5 = vmul.f32 %v2010_v48, %v5116_v7  ;;  %v2132_v25 = vadd.f32 0.18741608, %v2131_v44 }
 0x318   : > { %v1982_v1 = vmul.f32 %v1981_v30, %v5096_v0  ;;  %v1943_v62 = vadd.f32 0.4994258, %v1942_v43  ;;  %v2019_v27 = vadd.f32 0.014752088, %v2018_v35  ;;  %v2049_v26 = vmul.f32 %v2048_v28, %v5150_v37 }
 0x319   : > { %v2101_v12 = vadd.f32 0.112945676, %v2100_v8  ;;  %v2140_v57 = vmul.f32 %v2139_v54, %v5154_v19  ;;  %v2093_v14 = vmul.f32 %v2092_v42, %v5134_v59  ;;  %v2205_v51 = vmul.f32 2.1237322e-06, %v5206_v50 }
 0x31a   : > { %v1983_v32 = vadd.f32 0.4994258, %v1982_v1  ;;  %v1944_v34 = vmul.f32 %v1943_v62, %v5091_v3  ;;  %v2020_v41 = vmul.f32 %v2019_v27, %v5116_v7  ;;  %v2168_v39 = vadd.f32 0.0036580483, %v2167_v29 }
 0x31b   : > { %v2102_v48 = vmul.f32 %v2101_v12, %v5134_v59  ;;  %v2141_v46 = vadd.f32 0.112945676, %v2140_v57  ;;  %v1934_v16 = vadd.f32 1.1283791, %v1933_v6  ;;  %v1974_v28 = vadd.f32 1.1283791, %v1973_v38 }
 0x31c   : > { %v1984_v55 = vmul.f32 %v1983_v32, %v5096_v0  ;;  %v2133_v13 = vmul.f32 %v2132_v25, %v5154_v19  ;;  %v5223_v53 = vadd.f32 1.0, %v1944_v34  ;;  %v2021_v3 = vadd.f32 0.112945676, %v2020_v41 }
 0x31d   : > { %v2103_v24 = vadd.f32 0.4994258, %v2102_v48  ;;  %v2142_v56 = vmul.f32 %v2141_v46, %v5154_v19  ;;  %v2012_v2 = vadd.f32 0.18741608, %v2011_v5  ;;  %v2094_v17 = vadd.f32 1.1283791, %v2093_v14 }
 0x31e   : > { %v5225_v15 = vadd.f32 1.0, %v1984_v55  ;;  %3383 = vrcp.f32 %v5223_v53  ;;  %v2176_v44 = vmul.f32 3.8918573e-05, %v5173_v10  ;;  %v2169_v0 = vmul.f32 %v2168_v39, %v5173_v10 }
 0x31f   : > { %v2206_v6 = vadd.f32 0.00028619796, %v2205_v51  ;;  %v2104_v18 = vmul.f32 %v2103_v24, %v5134_v59  ;;  %v5234_v36 = vmul.f32 %v1934_v16, %v5064_v63  ;;  %v5236_v38 = vadd.f32 0.05243302, %v2049_v26 }
 0x320   : > { %3385 = vrcp.f32 %v5225_v15  ;;  %v5239_v22 = vmul.f32 0.5, %v5130_v47  ;;  %v2134_v30 = vadd.f32 1.1283791, %v2133_v13  ;;  %v5242_v61 = vmul.f32 %v1974_v28, %v5068_v23 }
 0x321   : > { %v5244_v42 = vadd.f32 1.0, %v2104_v18  ;;  %v2143_v43 = vadd.f32 0.4994258, %v2142_v56  ;;  %v2022_v35 = vmul.f32 %v2021_v3, %v5116_v7  ;;  %v5248_v59 = vmul.f32 %v2012_v2, %v5116_v7 }
 0x322   : > { %v5251_v63 = vmul.f32 %v2094_v17, %v5119_v4  ;;  %v1955_v29 = vand.u32 2147483647, %v5223_v53  ;;  %v2177_v8 = vadd.f32 0.001143296, %v2176_v44  ;;  %v5254_v47 = vadd.f32 0.05243302, %v2169_v0 }
 0x323   : > { %v5257_v1 = vmul.f32 %v2206_v6, %v5206_v50  ;;  %v1957_v23 = vand.u32 2147483648, %v5223_v53  ;;  %3387 = vrcp.f32 %v5244_v42  ;;  %v5262_v5 = vmul.f32 %v2134_v30, %v5140_v20 }
 0x324   : > { %v3384_v54 = vpop.eup %3383  ;;  %vm1951_vm9 = vweird.f32 %v5223_v53  ;;  %v2144_v4 = vmul.f32 %v2143_v43, %v5154_v19  ;;  %v2023_v25 = vadd.f32 0.4994258, %v2022_v35  ;;  %vm1991_vm10 = vweird.f32 %v5225_v15 }
 0x325   : > { %v1947_v27 = vmul.f32 %v3384_v54, %v5223_v53  ;;  %v2178_v26 = vmul.f32 %v2177_v8, %v5173_v10  ;;  %v2056_v12 = vmul.f32 3.8918573e-05, %v5150_v37  ;;  %vm5270_vm11 = vcmp.eq.f32.partialorder %v1955_v29, 8.507059e+37 }
 0x326   : > { %v3386_v62 = vpop.eup %3385  ;;  %v1995_v57 = vand.u32 2147483647, %v5225_v15  ;;  %v5276_v14 = vadd.f32 1.0, %v2144_v4  ;;  %v1958_v51 = vor.u32 1.1754944e-38, %v1957_v23  ;;  %v1997_v34 = vand.u32 2147483648, %v5225_v15 }
 0x327   : > { %v1987_v20 = vmul.f32 %v3386_v62, %v5225_v15  ;;  %v1948_v19 = vsub.f32 1.0, %v1947_v27  ;;  %v2024_v41 = vmul.f32 %v2023_v25, %v5116_v7  ;;  %vm1952_vm12 = vweird.f32 %v3384_v54 }
 0x328   : > { %v2115_v39 = vand.u32 2147483647, %v5244_v42  ;;  %3389 = vrcp.f32 %v5276_v14  ;;  %v2179_v28 = vadd.f32 0.014752088, %v2178_v26  ;;  %v2057_v13 = vadd.f32 0.001143296, %v2056_v12  ;;  %vm1953_vm15 = vmor %vm1951_vm9, %vm1952_vm12 }
 0x329   : > { %v1988_v48 = vsub.f32 1.0, %v1987_v20  ;;  %v3388_v55 = vpop.eup %3387  ;;  %v1949_v46 = vmul.f32 %v3384_v54, %v1948_v19  ;;  %v5282_v16 = vadd.f32 1.0, %v2024_v41  ;;  %vm1992_vm13 = vweird.f32 %v3386_v62 }
 0x32a   : > { %v2107_v24 = vmul.f32 %v3388_v55, %v5244_v42  ;;  %vm5285_vm14 = vcmp.eq.f32.partialorder %v1995_v57, 8.507059e+37  ;;  %v2117_v2 = vand.u32 2147483648, %v5244_v42  ;;  %v1998_v17 = vor.u32 1.1754944e-38, %v1997_v34  ;;  %vm1993_vm2 = vmor %vm1991_vm10, %vm1992_vm13 }
 0x32b   : > { %v1989_v56 = vmul.f32 %v3386_v62, %v1988_v48  ;;  %v1950_v7 = vadd.f32 %v3384_v54, %v1949_v46  ;;  %3391 = vrcp.f32 %v5282_v16  ;;  %vm2111_vm0 = vweird.f32 %v5244_v42 }
 0x32c   : > { %v2108_v44 = vsub.f32 1.0, %v2107_v24  ;;  %vm5295_vm1 = vcmp.eq.f32.partialorder %v2115_v39, 8.507059e+37  ;;  %v2180_v30 = vmul.f32 %v2179_v28, %v5173_v10  ;;  %v2058_v43 = vmul.f32 %v2057_v13, %v5150_v37 }
 0x32d   : > { %v1990_v6 = vadd.f32 %v3386_v62, %v1989_v56  ;;  %v1954_v18 = vsel %vm1953_vm15, %v3384_v54, %v1950_v7  ;;  %v2216_v35 = vmul.f32 3.8918573e-05, %v5206_v50  ;;  %vm2112_vm3 = vweird.f32 %v3388_v55 }
 0x32e   : > { %v3390_v53 = vpop.eup %3389  ;;  %v1959_v29 = vsel %vm5270_vm11, %v1958_v51, %v1954_v18  ;;  %v2109_v8 = vmul.f32 %v3388_v55, %v2108_v44  ;;  %v2118_v25 = vor.u32 1.1754944e-38, %v2117_v2  ;;  %vm2151_vm4 = vweird.f32 %v5276_v14  ;;  %vm2113_vm5 = vmor %vm2111_vm0, %vm2112_vm3 }
 0x32f   : > { %v1994_v23 = vsel %vm1993_vm2, %v3386_v62, %v1990_v6  ;;  %v1960_v4 = vmul.f32 %v1959_v29, %v5234_v36  ;;  %v2147_v54 = vmul.f32 %v3390_v53, %v5276_v14  ;;  %v2155_v26 = vand.u32 2147483647, %v5276_v14 }
 0x330   : > { %v1999_v15 = vsel %vm5285_vm14, %v1998_v17, %v1994_v23  ;;  %v2110_v27 = vadd.f32 %v3388_v55, %v2109_v8  ;;  %v2181_v12 = vadd.f32 0.112945676, %v2180_v30  ;;  %v2157_v36 = vand.u32 2147483648, %v5276_v14 }
 0x331   : > { %v5312_v20 = vpop.eup %3391  ;;  %v2148_v62 = vsub.f32 1.0, %v2147_v54  ;;  %v2059_v32 = vadd.f32 0.014752088, %v2058_v43  ;;  %v2217_v57 = vadd.f32 0.001143296, %v2216_v35  ;;  %v3014_v19 = vclamps-f32 %v1960_v4, 1.0 }
 0x332   : > { %v2114_v51 = vsel %vm2113_vm5, %v3388_v55, %v2110_v27  ;;  %v2000_v34 = vmul.f32 %v1999_v15, %v5242_v61  ;;  %v2027_v41 = vmul.f32 %v5312_v20, %v5282_v16  ;;  %vm2152_vm6 = vweird.f32 %v3390_v53 }
 0x333   : > { %v2119_v39 = vsel %vm5295_vm1, %v2118_v25, %v2114_v51  ;;  %v2149_v48 = vmul.f32 %v3390_v53, %v2148_v62  ;;  %v2182_v42 = vmul.f32 %v2181_v12, %v5173_v10  ;;  %vm5324_vm7 = vcmp.eq.f32.partialorder %v2155_v26, 8.507059e+37  ;;  %vm2153_vm8 = vmor %vm2151_vm4, %vm2152_vm6  ;;  %v5352_v12 = vld [vmem:[%s5488_s6] ss:$0 sm:$0xff]  ;;  %v2621_v62 = vpop.f32.mrf.mxu1 }
 0x334   : > { %v2120_v46 = vmul.f32 %v2119_v39, %v5251_v63  ;;  %v2028_v13 = vsub.f32 1.0, %v2027_v41  ;;  %v2060_v55 = vmul.f32 %v2059_v32, %v5150_v37  ;;  %v2158_v24 = vor.u32 1.1754944e-38, %v2157_v36 }
 0x335   : > { %v2150_v61 = vadd.f32 %v3390_v53, %v2149_v48  ;;  %v2183_v56 = vadd.f32 0.4994258, %v2182_v42  ;;  %v2218_v3 = vmul.f32 %v2217_v57, %v5206_v50  ;;  %v2267_v2 = vadd.f32 1.0, %v3014_v19 }
 0x336   : > { %v3018_v7 = vclamps-f32 %v2120_v46, 1.0  ;;  %v3015_v17 = vclamps-f32 %v2000_v34, 1.0  ;;  %v2061_v44 = vadd.f32 0.112945676, %v2060_v55  ;;  %v2029_v0 = vmul.f32 %v5312_v20, %v2028_v13 }
 0x337   : > { %v2154_v63 = vsel %vm2153_vm8, %v3390_v53, %v2150_v61  ;;  %v2184_v6 = vmul.f32 %v2183_v56, %v5173_v10  ;;  %v2219_v18 = vadd.f32 0.014752088, %v2218_v3  ;;  %v2171_v30 = vmul.f32 %v5254_v47, %v5173_v10  ;;  %v2592_v47 = vpop.f32.mrf.mxu0 }
 0x338   : > { %v2271_v43 = vadd.f32 1.0, %v3018_v7  ;;  %v2159_v35 = vsel %vm5324_vm7, %v2158_v24, %v2154_v63  ;;  %v2062_v29 = vmul.f32 %v2061_v44, %v5150_v37  ;;  %v2208_v8 = vadd.f32 0.0036580483, %v5257_v1  ;;  %v2650_v63 = vpop.f32.mrf.mxu2 }
 0x339   : > { %v2160_v14 = vmul.f32 %v2159_v35, %v5262_v5  ;;  %v5341_v23 = vadd.f32 1.0, %v2184_v6  ;;  %v2220_v53 = vmul.f32 %v2219_v18, %v5206_v50  ;;  %v2299_v4 = vmul.f32 %v2267_v2, %v5177_v49 }
 0x33a   : > { %v2303_v25 = vmul.f32 %v2271_v43, %v5185_v40  ;;  %v2268_v15 = vadd.f32 1.0, %v3015_v17  ;;  %v2063_v54 = vadd.f32 0.4994258, %v2062_v29  ;;  %v2030_v26 = vadd.f32 %v5312_v20, %v2029_v0  ;;  %v2679_v0 = vpop.f32.mrf.mxu3 }
 0x33b   : > { %v3019_v27 = vclamps-f32 %v2160_v14, 1.0  ;;  %vm2032_vm9 = vweird.f32 %v5312_v20  ;;  %3393 = vrcp.f32 %v5341_v23  ;;  %v2172_v1 = vadd.f32 0.18741608, %v2171_v30  ;;  %v2623_v29 = vpop.f32.mrf.mxu1 }
 0x33c   : > { %v2319_v5 = vpack.c.bf16 %v2303_v25, %v2299_v4  ;;  %vm2031_vm10 = vweird.f32 %v5282_v16  ;;  %v2037_v49 = vand.u32 2147483648, %v5282_v16  ;;  %v2035_v36 = vand.u32 2147483647, %v5282_v16 }
 0x33d   : > { %v2272_v40 = vadd.f32 1.0, %v3019_v27  ;;  %v2064_v32 = vmul.f32 %v2063_v54, %v5150_v37  ;;  %v2221_v57 = vadd.f32 0.112945676, %v2220_v53  ;;  %v2014_v19 = vadd.f32 1.1283791, %v5248_v59  ;;  %vm2033_vm11 = vmor %vm2031_vm10, %vm2032_vm9 }
 0x33e   : > { %v2209_v51 = vmul.f32 %v2208_v8, %v5206_v50  ;;  %2606 = vmatmul.bf16.gmra.mxu0 %v2319_v5  ;;  %v2300_v34 = vmul.f32 %v2268_v15, %v5180_v52  ;;  %v2034_v39 = vsel %vm2033_vm11, %v5312_v20, %v2030_v26  ;;  %v2051_v42 = vmul.f32 %v5236_v38, %v5150_v37 }
 0x33f   : > { %v2304_v41 = vmul.f32 %v2272_v40, %v5239_v22  ;;  %v5365_v48 = vadd.f32 1.0, %v2064_v32  ;;  %v2222_v16 = vmul.f32 %v2221_v57, %v5206_v50  ;;  %v2593_v59 = vadd.f32 %v5352_v12, %v2592_v47  ;;  %v2594_v7 = vpop.f32.mrf.mxu0 }
 0x340   : > { %v2038_v46 = vor.u32 1.1754944e-38, %v2037_v49  ;;  %v2173_v52 = vmul.f32 %v2172_v1, %v5173_v10  ;;  %vm2036_vm12 = vcmp.eq.f32.partialorder %v2035_v36, 8.507059e+37  ;;  %v2015_v55 = vmul.f32 %v2014_v19, %v5099_v21  ;;  %v2652_v19 = vpop.f32.mrf.mxu2 }
 0x341   : > { %v3394_v28 = vpop.eup %3393  ;;  %v2320_v13 = vpack.c.bf16 %v2304_v41, %v2300_v34  ;;  %3395 = vrcp.f32 %v5365_v48  ;;  %v2210_v61 = vadd.f32 0.05243302, %v2209_v51  ;;  %v2223_v24 = vadd.f32 0.4994258, %v2222_v16 }
 0x342   : > { %v2039_v22 = vsel %vm2036_vm12, %v2038_v46, %v2034_v39  ;;  %v2187_v20 = vmul.f32 %v3394_v28, %v5341_v23  ;;  %v2052_v56 = vadd.f32 0.18741608, %v2051_v42  ;;  %v2622_v38 = vadd.f32 %v2621_v62, %v2593_v59  ;;  %v2681_v51 = vpop.f32.mrf.mxu3 }
 0x343   : > { %2635 = vmatmul.bf16.gmra.mxu1 %v2320_v13  ;;  %v2174_v2 = vadd.f32 1.1283791, %v2173_v52  ;;  %v2040_v17 = vmul.f32 %v2039_v22, %v2015_v55  ;;  %v2197_v10 = vand.u32 2147483648, %v5341_v23  ;;  %v2224_v44 = vmul.f32 %v2223_v24, %v5206_v50 }
 0x344   : > { %v2188_v3 = vsub.f32 1.0, %v2187_v20  ;;  %vm2192_vm13 = vweird.f32 %v3394_v28  ;;  %v2195_v18 = vand.u32 2147483647, %v5341_v23  ;;  %v2651_v21 = vadd.f32 %v2650_v63, %v2622_v38  ;;  %v2626_v20 = vpop.f32.mrf.mxu1 }
 0x345   : > { %v2211_v43 = vmul.f32 %v2210_v61, %v5206_v50  ;;  %vm2191_vm14 = vweird.f32 %v5341_v23  ;;  %v5380_v35 = vadd.f32 1.0, %v2224_v44  ;;  %v2595_v53 = vadd.f32 %v5352_v12, %v2594_v7 }
 0x346   : > { %v2189_v6 = vmul.f32 %v3394_v28, %v2188_v3  ;;  %v2680_v4 = vadd.f32 %v2679_v0, %v2651_v21  ;;  %v2053_v25 = vmul.f32 %v2052_v56, %v5150_v37  ;;  %v3016_v15 = vclamps-f32 %v2040_v17, 1.0  ;;  %vm2193_vm15 = vmor %vm2191_vm14, %vm2192_vm13 }
 0x347   : > { %v3396_v30 = vpop.eup %3395  ;;  %v2198_v47 = vor.u32 1.1754944e-38, %v2197_v10  ;;  %3397 = vrcp.f32 %v5380_v35  ;;  %v2175_v54 = vmul.f32 %v2174_v2, %v5158_v45  ;;  %vm2196_vm0 = vcmp.eq.f32.partialorder %v2195_v18, 8.507059e+37  ;;  %v2597_v36 = vpop.f32.mrf.mxu0 }
 0x348   : > { %v2190_v8 = vadd.f32 %v3394_v28, %v2189_v6  ;;  %v2067_v14 = vmul.f32 %v3396_v30, %v5365_v48  ;;  %2699 = vst [vmem:[%s5389_s11] sm:$0xff] %v2680_v4  ;;  %v2212_v26 = vadd.f32 0.18741608, %v2211_v43  ;;  %v2075_v5 = vand.u32 2147483647, %v5365_v48  ;;  %v2655_v44 = vpop.f32.mrf.mxu2 }
 0x349   : > { %v2077_v37 = vand.u32 2147483648, %v5365_v48  ;;  %vm2072_vm1 = vweird.f32 %v3396_v30  ;;  %v2624_v62 = vadd.f32 %v2623_v29, %v2595_v53  ;;  %v925_v45 = vmul.f32 0.5, %v5074_v11 }
 0x34a   : > { %v2194_v23 = vsel %vm2193_vm15, %v3394_v28, %v2190_v8  ;;  %v2068_v27 = vsub.f32 1.0, %v2067_v14  ;;  %v2054_v32 = vadd.f32 1.1283791, %v2053_v25  ;;  %v2269_v57 = vadd.f32 1.0, %v3016_v15 }
 0x34b   : > { %v2199_v1 = vsel %vm2196_vm0, %v2198_v47, %v2194_v23  ;;  %vm2071_vm2 = vweird.f32 %v5365_v48  ;;  %v2653_v39 = vadd.f32 %v2652_v19, %v2624_v62  ;;  %v929_v42 = vmul.f32 0.5, %v5143_v58 }
 0x34c   : > { %v2200_v49 = vmul.f32 %v2199_v1, %v2175_v54  ;;  %v2069_v40 = vmul.f32 %v3396_v30, %v2068_v27  ;;  %v2213_v59 = vmul.f32 %v2212_v26, %v5206_v50  ;;  %vm2073_vm3 = vmor %vm2071_vm2, %vm2072_vm1  ;;  %v2078_v46 = vor.u32 1.1754944e-38, %v2077_v37  ;;  %v2628_v53 = vpop.f32.mrf.mxu1 }
 0x34d   : > { %v3398_v16 = vpop.eup %3397  ;;  %v2598_v28 = vadd.f32 %v5352_v12, %v2597_v36  ;;  %vm2076_vm4 = vcmp.eq.f32.partialorder %v2075_v5, 8.507059e+37  ;;  %v2682_v48 = vadd.f32 %v2681_v51, %v2653_v39  ;;  %v2055_v55 = vmul.f32 %v2054_v32, %v5124_v60 }
 0x34e   : > { %v3020_v34 = vclamps-f32 %v2200_v49, 1.0  ;;  %v2070_v41 = vadd.f32 %v3396_v30, %v2069_v40  ;;  %v2227_v13 = vmul.f32 %v3398_v16, %v5380_v35  ;;  %v2301_v61 = vmul.f32 %v2269_v57, %v925_v45 }
 0x34f   : > { %v2214_v50 = vadd.f32 1.1283791, %v2213_v59  ;;  %v2235_v56 = vand.u32 2147483647, %v5380_v35  ;;  %v2237_v38 = vand.u32 2147483648, %v5380_v35  ;;  %v2627_v3 = vadd.f32 %v2626_v20, %v2598_v28  ;;  %2700 = vst [vmem:[%s5389_s11 + $0x8] sm:$0xff] %v2682_v48  ;;  %v2599_v10 = vpop.f32.mrf.mxu0 }
 0x350   : > { %v2273_v11 = vadd.f32 1.0, %v3020_v34  ;;  %v2074_v52 = vsel %vm2073_vm3, %v3396_v30, %v2070_v41  ;;  %v2228_v24 = vsub.f32 1.0, %v2227_v13  ;;  %vm2232_vm5 = vweird.f32 %v3398_v16 }
 0x351   : > { %v2079_v22 = vsel %vm2076_vm4, %v2078_v46, %v2074_v52  ;;  %vm2231_vm6 = vweird.f32 %v5380_v35  ;;  %v2656_v0 = vadd.f32 %v2655_v44, %v2627_v3  ;;  %v2215_v6 = vmul.f32 %v2214_v50, %v5188_v9  ;;  %v2657_v35 = vpop.f32.mrf.mxu2 }
 0x352   : > { %v2305_v58 = vmul.f32 %v2273_v11, %v929_v42  ;;  %v2080_v2 = vmul.f32 %v2079_v22, %v2055_v55  ;;  %v2229_v17 = vmul.f32 %v3398_v16, %v2228_v24  ;;  %vm2233_vm7 = vmor %vm2231_vm6, %vm2232_vm5  ;;  %vm2236_vm8 = vcmp.eq.f32.partialorder %v2235_v56, 8.507059e+37 }
 0x353   : > { %v2238_v18 = vor.u32 1.1754944e-38, %v2237_v38  ;;  %v2600_v43 = vadd.f32 %v5352_v12, %v2599_v10  ;;  %v926_v47 = vmul.f32 0.5, %v5112_v33  ;;  %v930_v9 = vmul.f32 0.5, %v5169_v31 }
 0x354   : > { %v2321_v7 = vpack.c.bf16 %v2305_v58, %v2301_v61  ;;  %v2230_v60 = vadd.f32 %v3398_v16, %v2229_v17  ;;  %v3017_v21 = vclamps-f32 %v2080_v2, 1.0 }
 0x355   : > { %v2629_v15 = vadd.f32 %v2628_v53, %v2600_v43 }
 0x356   : > { %2664 = vmatmul.bf16.gmra.mxu2 %v2321_v7  ;;  %v2234_v30 = vsel %vm2233_vm7, %v3398_v16, %v2230_v60  ;;  %v2270_v25 = vadd.f32 1.0, %v3017_v21 }
 0x357   : > { %v2239_v8 = vsel %vm2236_vm8, %v2238_v18, %v2234_v30  ;;  %v2658_v23 = vadd.f32 %v2657_v35, %v2629_v15 }
 0x358   : > { %v2684_v63 = vpop.f32.mrf.mxu3  ;;  %v2240_v14 = vmul.f32 %v2239_v8, %v2215_v6  ;;  %v2302_v26 = vmul.f32 %v2270_v25, %v926_v47 }
 0x359   : > { %v2685_v29 = vadd.f32 %v2684_v63, %v2656_v0 }
 0x35a   : > { %v3021_v4 = vclamps-f32 %v2240_v14, 1.0 }
 0x35b   : > { %2701 = vst [vmem:[%s5389_s11 + $0x10] sm:$0xff] %v2685_v29 }
 0x35c   : > { %v2274_v54 = vadd.f32 1.0, %v3021_v4 }
 0x35e   : > { %v2306_v1 = vmul.f32 %v2274_v54, %v930_v9 }
 0x360   : > { %v2686_v27 = vpop.f32.mrf.mxu3  ;;  %v2322_v37 = vpack.c.bf16 %v2306_v1, %v2302_v26 }
 0x361   : > { %v2687_v5 = vadd.f32 %v2686_v27, %v2658_v23  ;;  %v2602_v49 = vpop.f32.mrf.mxu0 }
 0x362   : > { %2693 = vmatmul.bf16.gmra.mxu3 %v2322_v37  ;;  %v2603_v40 = vadd.f32 %v5352_v12, %v2602_v49 }
 0x363   : > { %2702 = vst [vmem:[%s5389_s11 + $0x18] sm:$0xff] %v2687_v5 }
 0x369   : > { %v2631_v62 = vpop.f32.mrf.mxu1  ;;  %v2604_v33 = vpop.f32.mrf.mxu0 }
 0x36a   : > { %v2632_v45 = vadd.f32 %v2631_v62, %v2603_v40  ;;  %v2605_v31 = vadd.f32 %v5352_v12, %v2604_v33 }
 0x371   : > { %v2633_v51 = vpop.f32.mrf.mxu1 }
 0x372   : > { %v2634_v41 = vadd.f32 %v2633_v51, %v2605_v31 }
 0x382   : > { %v2660_v36 = vpop.f32.mrf.mxu2 }
 0x383   : > { %v2661_v32 = vadd.f32 %v2660_v36, %v2632_v45 }
 0x38a   : > { %v2662_v34 = vpop.f32.mrf.mxu2 }
 0x38b   : > { %v2663_v39 = vadd.f32 %v2662_v34, %v2634_v41 }
 0x390   : > { %v2689_v57 = vpop.f32.mrf.mxu3 }
 0x391   : > { %v2690_v19 = vadd.f32 %v2689_v57, %v2661_v32 }
 0x393   : > { %2703 = vst [vmem:[%s5389_s11 + $0x20] sm:$0xff] %v2690_v19 }
 0x398   : > { %v2691_v16 = vpop.f32.mrf.mxu3 }
 0x399   : > { %v2692_v42 = vadd.f32 %v2691_v16, %v2663_v39 }
 0x39b   : > { %2704 = vst [vmem:[%s5389_s11 + $0x28] sm:$0xff] %v2692_v42 }
 0x3bb   : > { %v2607_v59 = vpop.f32.mrf.mxu0 }
 0x3bc   : > { %v2608_v46 = vadd.f32 %v5352_v12, %v2607_v59 }
 0x3c0   : > { %v2636_v28 = vpop.f32.mrf.mxu1 }
 0x3c1   : > { %v2637_v52 = vadd.f32 %v2636_v28, %v2608_v46 }
 0x3c3   : > { %v2609_v13 = vpop.f32.mrf.mxu0 }
 0x3c4   : > { %v2610_v20 = vadd.f32 %v5352_v12, %v2609_v13 }
 0x3c8   : > { %v2638_v61 = vpop.f32.mrf.mxu1 }
 0x3c9   : > { %v2639_v24 = vadd.f32 %v2638_v61, %v2610_v20 }
 0x3d9   : > { %v2665_v11 = vpop.f32.mrf.mxu2 }
 0x3da   : > { %v2666_v22 = vadd.f32 %v2665_v11, %v2637_v52 }
 0x3e1   : > { %v2667_v58 = vpop.f32.mrf.mxu2 }
 0x3e2   : > { %v2668_v50 = vadd.f32 %v2667_v58, %v2639_v24 }
 0x3e5   : > { %v2694_v48 = vpop.f32.mrf.mxu3 }
 0x3e6   : > { %v2695_v55 = vadd.f32 %v2694_v48, %v2666_v22 }
 0x3e8   : > { %2705 = vst [vmem:[%s5389_s11 + $0x30] sm:$0xff] %v2695_v55 }
 0x3ec   : > { %2714 = sbr.rel (!%p3752_p11) target bundleno = 1040 (0x410), region = 72 }
 0x3ed   : > { %v2696_v56 = vpop.f32.mrf.mxu3 }
 0x3ee   : > { %v2697_v38 = vadd.f32 %v2696_v56, %v2668_v50 }
 0x3f0   : > { %2706 = vst [vmem:[%s5389_s11 + $0x38] sm:$0xff] %v2697_v38 }
 0x3f1   : > { %s5649_s1 = smov (!%p2717_p6, %s2716_s1), 8 }
 0x3f2   : > { %s3152_s18 = sshll.u32 %s5649_s1, 3 }
 0x3f3   : > { %s2720_s20 = ssub.s32 64, %s3152_s18 }
 0x3f4   : > { %s2721_s19 = sshll.u32 %s2720_s20, 4 }
 0x3f5   : > { %2722 = vsyncadd %s2708_s16, %s2721_s19  ;;  %p5429_p9 = scmp.ne.s32.totalorder %s3152_s18, 0  ;;  %s3224_s29 = sshll.u32 %s3721_s28, 6 }
 0x3f6   : > { %s2725_s21 = scalar_lea.hbm %s5489_s7, %s3224_s29  ;;  %s2727_s22 = sshll.u32 %s5389_s11, 4  ;;  %s5438_s22 = int_to_ptr.vmem [resolvable:$true] %s2727_s22 }
 0x3f7   : > { %s2729_s8 = sshll.u32 %s2725_s21, 4  ;;  %s3156_s12 = sshll.u32 %s5649_s1, 7  ;;  %s5440_s8 = int_to_ptr.hbm [resolvable:$true] %s2729_s8 }
 0x3f8   : > { %s3558_s15 = sshra.s32 %s5438_s22, 4  ;;  %s3560_s23 = sshrl.u32 %s3156_s12, 4  ;;  %s3559_s15 = int_to_ptr.vmem [resolvable:$true] %s3558_s15 }
 0x3f9   : > { %s3565_s30 = scalar_lea.vmem %s3559_s15, %s3560_s23  ;;  %s3657_s28 = smov [#allocation11]  }
 0x3fa   : > { %p3566_p11 = scmp.ne.s32.totalorder %s3559_s15, %s3565_s30  ;;  %s3569_s17 = scalar_lea.vmem %s3657_s28, 128 }
 0x3fb   : > { %p3571_p0 = scmp.lt.s32.totalorder %s3569_s17, %s3565_s30 }
 0x3fc   : > { %p3567_p10 = pnand %p3566_p11, %p5429_p9 }
 0x3fe   : > { %p3568_p1 = pneg %p3567_p10 }
 0x400   : > { %p3573_p2 = pnand %p3571_p0, %p3568_p1 }
 0x402   : > { %3576 = shalt.err (!%p3573_p2)
}
 0x403   : > { %s3577_s11 = sshra.s32 %s5440_s8, 4  ;;  %s3588_s29 = scalar_lea.hbm %s5489_s7, 200  ;;  %s3578_s11 = int_to_ptr.hbm [resolvable:$true] %s3577_s11 }
 0x404   : > { %s3584_s18 = scalar_lea.hbm %s3578_s11, %s3560_s23  ;;  %p3589_p4 = scmp.lt.s32.totalorder %s3578_s11, %s5489_s7 }
 0x405   : > { %p3585_p3 = scmp.ne.s32.totalorder %s3578_s11, %s3584_s18  ;;  %p3590_p12 = scmp.lt.s32.totalorder %s3588_s29, %s3584_s18 }
 0x407   : > { %p3586_p7 = pnand %p3585_p3, %p5429_p9  ;;  %p3591_p13 = por %p3590_p12, %p3589_p4 }
 0x409   : > { %p3587_p8 = pneg %p3586_p7 }
 0x40b   : > { %p3592_p5 = pnand %p3591_p13, %p3587_p8 }
 0x40d   : > { %3595 = shalt.err (!%p3592_p5)
}
 0x40e   : > { %s3658_s21 = smov 128   ;;  %s3659_s15 = smov 8  }
 0x40f   : > { %2735 = dma.vmem_to_hbm [thread:$0]  (%p5429_p9), %s5438_s22, %s3156_s12, %s5440_s8, %s2708_s16, %s3658_s21, %s3658_s21, %s3659_s15  }
 0x410 PF: > { %p3268_p6 = scmp.ge.s32.totalorder %s3643_s27, 2  ;;  %s2744_s23 = sand.u32 1, %s3631_s24  }
 0x411   : > { %p5640_p11 = scmp.ne.s32.totalorder %s5521_s14, 0  ;;  %s2745_s30 = scalar_lea.sflag [#allocation4], %s2744_s23 }
 0x413   : > { %p3257_p10 = pnand %p3268_p6, %p5640_p11 }
 0x415   : > { %p3258_p1 = pneg %p3257_p10 }
 0x417   : > { %3626 = dma.done.wait (%p3258_p1), %s2745_s30, 1024  }
 0x418   : > { %3628 = vsyncadd (%p3258_p1), %s2745_s30, 4294966272  ;;  %s5641_s27 = sld [smem:[#allocation16_spill]]  ;;  %s5643_s24 = smov %s3635_s25 }
 0x419   : > { %s5642_s13 = sld [smem:[#allocation17_spill]]  ;;  %s5644_s25 = smov %s3639_s26 }
 0x41e   : > { %p22_p0 = scmp.ge.s32.totalorder %s5641_s27, 6  }
 0x41f   : > { %s5645_s26 = smov %s5642_s13 }
 0x420   :  { %24 = sbr.rel (!%p22_p0) target bundleno = 10 (0xa), region = 109 }
 0x425   :  { %2751 = vsyncpa [#allocation3], 1 }
 0x426   :  { %2753 = vsyncpa [#allocation3 + $0x1], 1 }
 0x427   :  { %2754 = vsyncpa [#allocation6], 1 }
 0x428   :  { %2755 = vsyncpa [#allocation9], 1 }
 0x429   :  { %2756 = vsyncpa [#allocation4], 1 }
 0x42a   :  { %2758 = vsyncpa [#allocation4 + $0x1], 1 }

</bundles_post_ra>
